<compile_context>
chip_gen: v6e
topology: v6e:2x2x1
jax: 0.10.0
libtpu: 0.0.40
codegen_flags: <defaults>
</compile_context>

<pallas_src>
import jax
import jax.numpy as jnp
from jax.experimental import pallas as pl
from jax.experimental.pallas import tpu as pltpu

NSUMS = 9
(IDX_GA_H, IDX_GA_V, IDX_GS_H, IDX_GS_V,
 IDX_PG, IDX_PP, IDX_GG, IDX_WA, IDX_WS) = range(NSUMS)


def _energy_partials_kernel(alb_p_ref, sha_p_ref, alb_in_ref, sha_in_ref,
                            img_ref, part_ref):
    i = pl.program_id(1)
    C, TH, W = alb_p_ref.shape
    nstrips = TH // 8

    @pl.when(i == 0)
    def _init():
        part_ref[...] = jnp.zeros_like(part_ref)

    zero8 = jnp.zeros((8, W), jnp.float32)
    acc_ga_h = zero8
    acc_gs_h = zero8
    acc_ga_v = zero8
    acc_gs_v = zero8
    acc_pg = zero8
    acc_pp = zero8
    acc_gg = zero8
    acc_wa = zero8
    acc_ws = zero8

    row8 = jax.lax.broadcasted_iota(jnp.int32, (8, W), 0)
    lane8 = jax.lax.broadcasted_iota(jnp.int32, (8, W), 1)
    v_ok = row8 < 6           # within-strip vertical validity (first strip only)
    h_ok = lane8 < (W - 2)    # horizontal validity, applied once at the end

    for c in range(C):
        a_tail = None
        s_tail = None
        for s in range(nstrips):
            r = s * 8
            # Per-channel, per-strip loads: working set stays a few vregs.
            ap_par = alb_p_ref[c, r:r + 8, :]
            sp_par = sha_p_ref[c, r:r + 8, :]
            ap = ap_par + alb_in_ref[c, r:r + 8, :]
            sp = sp_par + sha_in_ref[c, r:r + 8, :]
            im = img_ref[c, r:r + 8, :]

            # Horizontal stride-2 forward diffs (lane roll).  The two wrap
            # lanes accumulate garbage that is masked out once at the end.
            d = ap - pltpu.roll(ap, W - 2, axis=1)
            acc_ga_h = acc_ga_h + jnp.abs(d)
            d = sp - pltpu.roll(sp, W - 2, axis=1)
            acc_gs_h = acc_gs_h + d * d

            # Vertical stride-2 forward diffs (sublane roll).
            # roll(x, 6)[i] == x[(i + 2) % 8]: rows 0..5 pair inside the
            # strip; rows 6,7 pair with the previous strip's rows 6,7 via a
            # single row-select (no partial stores, no carries).
            ap_roll = pltpu.roll(ap, 6, axis=0)
            sp_roll = pltpu.roll(sp, 6, axis=0)
            if s == 0:
                d = jnp.where(v_ok, ap - ap_roll, 0.0)
                acc_ga_v = acc_ga_v + jnp.abs(d)
                d = jnp.where(v_ok, sp - sp_roll, 0.0)
                acc_gs_v = acc_gs_v + d * d
            else:
                d = jnp.where(v_ok, ap, a_tail) - ap_roll
                acc_ga_v = acc_ga_v + jnp.abs(d)
                d = jnp.where(v_ok, sp, s_tail) - sp_roll
                acc_gs_v = acc_gs_v + d * d
            a_tail = ap
            s_tail = sp

            # Reconstruction / least-squares statistics and weight decay.
            pr = ap * sp
            acc_pg = acc_pg + pr * im
            acc_pp = acc_pp + pr * pr
            acc_gg = acc_gg + im * im
            acc_wa = acc_wa + ap_par * ap_par
            acc_ws = acc_ws + sp_par * sp_par

    part_ref[0, IDX_GA_H] += jnp.where(h_ok, acc_ga_h, 0.0)
    part_ref[0, IDX_GS_H] += jnp.where(h_ok, acc_gs_h, 0.0)
    part_ref[0, IDX_GA_V] += acc_ga_v
    part_ref[0, IDX_GS_V] += acc_gs_v
    part_ref[0, IDX_PG] += acc_pg
    part_ref[0, IDX_PP] += acc_pp
    part_ref[0, IDX_GG] += acc_gg
    part_ref[0, IDX_WA] += acc_wa
    part_ref[0, IDX_WS] += acc_ws


def albedo_shading_energy(albedo_param, shading_param, albedo_input,
                          shading_input, image_input, hy_lamdas,
                          *, tile_h=64, num_row_splits=1):
    """Forward pass of Albedo_Shading_Joint_Opt_Model. Returns (energy, reconst).

    num_row_splits=1 is best on single-TensorCore chips (v5e/v6e); pass 2 on
    2-TC chips (v7x) so the "parallel" grid axis covers both cores.
    """
    C, H, W = albedo_param.shape
    assert W % 128 == 0, "W must be a multiple of 128 for the lane layout"
    assert H % 8 == 0, "H must be a multiple of 8"

    if num_row_splits < 1:
        raise ValueError("num_row_splits must be >= 1")
    if H % num_row_splits != 0 or (H // num_row_splits) % 8 != 0:
        # Raise instead of silently falling back (silent 2x loss on 2-TC chips).
        raise ValueError("num_row_splits must divide H into multiples of 8")
    rows_per_split = H // num_row_splits

    # Keep tile_h in the 64-128 range (double-buffered inputs stay well inside
    # the scoped VMEM limit on every TPU generation).
    tile_h = max(8, min(tile_h, rows_per_split))
    tile_h -= tile_h % 8
    while rows_per_split % tile_h != 0:
        tile_h -= 8
    assert tile_h >= 8
    steps = rows_per_split // tile_h

    in_blk = pl.BlockSpec((C, tile_h, W), lambda s, i: (0, s * steps + i, 0))
    out_blk = pl.BlockSpec((1, NSUMS, 8, W), lambda s, i: (s, 0, 0, 0))

    cost = pl.CostEstimate(
        flops=int(30 * C * H * W),
        transcendentals=0,
        bytes_accessed=int(5 * C * H * W * 4 + num_row_splits * NSUMS * 8 * W * 4),
    )

    # TODO(synk): on v7x verify axis 0 actually shards across both TensorCores
    # (if not, switch to pltpu.CORE_PARALLEL / a core_map over a 2-core mesh).
    part = pl.pallas_call(
        _energy_partials_kernel,
        out_shape=jax.ShapeDtypeStruct((num_row_splits, NSUMS, 8, W), jnp.float32),
        grid=(num_row_splits, steps),
        in_specs=[in_blk] * 5,
        out_specs=out_blk,
        compiler_params=pltpu.CompilerParams(
            dimension_semantics=("parallel", "arbitrary")),
        cost_estimate=cost,
    )(albedo_param, shading_param, albedo_input, shading_input, image_input)

    sums = jnp.sum(part, axis=(0, 2, 3))  # (NSUMS,)

    # Patch the vertical pairs straddling every internal tile boundary (the
    # kernel intentionally skips the last two rows of each tile); this touches
    # only a few rows of HBM and removes all carry state from the hot loop.
    ga_v_seam = jnp.float32(0.0)
    gs_v_seam = jnp.float32(0.0)
    ntiles = H // tile_h
    for t in range(1, ntiles):
        r = t * tile_h
        a_top = albedo_param[:, r - 2:r, :] + albedo_input[:, r - 2:r, :]
        a_bot = albedo_param[:, r:r + 2, :] + albedo_input[:, r:r + 2, :]
        s_top = shading_param[:, r - 2:r, :] + shading_input[:, r - 2:r, :]
        s_bot = shading_param[:, r:r + 2, :] + shading_input[:, r:r + 2, :]
        ga_v_seam = ga_v_seam + jnp.sum(jnp.abs(a_top - a_bot))
        gs_v_seam = gs_v_seam + jnp.sum((s_top - s_bot) ** 2)

    s_ga_v = sums[IDX_GA_V] + ga_v_seam
    s_gs_v = sums[IDX_GS_V] + gs_v_seam

    n_h = C * H * (W - 2)
    n_v = C * (H - 2) * W
    n = C * H * W

    l1_norm = (sums[IDX_GA_H] / n_h + s_ga_v / n_v) / 2.0
    l2_norm = (sums[IDX_GS_H] / n_h + s_gs_v / n_v) / 2.0

    s_pg, s_pp, s_gg = sums[IDX_PG], sums[IDX_PP], sums[IDX_GG]
    # torch.lstsq on a single column == closed-form 1-parameter least squares
    # (detached in the original module, so the forward value is identical).
    scale = s_pg / s_pp
    reconst = (s_gg - 2.0 * scale * s_pg + scale * scale * s_pp) / n

    wd_a = sums[IDX_WA] / n
    wd_s = sums[IDX_WS] / n

    lam = hy_lamdas
    energy = (lam[0] * reconst + lam[1] * l1_norm + lam[2] * l2_norm
              + lam[3] * wd_a + lam[4] * wd_s)
    return energy, reconst


def _reference(albedo_param, shading_param, albedo_input, shading_input,
               image_input, lam):
    """Pure-JAX transcription of the PyTorch forward (for verification)."""
    a_pred = albedo_param + albedo_input
    s_pred = shading_param + shading_input
    ga_h = a_pred[:, :, :-2] - a_pred[:, :, 2:]
    ga_v = a_pred[:, :-2, :] - a_pred[:, 2:, :]
    l1 = (jnp.mean(jnp.abs(ga_h)) + jnp.mean(jnp.abs(ga_v))) / 2.0
    gs_h = s_pred[:, :, :-2] - s_pred[:, :, 2:]
    gs_v = s_pred[:, :-2, :] - s_pred[:, 2:, :]
    l2 = (jnp.mean(gs_h ** 2) + jnp.mean(gs_v ** 2)) / 2.0
    pred = a_pred * s_pred
    scale = jnp.sum(pred * image_input) / jnp.sum(pred * pred)
    reconst = jnp.mean((image_input - pred * scale) ** 2)
    wd_a = jnp.mean(albedo_param ** 2)
    wd_s = jnp.mean(shading_param ** 2)
    energy = (lam[0] * reconst + lam[1] * l1 + lam[2] * l2
              + lam[3] * wd_a + lam[4] * wd_s)
    return energy, reconst


if __name__ == "__main__":
    key = jax.random.PRNGKey(0)
    C, H, W = 3, 256, 256  # small stand-in for the real (3, 512, 1024)
    k1, k2, k3, k4, k5 = jax.random.split(key, 5)

    # nn.Parameter defaults are zeros; use small deterministic values so that
    # the weight-decay terms are exercised too.
    albedo_param = 0.01 * jax.random.normal(k1, (C, H, W), jnp.float32)
    shading_param = 0.01 * jax.random.normal(k2, (C, H, W), jnp.float32)
    albedo_input = jax.random.uniform(k3, (C, H, W), dtype=jnp.float32)
    shading_input = jax.random.uniform(k4, (C, H, W), dtype=jnp.float32)
    image_input = jax.random.uniform(k5, (C, H, W), dtype=jnp.float32)
    hy_lamdas = (1.0, 0.1, 0.2, 1e-3, 1e-3)

    energy, reconst = albedo_shading_energy(
        albedo_param, shading_param, albedo_input, shading_input, image_input,
        hy_lamdas, tile_h=64, num_row_splits=1)
    jax.block_until_ready((energy, reconst))

    ref_energy, ref_reconst = _reference(
        albedo_param, shading_param, albedo_input, shading_input, image_input,
        hy_lamdas)

    assert jnp.allclose(energy, ref_energy, rtol=2e-3, atol=1e-5), (
        energy, ref_energy)
    assert jnp.allclose(reconst, ref_reconst, rtol=2e-3, atol=1e-5), (
        reconst, ref_reconst)
    print("KERNEL_OK")
</pallas_src>

<mosaic_0001>
module attributes {stable_mosaic.version = 11 : i64} {
  func.func @_energy_partials_kernel(%arg0: i32, %arg1: i32, %arg2: memref<3x64x256xf32, #tpu.memory_space<vmem>>, %arg3: memref<3x64x256xf32, #tpu.memory_space<vmem>>, %arg4: memref<3x64x256xf32, #tpu.memory_space<vmem>>, %arg5: memref<3x64x256xf32, #tpu.memory_space<vmem>>, %arg6: memref<3x64x256xf32, #tpu.memory_space<vmem>>, %arg7: memref<1x9x8x256xf32, #tpu.memory_space<vmem>>) attributes {dimension_semantics = [#tpu.dimension_semantics<parallel>, #tpu.dimension_semantics<arbitrary>], iteration_bounds = array<i64: 1, 4>, scalar_prefetch = 0 : i64, scratch_operands = 0 : i64, tpu.core_type = #tpu.core_type<tc>, window_params = [{transform_indices = @transform_0, window_bounds = array<i64: 3, 64, 256>}, {transform_indices = @transform_1, window_bounds = array<i64: 3, 64, 256>}, {transform_indices = @transform_2, window_bounds = array<i64: 3, 64, 256>}, {transform_indices = @transform_3, window_bounds = array<i64: 3, 64, 256>}, {transform_indices = @transform_4, window_bounds = array<i64: 3, 64, 256>}, {transform_indices = @transform_5, window_bounds = array<i64: 1, 9, 8, 256>}]} {
    %c0_i32 = arith.constant 0 : i32
    %0 = arith.cmpi eq, %arg1, %c0_i32 : i32
    %1 = arith.extui %0 : i1 to i32
    %c0_i32_0 = arith.constant 0 : i32
    %2 = arith.cmpi ne, %1, %c0_i32_0 : i32
    scf.if %2 {
      %cst_522 = arith.constant 0.000000e+00 : f32
      %1058 = vector.broadcast %cst_522 : f32 to vector<1x9x8x256xf32>
      %c0_523 = arith.constant 0 : index
      %c0_524 = arith.constant 0 : index
      %c0_525 = arith.constant 0 : index
      %c0_526 = arith.constant 0 : index
      %1059 = vector.load %arg7[%c0_523, %c0_524, %c0_525, %c0_526] : memref<1x9x8x256xf32, #tpu.memory_space<vmem>>, vector<1x9x8x256xf32>
      tpu.vector_store %arg7[%c0_523, %c0_524, %c0_525, %c0_526], %1058 {strides = array<i32>} : memref<1x9x8x256xf32, #tpu.memory_space<vmem>>, vector<1x9x8x256xf32>,
    } else {
    }
    %cst = arith.constant 0.000000e+00 : f32
    %3 = vector.broadcast %cst : f32 to vector<8x256xf32>
    %4 = tpu.iota {dimensions = array<i32: 0>} : vector<8x256xi32>
    %5 = tpu.iota {dimensions = array<i32: 1>} : vector<8x256xi32>
    %c6_i32 = arith.constant 6 : i32
    %6 = vector.broadcast %c6_i32 : i32 to vector<8x256xi32>
    %7 = arith.cmpi slt, %4, %6 : vector<8x256xi32>
    %c254_i32 = arith.constant 254 : i32
    %8 = vector.broadcast %c254_i32 : i32 to vector<8x256xi32>
    %9 = arith.cmpi slt, %5, %8 : vector<8x256xi32>
    %c0 = arith.constant 0 : index
    %c0_1 = arith.constant 0 : index
    %c0_2 = arith.constant 0 : index
    %10 = vector.load %arg2[%c0, %c0_1, %c0_2] : memref<3x64x256xf32, #tpu.memory_space<vmem>>, vector<1x8x256xf32>
    %11 = vector.shape_cast %10 : vector<1x8x256xf32> to vector<8x256xf32>
    %c0_3 = arith.constant 0 : index
    %c0_4 = arith.constant 0 : index
    %c0_5 = arith.constant 0 : index
    %12 = vector.load %arg3[%c0_3, %c0_4, %c0_5] : memref<3x64x256xf32, #tpu.memory_space<vmem>>, vector<1x8x256xf32>
    %13 = vector.shape_cast %12 : vector<1x8x256xf32> to vector<8x256xf32>
    %c0_6 = arith.constant 0 : index
    %c0_7 = arith.constant 0 : index
    %c0_8 = arith.constant 0 : index
    %14 = vector.load %arg4[%c0_6, %c0_7, %c0_8] : memref<3x64x256xf32, #tpu.memory_space<vmem>>, vector<1x8x256xf32>
    %15 = vector.shape_cast %14 : vector<1x8x256xf32> to vector<8x256xf32>
    %16 = arith.addf %11, %15 : vector<8x256xf32>
    %c0_9 = arith.constant 0 : index
    %c0_10 = arith.constant 0 : index
    %c0_11 = arith.constant 0 : index
    %17 = vector.load %arg5[%c0_9, %c0_10, %c0_11] : memref<3x64x256xf32, #tpu.memory_space<vmem>>, vector<1x8x256xf32>
    %18 = vector.shape_cast %17 : vector<1x8x256xf32> to vector<8x256xf32>
    %19 = arith.addf %13, %18 : vector<8x256xf32>
    %c0_12 = arith.constant 0 : index
    %c0_13 = arith.constant 0 : index
    %c0_14 = arith.constant 0 : index
    %20 = vector.load %arg6[%c0_12, %c0_13, %c0_14] : memref<3x64x256xf32, #tpu.memory_space<vmem>>, vector<1x8x256xf32>
    %21 = vector.shape_cast %20 : vector<1x8x256xf32> to vector<8x256xf32>
    %c254_i32_15 = arith.constant 254 : i32
    %22 = tpu.dynamic_rotate %16 by %c254_i32_15 dim 1 : vector<8x256xf32>, i32 -> vector<8x256xf32>
    %23 = arith.subf %16, %22 : vector<8x256xf32>
    %24 = math.absf %23 : vector<8x256xf32>
    %25 = arith.addf %3, %24 : vector<8x256xf32>
    %c254_i32_16 = arith.constant 254 : i32
    %26 = tpu.dynamic_rotate %19 by %c254_i32_16 dim 1 : vector<8x256xf32>, i32 -> vector<8x256xf32>
    %27 = arith.subf %19, %26 : vector<8x256xf32>
    %28 = arith.mulf %27, %27 : vector<8x256xf32>
    %29 = arith.addf %3, %28 : vector<8x256xf32>
    %c6_i32_17 = arith.constant 6 : i32
    %30 = tpu.dynamic_rotate %16 by %c6_i32_17 dim 0 : vector<8x256xf32>, i32 -> vector<8x256xf32>
    %c6_i32_18 = arith.constant 6 : i32
    %31 = tpu.dynamic_rotate %19 by %c6_i32_18 dim 0 : vector<8x256xf32>, i32 -> vector<8x256xf32>
    %32 = arith.subf %16, %30 : vector<8x256xf32>
    %cst_19 = arith.constant 0.000000e+00 : f32
    %33 = vector.broadcast %cst_19 : f32 to vector<8x256xf32>
    %34 = arith.select %7, %32, %33 : vector<8x256xi1>, vector<8x256xf32>
    %35 = math.absf %34 : vector<8x256xf32>
    %36 = arith.addf %3, %35 : vector<8x256xf32>
    %37 = arith.subf %19, %31 : vector<8x256xf32>
    %cst_20 = arith.constant 0.000000e+00 : f32
    %38 = vector.broadcast %cst_20 : f32 to vector<8x256xf32>
    %39 = arith.select %7, %37, %38 : vector<8x256xi1>, vector<8x256xf32>
    %40 = arith.mulf %39, %39 : vector<8x256xf32>
    %41 = arith.addf %3, %40 : vector<8x256xf32>
    %42 = arith.mulf %16, %19 : vector<8x256xf32>
    %43 = arith.mulf %42, %21 : vector<8x256xf32>
    %44 = arith.addf %3, %43 : vector<8x256xf32>
    %45 = arith.mulf %42, %42 : vector<8x256xf32>
    %46 = arith.addf %3, %45 : vector<8x256xf32>
    %47 = arith.mulf %21, %21 : vector<8x256xf32>
    %48 = arith.addf %3, %47 : vector<8x256xf32>
    %49 = arith.mulf %11, %11 : vector<8x256xf32>
    %50 = arith.addf %3, %49 : vector<8x256xf32>
    %51 = arith.mulf %13, %13 : vector<8x256xf32>
    %52 = arith.addf %3, %51 : vector<8x256xf32>
    %c0_21 = arith.constant 0 : index
    %c8 = arith.constant 8 : index
    %c0_22 = arith.constant 0 : index
    %53 = vector.load %arg2[%c0_21, %c8, %c0_22] : memref<3x64x256xf32, #tpu.memory_space<vmem>>, vector<1x8x256xf32>
    %54 = vector.shape_cast %53 : vector<1x8x256xf32> to vector<8x256xf32>
    %c0_23 = arith.constant 0 : index
    %c8_24 = arith.constant 8 : index
    %c0_25 = arith.constant 0 : index
    %55 = vector.load %arg3[%c0_23, %c8_24, %c0_25] : memref<3x64x256xf32, #tpu.memory_space<vmem>>, vector<1x8x256xf32>
    %56 = vector.shape_cast %55 : vector<1x8x256xf32> to vector<8x256xf32>
    %c0_26 = arith.constant 0 : index
    %c8_27 = arith.constant 8 : index
    %c0_28 = arith.constant 0 : index
    %57 = vector.load %arg4[%c0_26, %c8_27, %c0_28] : memref<3x64x256xf32, #tpu.memory_space<vmem>>, vector<1x8x256xf32>
    %58 = vector.shape_cast %57 : vector<1x8x256xf32> to vector<8x256xf32>
    %59 = arith.addf %54, %58 : vector<8x256xf32>
    %c0_29 = arith.constant 0 : index
    %c8_30 = arith.constant 8 : index
    %c0_31 = arith.constant 0 : index
    %60 = vector.load %arg5[%c0_29, %c8_30, %c0_31] : memref<3x64x256xf32, #tpu.memory_space<vmem>>, vector<1x8x256xf32>
    %61 = vector.shape_cast %60 : vector<1x8x256xf32> to vector<8x256xf32>
    %62 = arith.addf %56, %61 : vector<8x256xf32>
    %c0_32 = arith.constant 0 : index
    %c8_33 = arith.constant 8 : index
    %c0_34 = arith.constant 0 : index
    %63 = vector.load %arg6[%c0_32, %c8_33, %c0_34] : memref<3x64x256xf32, #tpu.memory_space<vmem>>, vector<1x8x256xf32>
    %64 = vector.shape_cast %63 : vector<1x8x256xf32> to vector<8x256xf32>
    %c254_i32_35 = arith.constant 254 : i32
    %65 = tpu.dynamic_rotate %59 by %c254_i32_35 dim 1 : vector<8x256xf32>, i32 -> vector<8x256xf32>
    %66 = arith.subf %59, %65 : vector<8x256xf32>
    %67 = math.absf %66 : vector<8x256xf32>
    %68 = arith.addf %25, %67 : vector<8x256xf32>
    %c254_i32_36 = arith.constant 254 : i32
    %69 = tpu.dynamic_rotate %62 by %c254_i32_36 dim 1 : vector<8x256xf32>, i32 -> vector<8x256xf32>
    %70 = arith.subf %62, %69 : vector<8x256xf32>
    %71 = arith.mulf %70, %70 : vector<8x256xf32>
    %72 = arith.addf %29, %71 : vector<8x256xf32>
    %c6_i32_37 = arith.constant 6 : i32
    %73 = tpu.dynamic_rotate %59 by %c6_i32_37 dim 0 : vector<8x256xf32>, i32 -> vector<8x256xf32>
    %c6_i32_38 = arith.constant 6 : i32
    %74 = tpu.dynamic_rotate %62 by %c6_i32_38 dim 0 : vector<8x256xf32>, i32 -> vector<8x256xf32>
    %75 = arith.select %7, %59, %16 : vector<8x256xi1>, vector<8x256xf32>
    %76 = arith.subf %75, %73 : vector<8x256xf32>
    %77 = math.absf %76 : vector<8x256xf32>
    %78 = arith.addf %36, %77 : vector<8x256xf32>
    %79 = arith.select %7, %62, %19 : vector<8x256xi1>, vector<8x256xf32>
    %80 = arith.subf %79, %74 : vector<8x256xf32>
    %81 = arith.mulf %80, %80 : vector<8x256xf32>
    %82 = arith.addf %41, %81 : vector<8x256xf32>
    %83 = arith.mulf %59, %62 : vector<8x256xf32>
    %84 = arith.mulf %83, %64 : vector<8x256xf32>
    %85 = arith.addf %44, %84 : vector<8x256xf32>
    %86 = arith.mulf %83, %83 : vector<8x256xf32>
    %87 = arith.addf %46, %86 : vector<8x256xf32>
    %88 = arith.mulf %64, %64 : vector<8x256xf32>
    %89 = arith.addf %48, %88 : vector<8x256xf32>
    %90 = arith.mulf %54, %54 : vector<8x256xf32>
    %91 = arith.addf %50, %90 : vector<8x256xf32>
    %92 = arith.mulf %56, %56 : vector<8x256xf32>
    %93 = arith.addf %52, %92 : vector<8x256xf32>
    %c0_39 = arith.constant 0 : index
    %c16 = arith.constant 16 : index
    %c0_40 = arith.constant 0 : index
    %94 = vector.load %arg2[%c0_39, %c16, %c0_40] : memref<3x64x256xf32, #tpu.memory_space<vmem>>, vector<1x8x256xf32>
    %95 = vector.shape_cast %94 : vector<1x8x256xf32> to vector<8x256xf32>
    %c0_41 = arith.constant 0 : index
    %c16_42 = arith.constant 16 : index
    %c0_43 = arith.constant 0 : index
    %96 = vector.load %arg3[%c0_41, %c16_42, %c0_43] : memref<3x64x256xf32, #tpu.memory_space<vmem>>, vector<1x8x256xf32>
    %97 = vector.shape_cast %96 : vector<1x8x256xf32> to vector<8x256xf32>
    %c0_44 = arith.constant 0 : index
    %c16_45 = arith.constant 16 : index
    %c0_46 = arith.constant 0 : index
    %98 = vector.load %arg4[%c0_44, %c16_45, %c0_46] : memref<3x64x256xf32, #tpu.memory_space<vmem>>, vector<1x8x256xf32>
    %99 = vector.shape_cast %98 : vector<1x8x256xf32> to vector<8x256xf32>
    %100 = arith.addf %95, %99 : vector<8x256xf32>
    %c0_47 = arith.constant 0 : index
    %c16_48 = arith.constant 16 : index
    %c0_49 = arith.constant 0 : index
    %101 = vector.load %arg5[%c0_47, %c16_48, %c0_49] : memref<3x64x256xf32, #tpu.memory_space<vmem>>, vector<1x8x256xf32>
    %102 = vector.shape_cast %101 : vector<1x8x256xf32> to vector<8x256xf32>
    %103 = arith.addf %97, %102 : vector<8x256xf32>
    %c0_50 = arith.constant 0 : index
    %c16_51 = arith.constant 16 : index
    %c0_52 = arith.constant 0 : index
    %104 = vector.load %arg6[%c0_50, %c16_51, %c0_52] : memref<3x64x256xf32, #tpu.memory_space<vmem>>, vector<1x8x256xf32>
    %105 = vector.shape_cast %104 : vector<1x8x256xf32> to vector<8x256xf32>
    %c254_i32_53 = arith.constant 254 : i32
    %106 = tpu.dynamic_rotate %100 by %c254_i32_53 dim 1 : vector<8x256xf32>, i32 -> vector<8x256xf32>
    %107 = arith.subf %100, %106 : vector<8x256xf32>
    %108 = math.absf %107 : vector<8x256xf32>
    %109 = arith.addf %68, %108 : vector<8x256xf32>
    %c254_i32_54 = arith.constant 254 : i32
    %110 = tpu.dynamic_rotate %103 by %c254_i32_54 dim 1 : vector<8x256xf32>, i32 -> vector<8x256xf32>
    %111 = arith.subf %103, %110 : vector<8x256xf32>
    %112 = arith.mulf %111, %111 : vector<8x256xf32>
    %113 = arith.addf %72, %112 : vector<8x256xf32>
    %c6_i32_55 = arith.constant 6 : i32
    %114 = tpu.dynamic_rotate %100 by %c6_i32_55 dim 0 : vector<8x256xf32>, i32 -> vector<8x256xf32>
    %c6_i32_56 = arith.constant 6 : i32
    %115 = tpu.dynamic_rotate %103 by %c6_i32_56 dim 0 : vector<8x256xf32>, i32 -> vector<8x256xf32>
    %116 = arith.select %7, %100, %59 : vector<8x256xi1>, vector<8x256xf32>
    %117 = arith.subf %116, %114 : vector<8x256xf32>
    %118 = math.absf %117 : vector<8x256xf32>
    %119 = arith.addf %78, %118 : vector<8x256xf32>
    %120 = arith.select %7, %103, %62 : vector<8x256xi1>, vector<8x256xf32>
    %121 = arith.subf %120, %115 : vector<8x256xf32>
    %122 = arith.mulf %121, %121 : vector<8x256xf32>
    %123 = arith.addf %82, %122 : vector<8x256xf32>
    %124 = arith.mulf %100, %103 : vector<8x256xf32>
    %125 = arith.mulf %124, %105 : vector<8x256xf32>
    %126 = arith.addf %85, %125 : vector<8x256xf32>
    %127 = arith.mulf %124, %124 : vector<8x256xf32>
    %128 = arith.addf %87, %127 : vector<8x256xf32>
    %129 = arith.mulf %105, %105 : vector<8x256xf32>
    %130 = arith.addf %89, %129 : vector<8x256xf32>
    %131 = arith.mulf %95, %95 : vector<8x256xf32>
    %132 = arith.addf %91, %131 : vector<8x256xf32>
    %133 = arith.mulf %97, %97 : vector<8x256xf32>
    %134 = arith.addf %93, %133 : vector<8x256xf32>
    %c0_57 = arith.constant 0 : index
    %c24 = arith.constant 24 : index
    %c0_58 = arith.constant 0 : index
    %135 = vector.load %arg2[%c0_57, %c24, %c0_58] : memref<3x64x256xf32, #tpu.memory_space<vmem>>, vector<1x8x256xf32>
    %136 = vector.shape_cast %135 : vector<1x8x256xf32> to vector<8x256xf32>
    %c0_59 = arith.constant 0 : index
    %c24_60 = arith.constant 24 : index
    %c0_61 = arith.constant 0 : index
    %137 = vector.load %arg3[%c0_59, %c24_60, %c0_61] : memref<3x64x256xf32, #tpu.memory_space<vmem>>, vector<1x8x256xf32>
    %138 = vector.shape_cast %137 : vector<1x8x256xf32> to vector<8x256xf32>
    %c0_62 = arith.constant 0 : index
    %c24_63 = arith.constant 24 : index
    %c0_64 = arith.constant 0 : index
    %139 = vector.load %arg4[%c0_62, %c24_63, %c0_64] : memref<3x64x256xf32, #tpu.memory_space<vmem>>, vector<1x8x256xf32>
    %140 = vector.shape_cast %139 : vector<1x8x256xf32> to vector<8x256xf32>
    %141 = arith.addf %136, %140 : vector<8x256xf32>
    %c0_65 = arith.constant 0 : index
    %c24_66 = arith.constant 24 : index
    %c0_67 = arith.constant 0 : index
    %142 = vector.load %arg5[%c0_65, %c24_66, %c0_67] : memref<3x64x256xf32, #tpu.memory_space<vmem>>, vector<1x8x256xf32>
    %143 = vector.shape_cast %142 : vector<1x8x256xf32> to vector<8x256xf32>
    %144 = arith.addf %138, %143 : vector<8x256xf32>
    %c0_68 = arith.constant 0 : index
    %c24_69 = arith.constant 24 : index
    %c0_70 = arith.constant 0 : index
    %145 = vector.load %arg6[%c0_68, %c24_69, %c0_70] : memref<3x64x256xf32, #tpu.memory_space<vmem>>, vector<1x8x256xf32>
    %146 = vector.shape_cast %145 : vector<1x8x256xf32> to vector<8x256xf32>
    %c254_i32_71 = arith.constant 254 : i32
    %147 = tpu.dynamic_rotate %141 by %c254_i32_71 dim 1 : vector<8x256xf32>, i32 -> vector<8x256xf32>
    %148 = arith.subf %141, %147 : vector<8x256xf32>
    %149 = math.absf %148 : vector<8x256xf32>
    %150 = arith.addf %109, %149 : vector<8x256xf32>
    %c254_i32_72 = arith.constant 254 : i32
    %151 = tpu.dynamic_rotate %144 by %c254_i32_72 dim 1 : vector<8x256xf32>, i32 -> vector<8x256xf32>
    %152 = arith.subf %144, %151 : vector<8x256xf32>
    %153 = arith.mulf %152, %152 : vector<8x256xf32>
    %154 = arith.addf %113, %153 : vector<8x256xf32>
    %c6_i32_73 = arith.constant 6 : i32
    %155 = tpu.dynamic_rotate %141 by %c6_i32_73 dim 0 : vector<8x256xf32>, i32 -> vector<8x256xf32>
    %c6_i32_74 = arith.constant 6 : i32
    %156 = tpu.dynamic_rotate %144 by %c6_i32_74 dim 0 : vector<8x256xf32>, i32 -> vector<8x256xf32>
    %157 = arith.select %7, %141, %100 : vector<8x256xi1>, vector<8x256xf32>
    %158 = arith.subf %157, %155 : vector<8x256xf32>
    %159 = math.absf %158 : vector<8x256xf32>
    %160 = arith.addf %119, %159 : vector<8x256xf32>
    %161 = arith.select %7, %144, %103 : vector<8x256xi1>, vector<8x256xf32>
    %162 = arith.subf %161, %156 : vector<8x256xf32>
    %163 = arith.mulf %162, %162 : vector<8x256xf32>
    %164 = arith.addf %123, %163 : vector<8x256xf32>
    %165 = arith.mulf %141, %144 : vector<8x256xf32>
    %166 = arith.mulf %165, %146 : vector<8x256xf32>
    %167 = arith.addf %126, %166 : vector<8x256xf32>
    %168 = arith.mulf %165, %165 : vector<8x256xf32>
    %169 = arith.addf %128, %168 : vector<8x256xf32>
    %170 = arith.mulf %146, %146 : vector<8x256xf32>
    %171 = arith.addf %130, %170 : vector<8x256xf32>
    %172 = arith.mulf %136, %136 : vector<8x256xf32>
    %173 = arith.addf %132, %172 : vector<8x256xf32>
    %174 = arith.mulf %138, %138 : vector<8x256xf32>
    %175 = arith.addf %134, %174 : vector<8x256xf32>
    %c0_75 = arith.constant 0 : index
    %c32 = arith.constant 32 : index
    %c0_76 = arith.constant 0 : index
    %176 = vector.load %arg2[%c0_75, %c32, %c0_76] : memref<3x64x256xf32, #tpu.memory_space<vmem>>, vector<1x8x256xf32>
    %177 = vector.shape_cast %176 : vector<1x8x256xf32> to vector<8x256xf32>
    %c0_77 = arith.constant 0 : index
    %c32_78 = arith.constant 32 : index
    %c0_79 = arith.constant 0 : index
    %178 = vector.load %arg3[%c0_77, %c32_78, %c0_79] : memref<3x64x256xf32, #tpu.memory_space<vmem>>, vector<1x8x256xf32>
    %179 = vector.shape_cast %178 : vector<1x8x256xf32> to vector<8x256xf32>
    %c0_80 = arith.constant 0 : index
    %c32_81 = arith.constant 32 : index
    %c0_82 = arith.constant 0 : index
    %180 = vector.load %arg4[%c0_80, %c32_81, %c0_82] : memref<3x64x256xf32, #tpu.memory_space<vmem>>, vector<1x8x256xf32>
    %181 = vector.shape_cast %180 : vector<1x8x256xf32> to vector<8x256xf32>
    %182 = arith.addf %177, %181 : vector<8x256xf32>
    %c0_83 = arith.constant 0 : index
    %c32_84 = arith.constant 32 : index
    %c0_85 = arith.constant 0 : index
    %183 = vector.load %arg5[%c0_83, %c32_84, %c0_85] : memref<3x64x256xf32, #tpu.memory_space<vmem>>, vector<1x8x256xf32>
    %184 = vector.shape_cast %183 : vector<1x8x256xf32> to vector<8x256xf32>
    %185 = arith.addf %179, %184 : vector<8x256xf32>
    %c0_86 = arith.constant 0 : index
    %c32_87 = arith.constant 32 : index
    %c0_88 = arith.constant 0 : index
    %186 = vector.load %arg6[%c0_86, %c32_87, %c0_88] : memref<3x64x256xf32, #tpu.memory_space<vmem>>, vector<1x8x256xf32>
    %187 = vector.shape_cast %186 : vector<1x8x256xf32> to vector<8x256xf32>
    %c254_i32_89 = arith.constant 254 : i32
    %188 = tpu.dynamic_rotate %182 by %c254_i32_89 dim 1 : vector<8x256xf32>, i32 -> vector<8x256xf32>
    %189 = arith.subf %182, %188 : vector<8x256xf32>
    %190 = math.absf %189 : vector<8x256xf32>
    %191 = arith.addf %150, %190 : vector<8x256xf32>
    %c254_i32_90 = arith.constant 254 : i32
    %192 = tpu.dynamic_rotate %185 by %c254_i32_90 dim 1 : vector<8x256xf32>, i32 -> vector<8x256xf32>
    %193 = arith.subf %185, %192 : vector<8x256xf32>
    %194 = arith.mulf %193, %193 : vector<8x256xf32>
    %195 = arith.addf %154, %194 : vector<8x256xf32>
    %c6_i32_91 = arith.constant 6 : i32
    %196 = tpu.dynamic_rotate %182 by %c6_i32_91 dim 0 : vector<8x256xf32>, i32 -> vector<8x256xf32>
    %c6_i32_92 = arith.constant 6 : i32
    %197 = tpu.dynamic_rotate %185 by %c6_i32_92 dim 0 : vector<8x256xf32>, i32 -> vector<8x256xf32>
    %198 = arith.select %7, %182, %141 : vector<8x256xi1>, vector<8x256xf32>
    %199 = arith.subf %198, %196 : vector<8x256xf32>
    %200 = math.absf %199 : vector<8x256xf32>
    %201 = arith.addf %160, %200 : vector<8x256xf32>
    %202 = arith.select %7, %185, %144 : vector<8x256xi1>, vector<8x256xf32>
    %203 = arith.subf %202, %197 : vector<8x256xf32>
    %204 = arith.mulf %203, %203 : vector<8x256xf32>
    %205 = arith.addf %164, %204 : vector<8x256xf32>
    %206 = arith.mulf %182, %185 : vector<8x256xf32>
    %207 = arith.mulf %206, %187 : vector<8x256xf32>
    %208 = arith.addf %167, %207 : vector<8x256xf32>
    %209 = arith.mulf %206, %206 : vector<8x256xf32>
    %210 = arith.addf %169, %209 : vector<8x256xf32>
    %211 = arith.mulf %187, %187 : vector<8x256xf32>
    %212 = arith.addf %171, %211 : vector<8x256xf32>
    %213 = arith.mulf %177, %177 : vector<8x256xf32>
    %214 = arith.addf %173, %213 : vector<8x256xf32>
    %215 = arith.mulf %179, %179 : vector<8x256xf32>
    %216 = arith.addf %175, %215 : vector<8x256xf32>
    %c0_93 = arith.constant 0 : index
    %c40 = arith.constant 40 : index
    %c0_94 = arith.constant 0 : index
    %217 = vector.load %arg2[%c0_93, %c40, %c0_94] : memref<3x64x256xf32, #tpu.memory_space<vmem>>, vector<1x8x256xf32>
    %218 = vector.shape_cast %217 : vector<1x8x256xf32> to vector<8x256xf32>
    %c0_95 = arith.constant 0 : index
    %c40_96 = arith.constant 40 : index
    %c0_97 = arith.constant 0 : index
    %219 = vector.load %arg3[%c0_95, %c40_96, %c0_97] : memref<3x64x256xf32, #tpu.memory_space<vmem>>, vector<1x8x256xf32>
    %220 = vector.shape_cast %219 : vector<1x8x256xf32> to vector<8x256xf32>
    %c0_98 = arith.constant 0 : index
    %c40_99 = arith.constant 40 : index
    %c0_100 = arith.constant 0 : index
    %221 = vector.load %arg4[%c0_98, %c40_99, %c0_100] : memref<3x64x256xf32, #tpu.memory_space<vmem>>, vector<1x8x256xf32>
    %222 = vector.shape_cast %221 : vector<1x8x256xf32> to vector<8x256xf32>
    %223 = arith.addf %218, %222 : vector<8x256xf32>
    %c0_101 = arith.constant 0 : index
    %c40_102 = arith.constant 40 : index
    %c0_103 = arith.constant 0 : index
    %224 = vector.load %arg5[%c0_101, %c40_102, %c0_103] : memref<3x64x256xf32, #tpu.memory_space<vmem>>, vector<1x8x256xf32>
    %225 = vector.shape_cast %224 : vector<1x8x256xf32> to vector<8x256xf32>
    %226 = arith.addf %220, %225 : vector<8x256xf32>
    %c0_104 = arith.constant 0 : index
    %c40_105 = arith.constant 40 : index
    %c0_106 = arith.constant 0 : index
    %227 = vector.load %arg6[%c0_104, %c40_105, %c0_106] : memref<3x64x256xf32, #tpu.memory_space<vmem>>, vector<1x8x256xf32>
    %228 = vector.shape_cast %227 : vector<1x8x256xf32> to vector<8x256xf32>
    %c254_i32_107 = arith.constant 254 : i32
    %229 = tpu.dynamic_rotate %223 by %c254_i32_107 dim 1 : vector<8x256xf32>, i32 -> vector<8x256xf32>
    %230 = arith.subf %223, %229 : vector<8x256xf32>
    %231 = math.absf %230 : vector<8x256xf32>
    %232 = arith.addf %191, %231 : vector<8x256xf32>
    %c254_i32_108 = arith.constant 254 : i32
    %233 = tpu.dynamic_rotate %226 by %c254_i32_108 dim 1 : vector<8x256xf32>, i32 -> vector<8x256xf32>
    %234 = arith.subf %226, %233 : vector<8x256xf32>
    %235 = arith.mulf %234, %234 : vector<8x256xf32>
    %236 = arith.addf %195, %235 : vector<8x256xf32>
    %c6_i32_109 = arith.constant 6 : i32
    %237 = tpu.dynamic_rotate %223 by %c6_i32_109 dim 0 : vector<8x256xf32>, i32 -> vector<8x256xf32>
    %c6_i32_110 = arith.constant 6 : i32
    %238 = tpu.dynamic_rotate %226 by %c6_i32_110 dim 0 : vector<8x256xf32>, i32 -> vector<8x256xf32>
    %239 = arith.select %7, %223, %182 : vector<8x256xi1>, vector<8x256xf32>
    %240 = arith.subf %239, %237 : vector<8x256xf32>
    %241 = math.absf %240 : vector<8x256xf32>
    %242 = arith.addf %201, %241 : vector<8x256xf32>
    %243 = arith.select %7, %226, %185 : vector<8x256xi1>, vector<8x256xf32>
    %244 = arith.subf %243, %238 : vector<8x256xf32>
    %245 = arith.mulf %244, %244 : vector<8x256xf32>
    %246 = arith.addf %205, %245 : vector<8x256xf32>
    %247 = arith.mulf %223, %226 : vector<8x256xf32>
    %248 = arith.mulf %247, %228 : vector<8x256xf32>
    %249 = arith.addf %208, %248 : vector<8x256xf32>
    %250 = arith.mulf %247, %247 : vector<8x256xf32>
    %251 = arith.addf %210, %250 : vector<8x256xf32>
    %252 = arith.mulf %228, %228 : vector<8x256xf32>
    %253 = arith.addf %212, %252 : vector<8x256xf32>
    %254 = arith.mulf %218, %218 : vector<8x256xf32>
    %255 = arith.addf %214, %254 : vector<8x256xf32>
    %256 = arith.mulf %220, %220 : vector<8x256xf32>
    %257 = arith.addf %216, %256 : vector<8x256xf32>
    %c0_111 = arith.constant 0 : index
    %c48 = arith.constant 48 : index
    %c0_112 = arith.constant 0 : index
    %258 = vector.load %arg2[%c0_111, %c48, %c0_112] : memref<3x64x256xf32, #tpu.memory_space<vmem>>, vector<1x8x256xf32>
    %259 = vector.shape_cast %258 : vector<1x8x256xf32> to vector<8x256xf32>
    %c0_113 = arith.constant 0 : index
    %c48_114 = arith.constant 48 : index
    %c0_115 = arith.constant 0 : index
    %260 = vector.load %arg3[%c0_113, %c48_114, %c0_115] : memref<3x64x256xf32, #tpu.memory_space<vmem>>, vector<1x8x256xf32>
    %261 = vector.shape_cast %260 : vector<1x8x256xf32> to vector<8x256xf32>
    %c0_116 = arith.constant 0 : index
    %c48_117 = arith.constant 48 : index
    %c0_118 = arith.constant 0 : index
    %262 = vector.load %arg4[%c0_116, %c48_117, %c0_118] : memref<3x64x256xf32, #tpu.memory_space<vmem>>, vector<1x8x256xf32>
    %263 = vector.shape_cast %262 : vector<1x8x256xf32> to vector<8x256xf32>
    %264 = arith.addf %259, %263 : vector<8x256xf32>
    %c0_119 = arith.constant 0 : index
    %c48_120 = arith.constant 48 : index
    %c0_121 = arith.constant 0 : index
    %265 = vector.load %arg5[%c0_119, %c48_120, %c0_121] : memref<3x64x256xf32, #tpu.memory_space<vmem>>, vector<1x8x256xf32>
    %266 = vector.shape_cast %265 : vector<1x8x256xf32> to vector<8x256xf32>
    %267 = arith.addf %261, %266 : vector<8x256xf32>
    %c0_122 = arith.constant 0 : index
    %c48_123 = arith.constant 48 : index
    %c0_124 = arith.constant 0 : index
    %268 = vector.load %arg6[%c0_122, %c48_123, %c0_124] : memref<3x64x256xf32, #tpu.memory_space<vmem>>, vector<1x8x256xf32>
    %269 = vector.shape_cast %268 : vector<1x8x256xf32> to vector<8x256xf32>
    %c254_i32_125 = arith.constant 254 : i32
    %270 = tpu.dynamic_rotate %264 by %c254_i32_125 dim 1 : vector<8x256xf32>, i32 -> vector<8x256xf32>
    %271 = arith.subf %264, %270 : vector<8x256xf32>
    %272 = math.absf %271 : vector<8x256xf32>
    %273 = arith.addf %232, %272 : vector<8x256xf32>
    %c254_i32_126 = arith.constant 254 : i32
    %274 = tpu.dynamic_rotate %267 by %c254_i32_126 dim 1 : vector<8x256xf32>, i32 -> vector<8x256xf32>
    %275 = arith.subf %267, %274 : vector<8x256xf32>
    %276 = arith.mulf %275, %275 : vector<8x256xf32>
    %277 = arith.addf %236, %276 : vector<8x256xf32>
    %c6_i32_127 = arith.constant 6 : i32
    %278 = tpu.dynamic_rotate %264 by %c6_i32_127 dim 0 : vector<8x256xf32>, i32 -> vector<8x256xf32>
    %c6_i32_128 = arith.constant 6 : i32
    %279 = tpu.dynamic_rotate %267 by %c6_i32_128 dim 0 : vector<8x256xf32>, i32 -> vector<8x256xf32>
    %280 = arith.select %7, %264, %223 : vector<8x256xi1>, vector<8x256xf32>
    %281 = arith.subf %280, %278 : vector<8x256xf32>
    %282 = math.absf %281 : vector<8x256xf32>
    %283 = arith.addf %242, %282 : vector<8x256xf32>
    %284 = arith.select %7, %267, %226 : vector<8x256xi1>, vector<8x256xf32>
    %285 = arith.subf %284, %279 : vector<8x256xf32>
    %286 = arith.mulf %285, %285 : vector<8x256xf32>
    %287 = arith.addf %246, %286 : vector<8x256xf32>
    %288 = arith.mulf %264, %267 : vector<8x256xf32>
    %289 = arith.mulf %288, %269 : vector<8x256xf32>
    %290 = arith.addf %249, %289 : vector<8x256xf32>
    %291 = arith.mulf %288, %288 : vector<8x256xf32>
    %292 = arith.addf %251, %291 : vector<8x256xf32>
    %293 = arith.mulf %269, %269 : vector<8x256xf32>
    %294 = arith.addf %253, %293 : vector<8x256xf32>
    %295 = arith.mulf %259, %259 : vector<8x256xf32>
    %296 = arith.addf %255, %295 : vector<8x256xf32>
    %297 = arith.mulf %261, %261 : vector<8x256xf32>
    %298 = arith.addf %257, %297 : vector<8x256xf32>
    %c0_129 = arith.constant 0 : index
    %c56 = arith.constant 56 : index
    %c0_130 = arith.constant 0 : index
    %299 = vector.load %arg2[%c0_129, %c56, %c0_130] : memref<3x64x256xf32, #tpu.memory_space<vmem>>, vector<1x8x256xf32>
    %300 = vector.shape_cast %299 : vector<1x8x256xf32> to vector<8x256xf32>
    %c0_131 = arith.constant 0 : index
    %c56_132 = arith.constant 56 : index
    %c0_133 = arith.constant 0 : index
    %301 = vector.load %arg3[%c0_131, %c56_132, %c0_133] : memref<3x64x256xf32, #tpu.memory_space<vmem>>, vector<1x8x256xf32>
    %302 = vector.shape_cast %301 : vector<1x8x256xf32> to vector<8x256xf32>
    %c0_134 = arith.constant 0 : index
    %c56_135 = arith.constant 56 : index
    %c0_136 = arith.constant 0 : index
    %303 = vector.load %arg4[%c0_134, %c56_135, %c0_136] : memref<3x64x256xf32, #tpu.memory_space<vmem>>, vector<1x8x256xf32>
    %304 = vector.shape_cast %303 : vector<1x8x256xf32> to vector<8x256xf32>
    %305 = arith.addf %300, %304 : vector<8x256xf32>
    %c0_137 = arith.constant 0 : index
    %c56_138 = arith.constant 56 : index
    %c0_139 = arith.constant 0 : index
    %306 = vector.load %arg5[%c0_137, %c56_138, %c0_139] : memref<3x64x256xf32, #tpu.memory_space<vmem>>, vector<1x8x256xf32>
    %307 = vector.shape_cast %306 : vector<1x8x256xf32> to vector<8x256xf32>
    %308 = arith.addf %302, %307 : vector<8x256xf32>
    %c0_140 = arith.constant 0 : index
    %c56_141 = arith.constant 56 : index
    %c0_142 = arith.constant 0 : index
    %309 = vector.load %arg6[%c0_140, %c56_141, %c0_142] : memref<3x64x256xf32, #tpu.memory_space<vmem>>, vector<1x8x256xf32>
    %310 = vector.shape_cast %309 : vector<1x8x256xf32> to vector<8x256xf32>
    %c254_i32_143 = arith.constant 254 : i32
    %311 = tpu.dynamic_rotate %305 by %c254_i32_143 dim 1 : vector<8x256xf32>, i32 -> vector<8x256xf32>
    %312 = arith.subf %305, %311 : vector<8x256xf32>
    %313 = math.absf %312 : vector<8x256xf32>
    %314 = arith.addf %273, %313 : vector<8x256xf32>
    %c254_i32_144 = arith.constant 254 : i32
    %315 = tpu.dynamic_rotate %308 by %c254_i32_144 dim 1 : vector<8x256xf32>, i32 -> vector<8x256xf32>
    %316 = arith.subf %308, %315 : vector<8x256xf32>
    %317 = arith.mulf %316, %316 : vector<8x256xf32>
    %318 = arith.addf %277, %317 : vector<8x256xf32>
    %c6_i32_145 = arith.constant 6 : i32
    %319 = tpu.dynamic_rotate %305 by %c6_i32_145 dim 0 : vector<8x256xf32>, i32 -> vector<8x256xf32>
    %c6_i32_146 = arith.constant 6 : i32
    %320 = tpu.dynamic_rotate %308 by %c6_i32_146 dim 0 : vector<8x256xf32>, i32 -> vector<8x256xf32>
    %321 = arith.select %7, %305, %264 : vector<8x256xi1>, vector<8x256xf32>
    %322 = arith.subf %321, %319 : vector<8x256xf32>
    %323 = math.absf %322 : vector<8x256xf32>
    %324 = arith.addf %283, %323 : vector<8x256xf32>
    %325 = arith.select %7, %308, %267 : vector<8x256xi1>, vector<8x256xf32>
    %326 = arith.subf %325, %320 : vector<8x256xf32>
    %327 = arith.mulf %326, %326 : vector<8x256xf32>
    %328 = arith.addf %287, %327 : vector<8x256xf32>
    %329 = arith.mulf %305, %308 : vector<8x256xf32>
    %330 = arith.mulf %329, %310 : vector<8x256xf32>
    %331 = arith.addf %290, %330 : vector<8x256xf32>
    %332 = arith.mulf %329, %329 : vector<8x256xf32>
    %333 = arith.addf %292, %332 : vector<8x256xf32>
    %334 = arith.mulf %310, %310 : vector<8x256xf32>
    %335 = arith.addf %294, %334 : vector<8x256xf32>
    %336 = arith.mulf %300, %300 : vector<8x256xf32>
    %337 = arith.addf %296, %336 : vector<8x256xf32>
    %338 = arith.mulf %302, %302 : vector<8x256xf32>
    %339 = arith.addf %298, %338 : vector<8x256xf32>
    %c1 = arith.constant 1 : index
    %c0_147 = arith.constant 0 : index
    %c0_148 = arith.constant 0 : index
    %340 = vector.load %arg2[%c1, %c0_147, %c0_148] : memref<3x64x256xf32, #tpu.memory_space<vmem>>, vector<1x8x256xf32>
    %341 = vector.shape_cast %340 : vector<1x8x256xf32> to vector<8x256xf32>
    %c1_149 = arith.constant 1 : index
    %c0_150 = arith.constant 0 : index
    %c0_151 = arith.constant 0 : index
    %342 = vector.load %arg3[%c1_149, %c0_150, %c0_151] : memref<3x64x256xf32, #tpu.memory_space<vmem>>, vector<1x8x256xf32>
    %343 = vector.shape_cast %342 : vector<1x8x256xf32> to vector<8x256xf32>
    %c1_152 = arith.constant 1 : index
    %c0_153 = arith.constant 0 : index
    %c0_154 = arith.constant 0 : index
    %344 = vector.load %arg4[%c1_152, %c0_153, %c0_154] : memref<3x64x256xf32, #tpu.memory_space<vmem>>, vector<1x8x256xf32>
    %345 = vector.shape_cast %344 : vector<1x8x256xf32> to vector<8x256xf32>
    %346 = arith.addf %341, %345 : vector<8x256xf32>
    %c1_155 = arith.constant 1 : index
    %c0_156 = arith.constant 0 : index
    %c0_157 = arith.constant 0 : index
    %347 = vector.load %arg5[%c1_155, %c0_156, %c0_157] : memref<3x64x256xf32, #tpu.memory_space<vmem>>, vector<1x8x256xf32>
    %348 = vector.shape_cast %347 : vector<1x8x256xf32> to vector<8x256xf32>
    %349 = arith.addf %343, %348 : vector<8x256xf32>
    %c1_158 = arith.constant 1 : index
    %c0_159 = arith.constant 0 : index
    %c0_160 = arith.constant 0 : index
    %350 = vector.load %arg6[%c1_158, %c0_159, %c0_160] : memref<3x64x256xf32, #tpu.memory_space<vmem>>, vector<1x8x256xf32>
    %351 = vector.shape_cast %350 : vector<1x8x256xf32> to vector<8x256xf32>
    %c254_i32_161 = arith.constant 254 : i32
    %352 = tpu.dynamic_rotate %346 by %c254_i32_161 dim 1 : vector<8x256xf32>, i32 -> vector<8x256xf32>
    %353 = arith.subf %346, %352 : vector<8x256xf32>
    %354 = math.absf %353 : vector<8x256xf32>
    %355 = arith.addf %314, %354 : vector<8x256xf32>
    %c254_i32_162 = arith.constant 254 : i32
    %356 = tpu.dynamic_rotate %349 by %c254_i32_162 dim 1 : vector<8x256xf32>, i32 -> vector<8x256xf32>
    %357 = arith.subf %349, %356 : vector<8x256xf32>
    %358 = arith.mulf %357, %357 : vector<8x256xf32>
    %359 = arith.addf %318, %358 : vector<8x256xf32>
    %c6_i32_163 = arith.constant 6 : i32
    %360 = tpu.dynamic_rotate %346 by %c6_i32_163 dim 0 : vector<8x256xf32>, i32 -> vector<8x256xf32>
    %c6_i32_164 = arith.constant 6 : i32
    %361 = tpu.dynamic_rotate %349 by %c6_i32_164 dim 0 : vector<8x256xf32>, i32 -> vector<8x256xf32>
    %362 = arith.subf %346, %360 : vector<8x256xf32>
    %cst_165 = arith.constant 0.000000e+00 : f32
    %363 = vector.broadcast %cst_165 : f32 to vector<8x256xf32>
    %364 = arith.select %7, %362, %363 : vector<8x256xi1>, vector<8x256xf32>
    %365 = math.absf %364 : vector<8x256xf32>
    %366 = arith.addf %324, %365 : vector<8x256xf32>
    %367 = arith.subf %349, %361 : vector<8x256xf32>
    %cst_166 = arith.constant 0.000000e+00 : f32
    %368 = vector.broadcast %cst_166 : f32 to vector<8x256xf32>
    %369 = arith.select %7, %367, %368 : vector<8x256xi1>, vector<8x256xf32>
    %370 = arith.mulf %369, %369 : vector<8x256xf32>
    %371 = arith.addf %328, %370 : vector<8x256xf32>
    %372 = arith.mulf %346, %349 : vector<8x256xf32>
    %373 = arith.mulf %372, %351 : vector<8x256xf32>
    %374 = arith.addf %331, %373 : vector<8x256xf32>
    %375 = arith.mulf %372, %372 : vector<8x256xf32>
    %376 = arith.addf %333, %375 : vector<8x256xf32>
    %377 = arith.mulf %351, %351 : vector<8x256xf32>
    %378 = arith.addf %335, %377 : vector<8x256xf32>
    %379 = arith.mulf %341, %341 : vector<8x256xf32>
    %380 = arith.addf %337, %379 : vector<8x256xf32>
    %381 = arith.mulf %343, %343 : vector<8x256xf32>
    %382 = arith.addf %339, %381 : vector<8x256xf32>
    %c1_167 = arith.constant 1 : index
    %c8_168 = arith.constant 8 : index
    %c0_169 = arith.constant 0 : index
    %383 = vector.load %arg2[%c1_167, %c8_168, %c0_169] : memref<3x64x256xf32, #tpu.memory_space<vmem>>, vector<1x8x256xf32>
    %384 = vector.shape_cast %383 : vector<1x8x256xf32> to vector<8x256xf32>
    %c1_170 = arith.constant 1 : index
    %c8_171 = arith.constant 8 : index
    %c0_172 = arith.constant 0 : index
    %385 = vector.load %arg3[%c1_170, %c8_171, %c0_172] : memref<3x64x256xf32, #tpu.memory_space<vmem>>, vector<1x8x256xf32>
    %386 = vector.shape_cast %385 : vector<1x8x256xf32> to vector<8x256xf32>
    %c1_173 = arith.constant 1 : index
    %c8_174 = arith.constant 8 : index
    %c0_175 = arith.constant 0 : index
    %387 = vector.load %arg4[%c1_173, %c8_174, %c0_175] : memref<3x64x256xf32, #tpu.memory_space<vmem>>, vector<1x8x256xf32>
    %388 = vector.shape_cast %387 : vector<1x8x256xf32> to vector<8x256xf32>
    %389 = arith.addf %384, %388 : vector<8x256xf32>
    %c1_176 = arith.constant 1 : index
    %c8_177 = arith.constant 8 : index
    %c0_178 = arith.constant 0 : index
    %390 = vector.load %arg5[%c1_176, %c8_177, %c0_178] : memref<3x64x256xf32, #tpu.memory_space<vmem>>, vector<1x8x256xf32>
    %391 = vector.shape_cast %390 : vector<1x8x256xf32> to vector<8x256xf32>
    %392 = arith.addf %386, %391 : vector<8x256xf32>
    %c1_179 = arith.constant 1 : index
    %c8_180 = arith.constant 8 : index
    %c0_181 = arith.constant 0 : index
    %393 = vector.load %arg6[%c1_179, %c8_180, %c0_181] : memref<3x64x256xf32, #tpu.memory_space<vmem>>, vector<1x8x256xf32>
    %394 = vector.shape_cast %393 : vector<1x8x256xf32> to vector<8x256xf32>
    %c254_i32_182 = arith.constant 254 : i32
    %395 = tpu.dynamic_rotate %389 by %c254_i32_182 dim 1 : vector<8x256xf32>, i32 -> vector<8x256xf32>
    %396 = arith.subf %389, %395 : vector<8x256xf32>
    %397 = math.absf %396 : vector<8x256xf32>
    %398 = arith.addf %355, %397 : vector<8x256xf32>
    %c254_i32_183 = arith.constant 254 : i32
    %399 = tpu.dynamic_rotate %392 by %c254_i32_183 dim 1 : vector<8x256xf32>, i32 -> vector<8x256xf32>
    %400 = arith.subf %392, %399 : vector<8x256xf32>
    %401 = arith.mulf %400, %400 : vector<8x256xf32>
    %402 = arith.addf %359, %401 : vector<8x256xf32>
    %c6_i32_184 = arith.constant 6 : i32
    %403 = tpu.dynamic_rotate %389 by %c6_i32_184 dim 0 : vector<8x256xf32>, i32 -> vector<8x256xf32>
    %c6_i32_185 = arith.constant 6 : i32
    %404 = tpu.dynamic_rotate %392 by %c6_i32_185 dim 0 : vector<8x256xf32>, i32 -> vector<8x256xf32>
    %405 = arith.select %7, %389, %346 : vector<8x256xi1>, vector<8x256xf32>
    %406 = arith.subf %405, %403 : vector<8x256xf32>
    %407 = math.absf %406 : vector<8x256xf32>
    %408 = arith.addf %366, %407 : vector<8x256xf32>
    %409 = arith.select %7, %392, %349 : vector<8x256xi1>, vector<8x256xf32>
    %410 = arith.subf %409, %404 : vector<8x256xf32>
    %411 = arith.mulf %410, %410 : vector<8x256xf32>
    %412 = arith.addf %371, %411 : vector<8x256xf32>
    %413 = arith.mulf %389, %392 : vector<8x256xf32>
    %414 = arith.mulf %413, %394 : vector<8x256xf32>
    %415 = arith.addf %374, %414 : vector<8x256xf32>
    %416 = arith.mulf %413, %413 : vector<8x256xf32>
    %417 = arith.addf %376, %416 : vector<8x256xf32>
    %418 = arith.mulf %394, %394 : vector<8x256xf32>
    %419 = arith.addf %378, %418 : vector<8x256xf32>
    %420 = arith.mulf %384, %384 : vector<8x256xf32>
    %421 = arith.addf %380, %420 : vector<8x256xf32>
    %422 = arith.mulf %386, %386 : vector<8x256xf32>
    %423 = arith.addf %382, %422 : vector<8x256xf32>
    %c1_186 = arith.constant 1 : index
    %c16_187 = arith.constant 16 : index
    %c0_188 = arith.constant 0 : index
    %424 = vector.load %arg2[%c1_186, %c16_187, %c0_188] : memref<3x64x256xf32, #tpu.memory_space<vmem>>, vector<1x8x256xf32>
    %425 = vector.shape_cast %424 : vector<1x8x256xf32> to vector<8x256xf32>
    %c1_189 = arith.constant 1 : index
    %c16_190 = arith.constant 16 : index
    %c0_191 = arith.constant 0 : index
    %426 = vector.load %arg3[%c1_189, %c16_190, %c0_191] : memref<3x64x256xf32, #tpu.memory_space<vmem>>, vector<1x8x256xf32>
    %427 = vector.shape_cast %426 : vector<1x8x256xf32> to vector<8x256xf32>
    %c1_192 = arith.constant 1 : index
    %c16_193 = arith.constant 16 : index
    %c0_194 = arith.constant 0 : index
    %428 = vector.load %arg4[%c1_192, %c16_193, %c0_194] : memref<3x64x256xf32, #tpu.memory_space<vmem>>, vector<1x8x256xf32>
    %429 = vector.shape_cast %428 : vector<1x8x256xf32> to vector<8x256xf32>
    %430 = arith.addf %425, %429 : vector<8x256xf32>
    %c1_195 = arith.constant 1 : index
    %c16_196 = arith.constant 16 : index
    %c0_197 = arith.constant 0 : index
    %431 = vector.load %arg5[%c1_195, %c16_196, %c0_197] : memref<3x64x256xf32, #tpu.memory_space<vmem>>, vector<1x8x256xf32>
    %432 = vector.shape_cast %431 : vector<1x8x256xf32> to vector<8x256xf32>
    %433 = arith.addf %427, %432 : vector<8x256xf32>
    %c1_198 = arith.constant 1 : index
    %c16_199 = arith.constant 16 : index
    %c0_200 = arith.constant 0 : index
    %434 = vector.load %arg6[%c1_198, %c16_199, %c0_200] : memref<3x64x256xf32, #tpu.memory_space<vmem>>, vector<1x8x256xf32>
    %435 = vector.shape_cast %434 : vector<1x8x256xf32> to vector<8x256xf32>
    %c254_i32_201 = arith.constant 254 : i32
    %436 = tpu.dynamic_rotate %430 by %c254_i32_201 dim 1 : vector<8x256xf32>, i32 -> vector<8x256xf32>
    %437 = arith.subf %430, %436 : vector<8x256xf32>
    %438 = math.absf %437 : vector<8x256xf32>
    %439 = arith.addf %398, %438 : vector<8x256xf32>
    %c254_i32_202 = arith.constant 254 : i32
    %440 = tpu.dynamic_rotate %433 by %c254_i32_202 dim 1 : vector<8x256xf32>, i32 -> vector<8x256xf32>
    %441 = arith.subf %433, %440 : vector<8x256xf32>
    %442 = arith.mulf %441, %441 : vector<8x256xf32>
    %443 = arith.addf %402, %442 : vector<8x256xf32>
    %c6_i32_203 = arith.constant 6 : i32
    %444 = tpu.dynamic_rotate %430 by %c6_i32_203 dim 0 : vector<8x256xf32>, i32 -> vector<8x256xf32>
    %c6_i32_204 = arith.constant 6 : i32
    %445 = tpu.dynamic_rotate %433 by %c6_i32_204 dim 0 : vector<8x256xf32>, i32 -> vector<8x256xf32>
    %446 = arith.select %7, %430, %389 : vector<8x256xi1>, vector<8x256xf32>
    %447 = arith.subf %446, %444 : vector<8x256xf32>
    %448 = math.absf %447 : vector<8x256xf32>
    %449 = arith.addf %408, %448 : vector<8x256xf32>
    %450 = arith.select %7, %433, %392 : vector<8x256xi1>, vector<8x256xf32>
    %451 = arith.subf %450, %445 : vector<8x256xf32>
    %452 = arith.mulf %451, %451 : vector<8x256xf32>
    %453 = arith.addf %412, %452 : vector<8x256xf32>
    %454 = arith.mulf %430, %433 : vector<8x256xf32>
    %455 = arith.mulf %454, %435 : vector<8x256xf32>
    %456 = arith.addf %415, %455 : vector<8x256xf32>
    %457 = arith.mulf %454, %454 : vector<8x256xf32>
    %458 = arith.addf %417, %457 : vector<8x256xf32>
    %459 = arith.mulf %435, %435 : vector<8x256xf32>
    %460 = arith.addf %419, %459 : vector<8x256xf32>
    %461 = arith.mulf %425, %425 : vector<8x256xf32>
    %462 = arith.addf %421, %461 : vector<8x256xf32>
    %463 = arith.mulf %427, %427 : vector<8x256xf32>
    %464 = arith.addf %423, %463 : vector<8x256xf32>
    %c1_205 = arith.constant 1 : index
    %c24_206 = arith.constant 24 : index
    %c0_207 = arith.constant 0 : index
    %465 = vector.load %arg2[%c1_205, %c24_206, %c0_207] : memref<3x64x256xf32, #tpu.memory_space<vmem>>, vector<1x8x256xf32>
    %466 = vector.shape_cast %465 : vector<1x8x256xf32> to vector<8x256xf32>
    %c1_208 = arith.constant 1 : index
    %c24_209 = arith.constant 24 : index
    %c0_210 = arith.constant 0 : index
    %467 = vector.load %arg3[%c1_208, %c24_209, %c0_210] : memref<3x64x256xf32, #tpu.memory_space<vmem>>, vector<1x8x256xf32>
    %468 = vector.shape_cast %467 : vector<1x8x256xf32> to vector<8x256xf32>
    %c1_211 = arith.constant 1 : index
    %c24_212 = arith.constant 24 : index
    %c0_213 = arith.constant 0 : index
    %469 = vector.load %arg4[%c1_211, %c24_212, %c0_213] : memref<3x64x256xf32, #tpu.memory_space<vmem>>, vector<1x8x256xf32>
    %470 = vector.shape_cast %469 : vector<1x8x256xf32> to vector<8x256xf32>
    %471 = arith.addf %466, %470 : vector<8x256xf32>
    %c1_214 = arith.constant 1 : index
    %c24_215 = arith.constant 24 : index
    %c0_216 = arith.constant 0 : index
    %472 = vector.load %arg5[%c1_214, %c24_215, %c0_216] : memref<3x64x256xf32, #tpu.memory_space<vmem>>, vector<1x8x256xf32>
    %473 = vector.shape_cast %472 : vector<1x8x256xf32> to vector<8x256xf32>
    %474 = arith.addf %468, %473 : vector<8x256xf32>
    %c1_217 = arith.constant 1 : index
    %c24_218 = arith.constant 24 : index
    %c0_219 = arith.constant 0 : index
    %475 = vector.load %arg6[%c1_217, %c24_218, %c0_219] : memref<3x64x256xf32, #tpu.memory_space<vmem>>, vector<1x8x256xf32>
    %476 = vector.shape_cast %475 : vector<1x8x256xf32> to vector<8x256xf32>
    %c254_i32_220 = arith.constant 254 : i32
    %477 = tpu.dynamic_rotate %471 by %c254_i32_220 dim 1 : vector<8x256xf32>, i32 -> vector<8x256xf32>
    %478 = arith.subf %471, %477 : vector<8x256xf32>
    %479 = math.absf %478 : vector<8x256xf32>
    %480 = arith.addf %439, %479 : vector<8x256xf32>
    %c254_i32_221 = arith.constant 254 : i32
    %481 = tpu.dynamic_rotate %474 by %c254_i32_221 dim 1 : vector<8x256xf32>, i32 -> vector<8x256xf32>
    %482 = arith.subf %474, %481 : vector<8x256xf32>
    %483 = arith.mulf %482, %482 : vector<8x256xf32>
    %484 = arith.addf %443, %483 : vector<8x256xf32>
    %c6_i32_222 = arith.constant 6 : i32
    %485 = tpu.dynamic_rotate %471 by %c6_i32_222 dim 0 : vector<8x256xf32>, i32 -> vector<8x256xf32>
    %c6_i32_223 = arith.constant 6 : i32
    %486 = tpu.dynamic_rotate %474 by %c6_i32_223 dim 0 : vector<8x256xf32>, i32 -> vector<8x256xf32>
    %487 = arith.select %7, %471, %430 : vector<8x256xi1>, vector<8x256xf32>
    %488 = arith.subf %487, %485 : vector<8x256xf32>
    %489 = math.absf %488 : vector<8x256xf32>
    %490 = arith.addf %449, %489 : vector<8x256xf32>
    %491 = arith.select %7, %474, %433 : vector<8x256xi1>, vector<8x256xf32>
    %492 = arith.subf %491, %486 : vector<8x256xf32>
    %493 = arith.mulf %492, %492 : vector<8x256xf32>
    %494 = arith.addf %453, %493 : vector<8x256xf32>
    %495 = arith.mulf %471, %474 : vector<8x256xf32>
    %496 = arith.mulf %495, %476 : vector<8x256xf32>
    %497 = arith.addf %456, %496 : vector<8x256xf32>
    %498 = arith.mulf %495, %495 : vector<8x256xf32>
    %499 = arith.addf %458, %498 : vector<8x256xf32>
    %500 = arith.mulf %476, %476 : vector<8x256xf32>
    %501 = arith.addf %460, %500 : vector<8x256xf32>
    %502 = arith.mulf %466, %466 : vector<8x256xf32>
    %503 = arith.addf %462, %502 : vector<8x256xf32>
    %504 = arith.mulf %468, %468 : vector<8x256xf32>
    %505 = arith.addf %464, %504 : vector<8x256xf32>
    %c1_224 = arith.constant 1 : index
    %c32_225 = arith.constant 32 : index
    %c0_226 = arith.constant 0 : index
    %506 = vector.load %arg2[%c1_224, %c32_225, %c0_226] : memref<3x64x256xf32, #tpu.memory_space<vmem>>, vector<1x8x256xf32>
    %507 = vector.shape_cast %506 : vector<1x8x256xf32> to vector<8x256xf32>
    %c1_227 = arith.constant 1 : index
    %c32_228 = arith.constant 32 : index
    %c0_229 = arith.constant 0 : index
    %508 = vector.load %arg3[%c1_227, %c32_228, %c0_229] : memref<3x64x256xf32, #tpu.memory_space<vmem>>, vector<1x8x256xf32>
    %509 = vector.shape_cast %508 : vector<1x8x256xf32> to vector<8x256xf32>
    %c1_230 = arith.constant 1 : index
    %c32_231 = arith.constant 32 : index
    %c0_232 = arith.constant 0 : index
    %510 = vector.load %arg4[%c1_230, %c32_231, %c0_232] : memref<3x64x256xf32, #tpu.memory_space<vmem>>, vector<1x8x256xf32>
    %511 = vector.shape_cast %510 : vector<1x8x256xf32> to vector<8x256xf32>
    %512 = arith.addf %507, %511 : vector<8x256xf32>
    %c1_233 = arith.constant 1 : index
    %c32_234 = arith.constant 32 : index
    %c0_235 = arith.constant 0 : index
    %513 = vector.load %arg5[%c1_233, %c32_234, %c0_235] : memref<3x64x256xf32, #tpu.memory_space<vmem>>, vector<1x8x256xf32>
    %514 = vector.shape_cast %513 : vector<1x8x256xf32> to vector<8x256xf32>
    %515 = arith.addf %509, %514 : vector<8x256xf32>
    %c1_236 = arith.constant 1 : index
    %c32_237 = arith.constant 32 : index
    %c0_238 = arith.constant 0 : index
    %516 = vector.load %arg6[%c1_236, %c32_237, %c0_238] : memref<3x64x256xf32, #tpu.memory_space<vmem>>, vector<1x8x256xf32>
    %517 = vector.shape_cast %516 : vector<1x8x256xf32> to vector<8x256xf32>
    %c254_i32_239 = arith.constant 254 : i32
    %518 = tpu.dynamic_rotate %512 by %c254_i32_239 dim 1 : vector<8x256xf32>, i32 -> vector<8x256xf32>
    %519 = arith.subf %512, %518 : vector<8x256xf32>
    %520 = math.absf %519 : vector<8x256xf32>
    %521 = arith.addf %480, %520 : vector<8x256xf32>
    %c254_i32_240 = arith.constant 254 : i32
    %522 = tpu.dynamic_rotate %515 by %c254_i32_240 dim 1 : vector<8x256xf32>, i32 -> vector<8x256xf32>
    %523 = arith.subf %515, %522 : vector<8x256xf32>
    %524 = arith.mulf %523, %523 : vector<8x256xf32>
    %525 = arith.addf %484, %524 : vector<8x256xf32>
    %c6_i32_241 = arith.constant 6 : i32
    %526 = tpu.dynamic_rotate %512 by %c6_i32_241 dim 0 : vector<8x256xf32>, i32 -> vector<8x256xf32>
    %c6_i32_242 = arith.constant 6 : i32
    %527 = tpu.dynamic_rotate %515 by %c6_i32_242 dim 0 : vector<8x256xf32>, i32 -> vector<8x256xf32>
    %528 = arith.select %7, %512, %471 : vector<8x256xi1>, vector<8x256xf32>
    %529 = arith.subf %528, %526 : vector<8x256xf32>
    %530 = math.absf %529 : vector<8x256xf32>
    %531 = arith.addf %490, %530 : vector<8x256xf32>
    %532 = arith.select %7, %515, %474 : vector<8x256xi1>, vector<8x256xf32>
    %533 = arith.subf %532, %527 : vector<8x256xf32>
    %534 = arith.mulf %533, %533 : vector<8x256xf32>
    %535 = arith.addf %494, %534 : vector<8x256xf32>
    %536 = arith.mulf %512, %515 : vector<8x256xf32>
    %537 = arith.mulf %536, %517 : vector<8x256xf32>
    %538 = arith.addf %497, %537 : vector<8x256xf32>
    %539 = arith.mulf %536, %536 : vector<8x256xf32>
    %540 = arith.addf %499, %539 : vector<8x256xf32>
    %541 = arith.mulf %517, %517 : vector<8x256xf32>
    %542 = arith.addf %501, %541 : vector<8x256xf32>
    %543 = arith.mulf %507, %507 : vector<8x256xf32>
    %544 = arith.addf %503, %543 : vector<8x256xf32>
    %545 = arith.mulf %509, %509 : vector<8x256xf32>
    %546 = arith.addf %505, %545 : vector<8x256xf32>
    %c1_243 = arith.constant 1 : index
    %c40_244 = arith.constant 40 : index
    %c0_245 = arith.constant 0 : index
    %547 = vector.load %arg2[%c1_243, %c40_244, %c0_245] : memref<3x64x256xf32, #tpu.memory_space<vmem>>, vector<1x8x256xf32>
    %548 = vector.shape_cast %547 : vector<1x8x256xf32> to vector<8x256xf32>
    %c1_246 = arith.constant 1 : index
    %c40_247 = arith.constant 40 : index
    %c0_248 = arith.constant 0 : index
    %549 = vector.load %arg3[%c1_246, %c40_247, %c0_248] : memref<3x64x256xf32, #tpu.memory_space<vmem>>, vector<1x8x256xf32>
    %550 = vector.shape_cast %549 : vector<1x8x256xf32> to vector<8x256xf32>
    %c1_249 = arith.constant 1 : index
    %c40_250 = arith.constant 40 : index
    %c0_251 = arith.constant 0 : index
    %551 = vector.load %arg4[%c1_249, %c40_250, %c0_251] : memref<3x64x256xf32, #tpu.memory_space<vmem>>, vector<1x8x256xf32>
    %552 = vector.shape_cast %551 : vector<1x8x256xf32> to vector<8x256xf32>
    %553 = arith.addf %548, %552 : vector<8x256xf32>
    %c1_252 = arith.constant 1 : index
    %c40_253 = arith.constant 40 : index
    %c0_254 = arith.constant 0 : index
    %554 = vector.load %arg5[%c1_252, %c40_253, %c0_254] : memref<3x64x256xf32, #tpu.memory_space<vmem>>, vector<1x8x256xf32>
    %555 = vector.shape_cast %554 : vector<1x8x256xf32> to vector<8x256xf32>
    %556 = arith.addf %550, %555 : vector<8x256xf32>
    %c1_255 = arith.constant 1 : index
    %c40_256 = arith.constant 40 : index
    %c0_257 = arith.constant 0 : index
    %557 = vector.load %arg6[%c1_255, %c40_256, %c0_257] : memref<3x64x256xf32, #tpu.memory_space<vmem>>, vector<1x8x256xf32>
    %558 = vector.shape_cast %557 : vector<1x8x256xf32> to vector<8x256xf32>
    %c254_i32_258 = arith.constant 254 : i32
    %559 = tpu.dynamic_rotate %553 by %c254_i32_258 dim 1 : vector<8x256xf32>, i32 -> vector<8x256xf32>
    %560 = arith.subf %553, %559 : vector<8x256xf32>
    %561 = math.absf %560 : vector<8x256xf32>
    %562 = arith.addf %521, %561 : vector<8x256xf32>
    %c254_i32_259 = arith.constant 254 : i32
    %563 = tpu.dynamic_rotate %556 by %c254_i32_259 dim 1 : vector<8x256xf32>, i32 -> vector<8x256xf32>
    %564 = arith.subf %556, %563 : vector<8x256xf32>
    %565 = arith.mulf %564, %564 : vector<8x256xf32>
    %566 = arith.addf %525, %565 : vector<8x256xf32>
    %c6_i32_260 = arith.constant 6 : i32
    %567 = tpu.dynamic_rotate %553 by %c6_i32_260 dim 0 : vector<8x256xf32>, i32 -> vector<8x256xf32>
    %c6_i32_261 = arith.constant 6 : i32
    %568 = tpu.dynamic_rotate %556 by %c6_i32_261 dim 0 : vector<8x256xf32>, i32 -> vector<8x256xf32>
    %569 = arith.select %7, %553, %512 : vector<8x256xi1>, vector<8x256xf32>
    %570 = arith.subf %569, %567 : vector<8x256xf32>
    %571 = math.absf %570 : vector<8x256xf32>
    %572 = arith.addf %531, %571 : vector<8x256xf32>
    %573 = arith.select %7, %556, %515 : vector<8x256xi1>, vector<8x256xf32>
    %574 = arith.subf %573, %568 : vector<8x256xf32>
    %575 = arith.mulf %574, %574 : vector<8x256xf32>
    %576 = arith.addf %535, %575 : vector<8x256xf32>
    %577 = arith.mulf %553, %556 : vector<8x256xf32>
    %578 = arith.mulf %577, %558 : vector<8x256xf32>
    %579 = arith.addf %538, %578 : vector<8x256xf32>
    %580 = arith.mulf %577, %577 : vector<8x256xf32>
    %581 = arith.addf %540, %580 : vector<8x256xf32>
    %582 = arith.mulf %558, %558 : vector<8x256xf32>
    %583 = arith.addf %542, %582 : vector<8x256xf32>
    %584 = arith.mulf %548, %548 : vector<8x256xf32>
    %585 = arith.addf %544, %584 : vector<8x256xf32>
    %586 = arith.mulf %550, %550 : vector<8x256xf32>
    %587 = arith.addf %546, %586 : vector<8x256xf32>
    %c1_262 = arith.constant 1 : index
    %c48_263 = arith.constant 48 : index
    %c0_264 = arith.constant 0 : index
    %588 = vector.load %arg2[%c1_262, %c48_263, %c0_264] : memref<3x64x256xf32, #tpu.memory_space<vmem>>, vector<1x8x256xf32>
    %589 = vector.shape_cast %588 : vector<1x8x256xf32> to vector<8x256xf32>
    %c1_265 = arith.constant 1 : index
    %c48_266 = arith.constant 48 : index
    %c0_267 = arith.constant 0 : index
    %590 = vector.load %arg3[%c1_265, %c48_266, %c0_267] : memref<3x64x256xf32, #tpu.memory_space<vmem>>, vector<1x8x256xf32>
    %591 = vector.shape_cast %590 : vector<1x8x256xf32> to vector<8x256xf32>
    %c1_268 = arith.constant 1 : index
    %c48_269 = arith.constant 48 : index
    %c0_270 = arith.constant 0 : index
    %592 = vector.load %arg4[%c1_268, %c48_269, %c0_270] : memref<3x64x256xf32, #tpu.memory_space<vmem>>, vector<1x8x256xf32>
    %593 = vector.shape_cast %592 : vector<1x8x256xf32> to vector<8x256xf32>
    %594 = arith.addf %589, %593 : vector<8x256xf32>
    %c1_271 = arith.constant 1 : index
    %c48_272 = arith.constant 48 : index
    %c0_273 = arith.constant 0 : index
    %595 = vector.load %arg5[%c1_271, %c48_272, %c0_273] : memref<3x64x256xf32, #tpu.memory_space<vmem>>, vector<1x8x256xf32>
    %596 = vector.shape_cast %595 : vector<1x8x256xf32> to vector<8x256xf32>
    %597 = arith.addf %591, %596 : vector<8x256xf32>
    %c1_274 = arith.constant 1 : index
    %c48_275 = arith.constant 48 : index
    %c0_276 = arith.constant 0 : index
    %598 = vector.load %arg6[%c1_274, %c48_275, %c0_276] : memref<3x64x256xf32, #tpu.memory_space<vmem>>, vector<1x8x256xf32>
    %599 = vector.shape_cast %598 : vector<1x8x256xf32> to vector<8x256xf32>
    %c254_i32_277 = arith.constant 254 : i32
    %600 = tpu.dynamic_rotate %594 by %c254_i32_277 dim 1 : vector<8x256xf32>, i32 -> vector<8x256xf32>
    %601 = arith.subf %594, %600 : vector<8x256xf32>
    %602 = math.absf %601 : vector<8x256xf32>
    %603 = arith.addf %562, %602 : vector<8x256xf32>
    %c254_i32_278 = arith.constant 254 : i32
    %604 = tpu.dynamic_rotate %597 by %c254_i32_278 dim 1 : vector<8x256xf32>, i32 -> vector<8x256xf32>
    %605 = arith.subf %597, %604 : vector<8x256xf32>
    %606 = arith.mulf %605, %605 : vector<8x256xf32>
    %607 = arith.addf %566, %606 : vector<8x256xf32>
    %c6_i32_279 = arith.constant 6 : i32
    %608 = tpu.dynamic_rotate %594 by %c6_i32_279 dim 0 : vector<8x256xf32>, i32 -> vector<8x256xf32>
    %c6_i32_280 = arith.constant 6 : i32
    %609 = tpu.dynamic_rotate %597 by %c6_i32_280 dim 0 : vector<8x256xf32>, i32 -> vector<8x256xf32>
    %610 = arith.select %7, %594, %553 : vector<8x256xi1>, vector<8x256xf32>
    %611 = arith.subf %610, %608 : vector<8x256xf32>
    %612 = math.absf %611 : vector<8x256xf32>
    %613 = arith.addf %572, %612 : vector<8x256xf32>
    %614 = arith.select %7, %597, %556 : vector<8x256xi1>, vector<8x256xf32>
    %615 = arith.subf %614, %609 : vector<8x256xf32>
    %616 = arith.mulf %615, %615 : vector<8x256xf32>
    %617 = arith.addf %576, %616 : vector<8x256xf32>
    %618 = arith.mulf %594, %597 : vector<8x256xf32>
    %619 = arith.mulf %618, %599 : vector<8x256xf32>
    %620 = arith.addf %579, %619 : vector<8x256xf32>
    %621 = arith.mulf %618, %618 : vector<8x256xf32>
    %622 = arith.addf %581, %621 : vector<8x256xf32>
    %623 = arith.mulf %599, %599 : vector<8x256xf32>
    %624 = arith.addf %583, %623 : vector<8x256xf32>
    %625 = arith.mulf %589, %589 : vector<8x256xf32>
    %626 = arith.addf %585, %625 : vector<8x256xf32>
    %627 = arith.mulf %591, %591 : vector<8x256xf32>
    %628 = arith.addf %587, %627 : vector<8x256xf32>
    %c1_281 = arith.constant 1 : index
    %c56_282 = arith.constant 56 : index
    %c0_283 = arith.constant 0 : index
    %629 = vector.load %arg2[%c1_281, %c56_282, %c0_283] : memref<3x64x256xf32, #tpu.memory_space<vmem>>, vector<1x8x256xf32>
    %630 = vector.shape_cast %629 : vector<1x8x256xf32> to vector<8x256xf32>
    %c1_284 = arith.constant 1 : index
    %c56_285 = arith.constant 56 : index
    %c0_286 = arith.constant 0 : index
    %631 = vector.load %arg3[%c1_284, %c56_285, %c0_286] : memref<3x64x256xf32, #tpu.memory_space<vmem>>, vector<1x8x256xf32>
    %632 = vector.shape_cast %631 : vector<1x8x256xf32> to vector<8x256xf32>
    %c1_287 = arith.constant 1 : index
    %c56_288 = arith.constant 56 : index
    %c0_289 = arith.constant 0 : index
    %633 = vector.load %arg4[%c1_287, %c56_288, %c0_289] : memref<3x64x256xf32, #tpu.memory_space<vmem>>, vector<1x8x256xf32>
    %634 = vector.shape_cast %633 : vector<1x8x256xf32> to vector<8x256xf32>
    %635 = arith.addf %630, %634 : vector<8x256xf32>
    %c1_290 = arith.constant 1 : index
    %c56_291 = arith.constant 56 : index
    %c0_292 = arith.constant 0 : index
    %636 = vector.load %arg5[%c1_290, %c56_291, %c0_292] : memref<3x64x256xf32, #tpu.memory_space<vmem>>, vector<1x8x256xf32>
    %637 = vector.shape_cast %636 : vector<1x8x256xf32> to vector<8x256xf32>
    %638 = arith.addf %632, %637 : vector<8x256xf32>
    %c1_293 = arith.constant 1 : index
    %c56_294 = arith.constant 56 : index
    %c0_295 = arith.constant 0 : index
    %639 = vector.load %arg6[%c1_293, %c56_294, %c0_295] : memref<3x64x256xf32, #tpu.memory_space<vmem>>, vector<1x8x256xf32>
    %640 = vector.shape_cast %639 : vector<1x8x256xf32> to vector<8x256xf32>
    %c254_i32_296 = arith.constant 254 : i32
    %641 = tpu.dynamic_rotate %635 by %c254_i32_296 dim 1 : vector<8x256xf32>, i32 -> vector<8x256xf32>
    %642 = arith.subf %635, %641 : vector<8x256xf32>
    %643 = math.absf %642 : vector<8x256xf32>
    %644 = arith.addf %603, %643 : vector<8x256xf32>
    %c254_i32_297 = arith.constant 254 : i32
    %645 = tpu.dynamic_rotate %638 by %c254_i32_297 dim 1 : vector<8x256xf32>, i32 -> vector<8x256xf32>
    %646 = arith.subf %638, %645 : vector<8x256xf32>
    %647 = arith.mulf %646, %646 : vector<8x256xf32>
    %648 = arith.addf %607, %647 : vector<8x256xf32>
    %c6_i32_298 = arith.constant 6 : i32
    %649 = tpu.dynamic_rotate %635 by %c6_i32_298 dim 0 : vector<8x256xf32>, i32 -> vector<8x256xf32>
    %c6_i32_299 = arith.constant 6 : i32
    %650 = tpu.dynamic_rotate %638 by %c6_i32_299 dim 0 : vector<8x256xf32>, i32 -> vector<8x256xf32>
    %651 = arith.select %7, %635, %594 : vector<8x256xi1>, vector<8x256xf32>
    %652 = arith.subf %651, %649 : vector<8x256xf32>
    %653 = math.absf %652 : vector<8x256xf32>
    %654 = arith.addf %613, %653 : vector<8x256xf32>
    %655 = arith.select %7, %638, %597 : vector<8x256xi1>, vector<8x256xf32>
    %656 = arith.subf %655, %650 : vector<8x256xf32>
    %657 = arith.mulf %656, %656 : vector<8x256xf32>
    %658 = arith.addf %617, %657 : vector<8x256xf32>
    %659 = arith.mulf %635, %638 : vector<8x256xf32>
    %660 = arith.mulf %659, %640 : vector<8x256xf32>
    %661 = arith.addf %620, %660 : vector<8x256xf32>
    %662 = arith.mulf %659, %659 : vector<8x256xf32>
    %663 = arith.addf %622, %662 : vector<8x256xf32>
    %664 = arith.mulf %640, %640 : vector<8x256xf32>
    %665 = arith.addf %624, %664 : vector<8x256xf32>
    %666 = arith.mulf %630, %630 : vector<8x256xf32>
    %667 = arith.addf %626, %666 : vector<8x256xf32>
    %668 = arith.mulf %632, %632 : vector<8x256xf32>
    %669 = arith.addf %628, %668 : vector<8x256xf32>
    %c2 = arith.constant 2 : index
    %c0_300 = arith.constant 0 : index
    %c0_301 = arith.constant 0 : index
    %670 = vector.load %arg2[%c2, %c0_300, %c0_301] : memref<3x64x256xf32, #tpu.memory_space<vmem>>, vector<1x8x256xf32>
    %671 = vector.shape_cast %670 : vector<1x8x256xf32> to vector<8x256xf32>
    %c2_302 = arith.constant 2 : index
    %c0_303 = arith.constant 0 : index
    %c0_304 = arith.constant 0 : index
    %672 = vector.load %arg3[%c2_302, %c0_303, %c0_304] : memref<3x64x256xf32, #tpu.memory_space<vmem>>, vector<1x8x256xf32>
    %673 = vector.shape_cast %672 : vector<1x8x256xf32> to vector<8x256xf32>
    %c2_305 = arith.constant 2 : index
    %c0_306 = arith.constant 0 : index
    %c0_307 = arith.constant 0 : index
    %674 = vector.load %arg4[%c2_305, %c0_306, %c0_307] : memref<3x64x256xf32, #tpu.memory_space<vmem>>, vector<1x8x256xf32>
    %675 = vector.shape_cast %674 : vector<1x8x256xf32> to vector<8x256xf32>
    %676 = arith.addf %671, %675 : vector<8x256xf32>
    %c2_308 = arith.constant 2 : index
    %c0_309 = arith.constant 0 : index
    %c0_310 = arith.constant 0 : index
    %677 = vector.load %arg5[%c2_308, %c0_309, %c0_310] : memref<3x64x256xf32, #tpu.memory_space<vmem>>, vector<1x8x256xf32>
    %678 = vector.shape_cast %677 : vector<1x8x256xf32> to vector<8x256xf32>
    %679 = arith.addf %673, %678 : vector<8x256xf32>
    %c2_311 = arith.constant 2 : index
    %c0_312 = arith.constant 0 : index
    %c0_313 = arith.constant 0 : index
    %680 = vector.load %arg6[%c2_311, %c0_312, %c0_313] : memref<3x64x256xf32, #tpu.memory_space<vmem>>, vector<1x8x256xf32>
    %681 = vector.shape_cast %680 : vector<1x8x256xf32> to vector<8x256xf32>
    %c254_i32_314 = arith.constant 254 : i32
    %682 = tpu.dynamic_rotate %676 by %c254_i32_314 dim 1 : vector<8x256xf32>, i32 -> vector<8x256xf32>
    %683 = arith.subf %676, %682 : vector<8x256xf32>
    %684 = math.absf %683 : vector<8x256xf32>
    %685 = arith.addf %644, %684 : vector<8x256xf32>
    %c254_i32_315 = arith.constant 254 : i32
    %686 = tpu.dynamic_rotate %679 by %c254_i32_315 dim 1 : vector<8x256xf32>, i32 -> vector<8x256xf32>
    %687 = arith.subf %679, %686 : vector<8x256xf32>
    %688 = arith.mulf %687, %687 : vector<8x256xf32>
    %689 = arith.addf %648, %688 : vector<8x256xf32>
    %c6_i32_316 = arith.constant 6 : i32
    %690 = tpu.dynamic_rotate %676 by %c6_i32_316 dim 0 : vector<8x256xf32>, i32 -> vector<8x256xf32>
    %c6_i32_317 = arith.constant 6 : i32
    %691 = tpu.dynamic_rotate %679 by %c6_i32_317 dim 0 : vector<8x256xf32>, i32 -> vector<8x256xf32>
    %692 = arith.subf %676, %690 : vector<8x256xf32>
    %cst_318 = arith.constant 0.000000e+00 : f32
    %693 = vector.broadcast %cst_318 : f32 to vector<8x256xf32>
    %694 = arith.select %7, %692, %693 : vector<8x256xi1>, vector<8x256xf32>
    %695 = math.absf %694 : vector<8x256xf32>
    %696 = arith.addf %654, %695 : vector<8x256xf32>
    %697 = arith.subf %679, %691 : vector<8x256xf32>
    %cst_319 = arith.constant 0.000000e+00 : f32
    %698 = vector.broadcast %cst_319 : f32 to vector<8x256xf32>
    %699 = arith.select %7, %697, %698 : vector<8x256xi1>, vector<8x256xf32>
    %700 = arith.mulf %699, %699 : vector<8x256xf32>
    %701 = arith.addf %658, %700 : vector<8x256xf32>
    %702 = arith.mulf %676, %679 : vector<8x256xf32>
    %703 = arith.mulf %702, %681 : vector<8x256xf32>
    %704 = arith.addf %661, %703 : vector<8x256xf32>
    %705 = arith.mulf %702, %702 : vector<8x256xf32>
    %706 = arith.addf %663, %705 : vector<8x256xf32>
    %707 = arith.mulf %681, %681 : vector<8x256xf32>
    %708 = arith.addf %665, %707 : vector<8x256xf32>
    %709 = arith.mulf %671, %671 : vector<8x256xf32>
    %710 = arith.addf %667, %709 : vector<8x256xf32>
    %711 = arith.mulf %673, %673 : vector<8x256xf32>
    %712 = arith.addf %669, %711 : vector<8x256xf32>
    %c2_320 = arith.constant 2 : index
    %c8_321 = arith.constant 8 : index
    %c0_322 = arith.constant 0 : index
    %713 = vector.load %arg2[%c2_320, %c8_321, %c0_322] : memref<3x64x256xf32, #tpu.memory_space<vmem>>, vector<1x8x256xf32>
    %714 = vector.shape_cast %713 : vector<1x8x256xf32> to vector<8x256xf32>
    %c2_323 = arith.constant 2 : index
    %c8_324 = arith.constant 8 : index
    %c0_325 = arith.constant 0 : index
    %715 = vector.load %arg3[%c2_323, %c8_324, %c0_325] : memref<3x64x256xf32, #tpu.memory_space<vmem>>, vector<1x8x256xf32>
    %716 = vector.shape_cast %715 : vector<1x8x256xf32> to vector<8x256xf32>
    %c2_326 = arith.constant 2 : index
    %c8_327 = arith.constant 8 : index
    %c0_328 = arith.constant 0 : index
    %717 = vector.load %arg4[%c2_326, %c8_327, %c0_328] : memref<3x64x256xf32, #tpu.memory_space<vmem>>, vector<1x8x256xf32>
    %718 = vector.shape_cast %717 : vector<1x8x256xf32> to vector<8x256xf32>
    %719 = arith.addf %714, %718 : vector<8x256xf32>
    %c2_329 = arith.constant 2 : index
    %c8_330 = arith.constant 8 : index
    %c0_331 = arith.constant 0 : index
    %720 = vector.load %arg5[%c2_329, %c8_330, %c0_331] : memref<3x64x256xf32, #tpu.memory_space<vmem>>, vector<1x8x256xf32>
    %721 = vector.shape_cast %720 : vector<1x8x256xf32> to vector<8x256xf32>
    %722 = arith.addf %716, %721 : vector<8x256xf32>
    %c2_332 = arith.constant 2 : index
    %c8_333 = arith.constant 8 : index
    %c0_334 = arith.constant 0 : index
    %723 = vector.load %arg6[%c2_332, %c8_333, %c0_334] : memref<3x64x256xf32, #tpu.memory_space<vmem>>, vector<1x8x256xf32>
    %724 = vector.shape_cast %723 : vector<1x8x256xf32> to vector<8x256xf32>
    %c254_i32_335 = arith.constant 254 : i32
    %725 = tpu.dynamic_rotate %719 by %c254_i32_335 dim 1 : vector<8x256xf32>, i32 -> vector<8x256xf32>
    %726 = arith.subf %719, %725 : vector<8x256xf32>
    %727 = math.absf %726 : vector<8x256xf32>
    %728 = arith.addf %685, %727 : vector<8x256xf32>
    %c254_i32_336 = arith.constant 254 : i32
    %729 = tpu.dynamic_rotate %722 by %c254_i32_336 dim 1 : vector<8x256xf32>, i32 -> vector<8x256xf32>
    %730 = arith.subf %722, %729 : vector<8x256xf32>
    %731 = arith.mulf %730, %730 : vector<8x256xf32>
    %732 = arith.addf %689, %731 : vector<8x256xf32>
    %c6_i32_337 = arith.constant 6 : i32
    %733 = tpu.dynamic_rotate %719 by %c6_i32_337 dim 0 : vector<8x256xf32>, i32 -> vector<8x256xf32>
    %c6_i32_338 = arith.constant 6 : i32
    %734 = tpu.dynamic_rotate %722 by %c6_i32_338 dim 0 : vector<8x256xf32>, i32 -> vector<8x256xf32>
    %735 = arith.select %7, %719, %676 : vector<8x256xi1>, vector<8x256xf32>
    %736 = arith.subf %735, %733 : vector<8x256xf32>
    %737 = math.absf %736 : vector<8x256xf32>
    %738 = arith.addf %696, %737 : vector<8x256xf32>
    %739 = arith.select %7, %722, %679 : vector<8x256xi1>, vector<8x256xf32>
    %740 = arith.subf %739, %734 : vector<8x256xf32>
    %741 = arith.mulf %740, %740 : vector<8x256xf32>
    %742 = arith.addf %701, %741 : vector<8x256xf32>
    %743 = arith.mulf %719, %722 : vector<8x256xf32>
    %744 = arith.mulf %743, %724 : vector<8x256xf32>
    %745 = arith.addf %704, %744 : vector<8x256xf32>
    %746 = arith.mulf %743, %743 : vector<8x256xf32>
    %747 = arith.addf %706, %746 : vector<8x256xf32>
    %748 = arith.mulf %724, %724 : vector<8x256xf32>
    %749 = arith.addf %708, %748 : vector<8x256xf32>
    %750 = arith.mulf %714, %714 : vector<8x256xf32>
    %751 = arith.addf %710, %750 : vector<8x256xf32>
    %752 = arith.mulf %716, %716 : vector<8x256xf32>
    %753 = arith.addf %712, %752 : vector<8x256xf32>
    %c2_339 = arith.constant 2 : index
    %c16_340 = arith.constant 16 : index
    %c0_341 = arith.constant 0 : index
    %754 = vector.load %arg2[%c2_339, %c16_340, %c0_341] : memref<3x64x256xf32, #tpu.memory_space<vmem>>, vector<1x8x256xf32>
    %755 = vector.shape_cast %754 : vector<1x8x256xf32> to vector<8x256xf32>
    %c2_342 = arith.constant 2 : index
    %c16_343 = arith.constant 16 : index
    %c0_344 = arith.constant 0 : index
    %756 = vector.load %arg3[%c2_342, %c16_343, %c0_344] : memref<3x64x256xf32, #tpu.memory_space<vmem>>, vector<1x8x256xf32>
    %757 = vector.shape_cast %756 : vector<1x8x256xf32> to vector<8x256xf32>
    %c2_345 = arith.constant 2 : index
    %c16_346 = arith.constant 16 : index
    %c0_347 = arith.constant 0 : index
    %758 = vector.load %arg4[%c2_345, %c16_346, %c0_347] : memref<3x64x256xf32, #tpu.memory_space<vmem>>, vector<1x8x256xf32>
    %759 = vector.shape_cast %758 : vector<1x8x256xf32> to vector<8x256xf32>
    %760 = arith.addf %755, %759 : vector<8x256xf32>
    %c2_348 = arith.constant 2 : index
    %c16_349 = arith.constant 16 : index
    %c0_350 = arith.constant 0 : index
    %761 = vector.load %arg5[%c2_348, %c16_349, %c0_350] : memref<3x64x256xf32, #tpu.memory_space<vmem>>, vector<1x8x256xf32>
    %762 = vector.shape_cast %761 : vector<1x8x256xf32> to vector<8x256xf32>
    %763 = arith.addf %757, %762 : vector<8x256xf32>
    %c2_351 = arith.constant 2 : index
    %c16_352 = arith.constant 16 : index
    %c0_353 = arith.constant 0 : index
    %764 = vector.load %arg6[%c2_351, %c16_352, %c0_353] : memref<3x64x256xf32, #tpu.memory_space<vmem>>, vector<1x8x256xf32>
    %765 = vector.shape_cast %764 : vector<1x8x256xf32> to vector<8x256xf32>
    %c254_i32_354 = arith.constant 254 : i32
    %766 = tpu.dynamic_rotate %760 by %c254_i32_354 dim 1 : vector<8x256xf32>, i32 -> vector<8x256xf32>
    %767 = arith.subf %760, %766 : vector<8x256xf32>
    %768 = math.absf %767 : vector<8x256xf32>
    %769 = arith.addf %728, %768 : vector<8x256xf32>
    %c254_i32_355 = arith.constant 254 : i32
    %770 = tpu.dynamic_rotate %763 by %c254_i32_355 dim 1 : vector<8x256xf32>, i32 -> vector<8x256xf32>
    %771 = arith.subf %763, %770 : vector<8x256xf32>
    %772 = arith.mulf %771, %771 : vector<8x256xf32>
    %773 = arith.addf %732, %772 : vector<8x256xf32>
    %c6_i32_356 = arith.constant 6 : i32
    %774 = tpu.dynamic_rotate %760 by %c6_i32_356 dim 0 : vector<8x256xf32>, i32 -> vector<8x256xf32>
    %c6_i32_357 = arith.constant 6 : i32
    %775 = tpu.dynamic_rotate %763 by %c6_i32_357 dim 0 : vector<8x256xf32>, i32 -> vector<8x256xf32>
    %776 = arith.select %7, %760, %719 : vector<8x256xi1>, vector<8x256xf32>
    %777 = arith.subf %776, %774 : vector<8x256xf32>
    %778 = math.absf %777 : vector<8x256xf32>
    %779 = arith.addf %738, %778 : vector<8x256xf32>
    %780 = arith.select %7, %763, %722 : vector<8x256xi1>, vector<8x256xf32>
    %781 = arith.subf %780, %775 : vector<8x256xf32>
    %782 = arith.mulf %781, %781 : vector<8x256xf32>
    %783 = arith.addf %742, %782 : vector<8x256xf32>
    %784 = arith.mulf %760, %763 : vector<8x256xf32>
    %785 = arith.mulf %784, %765 : vector<8x256xf32>
    %786 = arith.addf %745, %785 : vector<8x256xf32>
    %787 = arith.mulf %784, %784 : vector<8x256xf32>
    %788 = arith.addf %747, %787 : vector<8x256xf32>
    %789 = arith.mulf %765, %765 : vector<8x256xf32>
    %790 = arith.addf %749, %789 : vector<8x256xf32>
    %791 = arith.mulf %755, %755 : vector<8x256xf32>
    %792 = arith.addf %751, %791 : vector<8x256xf32>
    %793 = arith.mulf %757, %757 : vector<8x256xf32>
    %794 = arith.addf %753, %793 : vector<8x256xf32>
    %c2_358 = arith.constant 2 : index
    %c24_359 = arith.constant 24 : index
    %c0_360 = arith.constant 0 : index
    %795 = vector.load %arg2[%c2_358, %c24_359, %c0_360] : memref<3x64x256xf32, #tpu.memory_space<vmem>>, vector<1x8x256xf32>
    %796 = vector.shape_cast %795 : vector<1x8x256xf32> to vector<8x256xf32>
    %c2_361 = arith.constant 2 : index
    %c24_362 = arith.constant 24 : index
    %c0_363 = arith.constant 0 : index
    %797 = vector.load %arg3[%c2_361, %c24_362, %c0_363] : memref<3x64x256xf32, #tpu.memory_space<vmem>>, vector<1x8x256xf32>
    %798 = vector.shape_cast %797 : vector<1x8x256xf32> to vector<8x256xf32>
    %c2_364 = arith.constant 2 : index
    %c24_365 = arith.constant 24 : index
    %c0_366 = arith.constant 0 : index
    %799 = vector.load %arg4[%c2_364, %c24_365, %c0_366] : memref<3x64x256xf32, #tpu.memory_space<vmem>>, vector<1x8x256xf32>
    %800 = vector.shape_cast %799 : vector<1x8x256xf32> to vector<8x256xf32>
    %801 = arith.addf %796, %800 : vector<8x256xf32>
    %c2_367 = arith.constant 2 : index
    %c24_368 = arith.constant 24 : index
    %c0_369 = arith.constant 0 : index
    %802 = vector.load %arg5[%c2_367, %c24_368, %c0_369] : memref<3x64x256xf32, #tpu.memory_space<vmem>>, vector<1x8x256xf32>
    %803 = vector.shape_cast %802 : vector<1x8x256xf32> to vector<8x256xf32>
    %804 = arith.addf %798, %803 : vector<8x256xf32>
    %c2_370 = arith.constant 2 : index
    %c24_371 = arith.constant 24 : index
    %c0_372 = arith.constant 0 : index
    %805 = vector.load %arg6[%c2_370, %c24_371, %c0_372] : memref<3x64x256xf32, #tpu.memory_space<vmem>>, vector<1x8x256xf32>
    %806 = vector.shape_cast %805 : vector<1x8x256xf32> to vector<8x256xf32>
    %c254_i32_373 = arith.constant 254 : i32
    %807 = tpu.dynamic_rotate %801 by %c254_i32_373 dim 1 : vector<8x256xf32>, i32 -> vector<8x256xf32>
    %808 = arith.subf %801, %807 : vector<8x256xf32>
    %809 = math.absf %808 : vector<8x256xf32>
    %810 = arith.addf %769, %809 : vector<8x256xf32>
    %c254_i32_374 = arith.constant 254 : i32
    %811 = tpu.dynamic_rotate %804 by %c254_i32_374 dim 1 : vector<8x256xf32>, i32 -> vector<8x256xf32>
    %812 = arith.subf %804, %811 : vector<8x256xf32>
    %813 = arith.mulf %812, %812 : vector<8x256xf32>
    %814 = arith.addf %773, %813 : vector<8x256xf32>
    %c6_i32_375 = arith.constant 6 : i32
    %815 = tpu.dynamic_rotate %801 by %c6_i32_375 dim 0 : vector<8x256xf32>, i32 -> vector<8x256xf32>
    %c6_i32_376 = arith.constant 6 : i32
    %816 = tpu.dynamic_rotate %804 by %c6_i32_376 dim 0 : vector<8x256xf32>, i32 -> vector<8x256xf32>
    %817 = arith.select %7, %801, %760 : vector<8x256xi1>, vector<8x256xf32>
    %818 = arith.subf %817, %815 : vector<8x256xf32>
    %819 = math.absf %818 : vector<8x256xf32>
    %820 = arith.addf %779, %819 : vector<8x256xf32>
    %821 = arith.select %7, %804, %763 : vector<8x256xi1>, vector<8x256xf32>
    %822 = arith.subf %821, %816 : vector<8x256xf32>
    %823 = arith.mulf %822, %822 : vector<8x256xf32>
    %824 = arith.addf %783, %823 : vector<8x256xf32>
    %825 = arith.mulf %801, %804 : vector<8x256xf32>
    %826 = arith.mulf %825, %806 : vector<8x256xf32>
    %827 = arith.addf %786, %826 : vector<8x256xf32>
    %828 = arith.mulf %825, %825 : vector<8x256xf32>
    %829 = arith.addf %788, %828 : vector<8x256xf32>
    %830 = arith.mulf %806, %806 : vector<8x256xf32>
    %831 = arith.addf %790, %830 : vector<8x256xf32>
    %832 = arith.mulf %796, %796 : vector<8x256xf32>
    %833 = arith.addf %792, %832 : vector<8x256xf32>
    %834 = arith.mulf %798, %798 : vector<8x256xf32>
    %835 = arith.addf %794, %834 : vector<8x256xf32>
    %c2_377 = arith.constant 2 : index
    %c32_378 = arith.constant 32 : index
    %c0_379 = arith.constant 0 : index
    %836 = vector.load %arg2[%c2_377, %c32_378, %c0_379] : memref<3x64x256xf32, #tpu.memory_space<vmem>>, vector<1x8x256xf32>
    %837 = vector.shape_cast %836 : vector<1x8x256xf32> to vector<8x256xf32>
    %c2_380 = arith.constant 2 : index
    %c32_381 = arith.constant 32 : index
    %c0_382 = arith.constant 0 : index
    %838 = vector.load %arg3[%c2_380, %c32_381, %c0_382] : memref<3x64x256xf32, #tpu.memory_space<vmem>>, vector<1x8x256xf32>
    %839 = vector.shape_cast %838 : vector<1x8x256xf32> to vector<8x256xf32>
    %c2_383 = arith.constant 2 : index
    %c32_384 = arith.constant 32 : index
    %c0_385 = arith.constant 0 : index
    %840 = vector.load %arg4[%c2_383, %c32_384, %c0_385] : memref<3x64x256xf32, #tpu.memory_space<vmem>>, vector<1x8x256xf32>
    %841 = vector.shape_cast %840 : vector<1x8x256xf32> to vector<8x256xf32>
    %842 = arith.addf %837, %841 : vector<8x256xf32>
    %c2_386 = arith.constant 2 : index
    %c32_387 = arith.constant 32 : index
    %c0_388 = arith.constant 0 : index
    %843 = vector.load %arg5[%c2_386, %c32_387, %c0_388] : memref<3x64x256xf32, #tpu.memory_space<vmem>>, vector<1x8x256xf32>
    %844 = vector.shape_cast %843 : vector<1x8x256xf32> to vector<8x256xf32>
    %845 = arith.addf %839, %844 : vector<8x256xf32>
    %c2_389 = arith.constant 2 : index
    %c32_390 = arith.constant 32 : index
    %c0_391 = arith.constant 0 : index
    %846 = vector.load %arg6[%c2_389, %c32_390, %c0_391] : memref<3x64x256xf32, #tpu.memory_space<vmem>>, vector<1x8x256xf32>
    %847 = vector.shape_cast %846 : vector<1x8x256xf32> to vector<8x256xf32>
    %c254_i32_392 = arith.constant 254 : i32
    %848 = tpu.dynamic_rotate %842 by %c254_i32_392 dim 1 : vector<8x256xf32>, i32 -> vector<8x256xf32>
    %849 = arith.subf %842, %848 : vector<8x256xf32>
    %850 = math.absf %849 : vector<8x256xf32>
    %851 = arith.addf %810, %850 : vector<8x256xf32>
    %c254_i32_393 = arith.constant 254 : i32
    %852 = tpu.dynamic_rotate %845 by %c254_i32_393 dim 1 : vector<8x256xf32>, i32 -> vector<8x256xf32>
    %853 = arith.subf %845, %852 : vector<8x256xf32>
    %854 = arith.mulf %853, %853 : vector<8x256xf32>
    %855 = arith.addf %814, %854 : vector<8x256xf32>
    %c6_i32_394 = arith.constant 6 : i32
    %856 = tpu.dynamic_rotate %842 by %c6_i32_394 dim 0 : vector<8x256xf32>, i32 -> vector<8x256xf32>
    %c6_i32_395 = arith.constant 6 : i32
    %857 = tpu.dynamic_rotate %845 by %c6_i32_395 dim 0 : vector<8x256xf32>, i32 -> vector<8x256xf32>
    %858 = arith.select %7, %842, %801 : vector<8x256xi1>, vector<8x256xf32>
    %859 = arith.subf %858, %856 : vector<8x256xf32>
    %860 = math.absf %859 : vector<8x256xf32>
    %861 = arith.addf %820, %860 : vector<8x256xf32>
    %862 = arith.select %7, %845, %804 : vector<8x256xi1>, vector<8x256xf32>
    %863 = arith.subf %862, %857 : vector<8x256xf32>
    %864 = arith.mulf %863, %863 : vector<8x256xf32>
    %865 = arith.addf %824, %864 : vector<8x256xf32>
    %866 = arith.mulf %842, %845 : vector<8x256xf32>
    %867 = arith.mulf %866, %847 : vector<8x256xf32>
    %868 = arith.addf %827, %867 : vector<8x256xf32>
    %869 = arith.mulf %866, %866 : vector<8x256xf32>
    %870 = arith.addf %829, %869 : vector<8x256xf32>
    %871 = arith.mulf %847, %847 : vector<8x256xf32>
    %872 = arith.addf %831, %871 : vector<8x256xf32>
    %873 = arith.mulf %837, %837 : vector<8x256xf32>
    %874 = arith.addf %833, %873 : vector<8x256xf32>
    %875 = arith.mulf %839, %839 : vector<8x256xf32>
    %876 = arith.addf %835, %875 : vector<8x256xf32>
    %c2_396 = arith.constant 2 : index
    %c40_397 = arith.constant 40 : index
    %c0_398 = arith.constant 0 : index
    %877 = vector.load %arg2[%c2_396, %c40_397, %c0_398] : memref<3x64x256xf32, #tpu.memory_space<vmem>>, vector<1x8x256xf32>
    %878 = vector.shape_cast %877 : vector<1x8x256xf32> to vector<8x256xf32>
    %c2_399 = arith.constant 2 : index
    %c40_400 = arith.constant 40 : index
    %c0_401 = arith.constant 0 : index
    %879 = vector.load %arg3[%c2_399, %c40_400, %c0_401] : memref<3x64x256xf32, #tpu.memory_space<vmem>>, vector<1x8x256xf32>
    %880 = vector.shape_cast %879 : vector<1x8x256xf32> to vector<8x256xf32>
    %c2_402 = arith.constant 2 : index
    %c40_403 = arith.constant 40 : index
    %c0_404 = arith.constant 0 : index
    %881 = vector.load %arg4[%c2_402, %c40_403, %c0_404] : memref<3x64x256xf32, #tpu.memory_space<vmem>>, vector<1x8x256xf32>
    %882 = vector.shape_cast %881 : vector<1x8x256xf32> to vector<8x256xf32>
    %883 = arith.addf %878, %882 : vector<8x256xf32>
    %c2_405 = arith.constant 2 : index
    %c40_406 = arith.constant 40 : index
    %c0_407 = arith.constant 0 : index
    %884 = vector.load %arg5[%c2_405, %c40_406, %c0_407] : memref<3x64x256xf32, #tpu.memory_space<vmem>>, vector<1x8x256xf32>
    %885 = vector.shape_cast %884 : vector<1x8x256xf32> to vector<8x256xf32>
    %886 = arith.addf %880, %885 : vector<8x256xf32>
    %c2_408 = arith.constant 2 : index
    %c40_409 = arith.constant 40 : index
    %c0_410 = arith.constant 0 : index
    %887 = vector.load %arg6[%c2_408, %c40_409, %c0_410] : memref<3x64x256xf32, #tpu.memory_space<vmem>>, vector<1x8x256xf32>
    %888 = vector.shape_cast %887 : vector<1x8x256xf32> to vector<8x256xf32>
    %c254_i32_411 = arith.constant 254 : i32
    %889 = tpu.dynamic_rotate %883 by %c254_i32_411 dim 1 : vector<8x256xf32>, i32 -> vector<8x256xf32>
    %890 = arith.subf %883, %889 : vector<8x256xf32>
    %891 = math.absf %890 : vector<8x256xf32>
    %892 = arith.addf %851, %891 : vector<8x256xf32>
    %c254_i32_412 = arith.constant 254 : i32
    %893 = tpu.dynamic_rotate %886 by %c254_i32_412 dim 1 : vector<8x256xf32>, i32 -> vector<8x256xf32>
    %894 = arith.subf %886, %893 : vector<8x256xf32>
    %895 = arith.mulf %894, %894 : vector<8x256xf32>
    %896 = arith.addf %855, %895 : vector<8x256xf32>
    %c6_i32_413 = arith.constant 6 : i32
    %897 = tpu.dynamic_rotate %883 by %c6_i32_413 dim 0 : vector<8x256xf32>, i32 -> vector<8x256xf32>
    %c6_i32_414 = arith.constant 6 : i32
    %898 = tpu.dynamic_rotate %886 by %c6_i32_414 dim 0 : vector<8x256xf32>, i32 -> vector<8x256xf32>
    %899 = arith.select %7, %883, %842 : vector<8x256xi1>, vector<8x256xf32>
    %900 = arith.subf %899, %897 : vector<8x256xf32>
    %901 = math.absf %900 : vector<8x256xf32>
    %902 = arith.addf %861, %901 : vector<8x256xf32>
    %903 = arith.select %7, %886, %845 : vector<8x256xi1>, vector<8x256xf32>
    %904 = arith.subf %903, %898 : vector<8x256xf32>
    %905 = arith.mulf %904, %904 : vector<8x256xf32>
    %906 = arith.addf %865, %905 : vector<8x256xf32>
    %907 = arith.mulf %883, %886 : vector<8x256xf32>
    %908 = arith.mulf %907, %888 : vector<8x256xf32>
    %909 = arith.addf %868, %908 : vector<8x256xf32>
    %910 = arith.mulf %907, %907 : vector<8x256xf32>
    %911 = arith.addf %870, %910 : vector<8x256xf32>
    %912 = arith.mulf %888, %888 : vector<8x256xf32>
    %913 = arith.addf %872, %912 : vector<8x256xf32>
    %914 = arith.mulf %878, %878 : vector<8x256xf32>
    %915 = arith.addf %874, %914 : vector<8x256xf32>
    %916 = arith.mulf %880, %880 : vector<8x256xf32>
    %917 = arith.addf %876, %916 : vector<8x256xf32>
    %c2_415 = arith.constant 2 : index
    %c48_416 = arith.constant 48 : index
    %c0_417 = arith.constant 0 : index
    %918 = vector.load %arg2[%c2_415, %c48_416, %c0_417] : memref<3x64x256xf32, #tpu.memory_space<vmem>>, vector<1x8x256xf32>
    %919 = vector.shape_cast %918 : vector<1x8x256xf32> to vector<8x256xf32>
    %c2_418 = arith.constant 2 : index
    %c48_419 = arith.constant 48 : index
    %c0_420 = arith.constant 0 : index
    %920 = vector.load %arg3[%c2_418, %c48_419, %c0_420] : memref<3x64x256xf32, #tpu.memory_space<vmem>>, vector<1x8x256xf32>
    %921 = vector.shape_cast %920 : vector<1x8x256xf32> to vector<8x256xf32>
    %c2_421 = arith.constant 2 : index
    %c48_422 = arith.constant 48 : index
    %c0_423 = arith.constant 0 : index
    %922 = vector.load %arg4[%c2_421, %c48_422, %c0_423] : memref<3x64x256xf32, #tpu.memory_space<vmem>>, vector<1x8x256xf32>
    %923 = vector.shape_cast %922 : vector<1x8x256xf32> to vector<8x256xf32>
    %924 = arith.addf %919, %923 : vector<8x256xf32>
    %c2_424 = arith.constant 2 : index
    %c48_425 = arith.constant 48 : index
    %c0_426 = arith.constant 0 : index
    %925 = vector.load %arg5[%c2_424, %c48_425, %c0_426] : memref<3x64x256xf32, #tpu.memory_space<vmem>>, vector<1x8x256xf32>
    %926 = vector.shape_cast %925 : vector<1x8x256xf32> to vector<8x256xf32>
    %927 = arith.addf %921, %926 : vector<8x256xf32>
    %c2_427 = arith.constant 2 : index
    %c48_428 = arith.constant 48 : index
    %c0_429 = arith.constant 0 : index
    %928 = vector.load %arg6[%c2_427, %c48_428, %c0_429] : memref<3x64x256xf32, #tpu.memory_space<vmem>>, vector<1x8x256xf32>
    %929 = vector.shape_cast %928 : vector<1x8x256xf32> to vector<8x256xf32>
    %c254_i32_430 = arith.constant 254 : i32
    %930 = tpu.dynamic_rotate %924 by %c254_i32_430 dim 1 : vector<8x256xf32>, i32 -> vector<8x256xf32>
    %931 = arith.subf %924, %930 : vector<8x256xf32>
    %932 = math.absf %931 : vector<8x256xf32>
    %933 = arith.addf %892, %932 : vector<8x256xf32>
    %c254_i32_431 = arith.constant 254 : i32
    %934 = tpu.dynamic_rotate %927 by %c254_i32_431 dim 1 : vector<8x256xf32>, i32 -> vector<8x256xf32>
    %935 = arith.subf %927, %934 : vector<8x256xf32>
    %936 = arith.mulf %935, %935 : vector<8x256xf32>
    %937 = arith.addf %896, %936 : vector<8x256xf32>
    %c6_i32_432 = arith.constant 6 : i32
    %938 = tpu.dynamic_rotate %924 by %c6_i32_432 dim 0 : vector<8x256xf32>, i32 -> vector<8x256xf32>
    %c6_i32_433 = arith.constant 6 : i32
    %939 = tpu.dynamic_rotate %927 by %c6_i32_433 dim 0 : vector<8x256xf32>, i32 -> vector<8x256xf32>
    %940 = arith.select %7, %924, %883 : vector<8x256xi1>, vector<8x256xf32>
    %941 = arith.subf %940, %938 : vector<8x256xf32>
    %942 = math.absf %941 : vector<8x256xf32>
    %943 = arith.addf %902, %942 : vector<8x256xf32>
    %944 = arith.select %7, %927, %886 : vector<8x256xi1>, vector<8x256xf32>
    %945 = arith.subf %944, %939 : vector<8x256xf32>
    %946 = arith.mulf %945, %945 : vector<8x256xf32>
    %947 = arith.addf %906, %946 : vector<8x256xf32>
    %948 = arith.mulf %924, %927 : vector<8x256xf32>
    %949 = arith.mulf %948, %929 : vector<8x256xf32>
    %950 = arith.addf %909, %949 : vector<8x256xf32>
    %951 = arith.mulf %948, %948 : vector<8x256xf32>
    %952 = arith.addf %911, %951 : vector<8x256xf32>
    %953 = arith.mulf %929, %929 : vector<8x256xf32>
    %954 = arith.addf %913, %953 : vector<8x256xf32>
    %955 = arith.mulf %919, %919 : vector<8x256xf32>
    %956 = arith.addf %915, %955 : vector<8x256xf32>
    %957 = arith.mulf %921, %921 : vector<8x256xf32>
    %958 = arith.addf %917, %957 : vector<8x256xf32>
    %c2_434 = arith.constant 2 : index
    %c56_435 = arith.constant 56 : index
    %c0_436 = arith.constant 0 : index
    %959 = vector.load %arg2[%c2_434, %c56_435, %c0_436] : memref<3x64x256xf32, #tpu.memory_space<vmem>>, vector<1x8x256xf32>
    %960 = vector.shape_cast %959 : vector<1x8x256xf32> to vector<8x256xf32>
    %c2_437 = arith.constant 2 : index
    %c56_438 = arith.constant 56 : index
    %c0_439 = arith.constant 0 : index
    %961 = vector.load %arg3[%c2_437, %c56_438, %c0_439] : memref<3x64x256xf32, #tpu.memory_space<vmem>>, vector<1x8x256xf32>
    %962 = vector.shape_cast %961 : vector<1x8x256xf32> to vector<8x256xf32>
    %c2_440 = arith.constant 2 : index
    %c56_441 = arith.constant 56 : index
    %c0_442 = arith.constant 0 : index
    %963 = vector.load %arg4[%c2_440, %c56_441, %c0_442] : memref<3x64x256xf32, #tpu.memory_space<vmem>>, vector<1x8x256xf32>
    %964 = vector.shape_cast %963 : vector<1x8x256xf32> to vector<8x256xf32>
    %965 = arith.addf %960, %964 : vector<8x256xf32>
    %c2_443 = arith.constant 2 : index
    %c56_444 = arith.constant 56 : index
    %c0_445 = arith.constant 0 : index
    %966 = vector.load %arg5[%c2_443, %c56_444, %c0_445] : memref<3x64x256xf32, #tpu.memory_space<vmem>>, vector<1x8x256xf32>
    %967 = vector.shape_cast %966 : vector<1x8x256xf32> to vector<8x256xf32>
    %968 = arith.addf %962, %967 : vector<8x256xf32>
    %c2_446 = arith.constant 2 : index
    %c56_447 = arith.constant 56 : index
    %c0_448 = arith.constant 0 : index
    %969 = vector.load %arg6[%c2_446, %c56_447, %c0_448] : memref<3x64x256xf32, #tpu.memory_space<vmem>>, vector<1x8x256xf32>
    %970 = vector.shape_cast %969 : vector<1x8x256xf32> to vector<8x256xf32>
    %c254_i32_449 = arith.constant 254 : i32
    %971 = tpu.dynamic_rotate %965 by %c254_i32_449 dim 1 : vector<8x256xf32>, i32 -> vector<8x256xf32>
    %972 = arith.subf %965, %971 : vector<8x256xf32>
    %973 = math.absf %972 : vector<8x256xf32>
    %974 = arith.addf %933, %973 : vector<8x256xf32>
    %c254_i32_450 = arith.constant 254 : i32
    %975 = tpu.dynamic_rotate %968 by %c254_i32_450 dim 1 : vector<8x256xf32>, i32 -> vector<8x256xf32>
    %976 = arith.subf %968, %975 : vector<8x256xf32>
    %977 = arith.mulf %976, %976 : vector<8x256xf32>
    %978 = arith.addf %937, %977 : vector<8x256xf32>
    %c6_i32_451 = arith.constant 6 : i32
    %979 = tpu.dynamic_rotate %965 by %c6_i32_451 dim 0 : vector<8x256xf32>, i32 -> vector<8x256xf32>
    %c6_i32_452 = arith.constant 6 : i32
    %980 = tpu.dynamic_rotate %968 by %c6_i32_452 dim 0 : vector<8x256xf32>, i32 -> vector<8x256xf32>
    %981 = arith.select %7, %965, %924 : vector<8x256xi1>, vector<8x256xf32>
    %982 = arith.subf %981, %979 : vector<8x256xf32>
    %983 = math.absf %982 : vector<8x256xf32>
    %984 = arith.addf %943, %983 : vector<8x256xf32>
    %985 = arith.select %7, %968, %927 : vector<8x256xi1>, vector<8x256xf32>
    %986 = arith.subf %985, %980 : vector<8x256xf32>
    %987 = arith.mulf %986, %986 : vector<8x256xf32>
    %988 = arith.addf %947, %987 : vector<8x256xf32>
    %989 = arith.mulf %965, %968 : vector<8x256xf32>
    %990 = arith.mulf %989, %970 : vector<8x256xf32>
    %991 = arith.addf %950, %990 : vector<8x256xf32>
    %992 = arith.mulf %989, %989 : vector<8x256xf32>
    %993 = arith.addf %952, %992 : vector<8x256xf32>
    %994 = arith.mulf %970, %970 : vector<8x256xf32>
    %995 = arith.addf %954, %994 : vector<8x256xf32>
    %996 = arith.mulf %960, %960 : vector<8x256xf32>
    %997 = arith.addf %956, %996 : vector<8x256xf32>
    %998 = arith.mulf %962, %962 : vector<8x256xf32>
    %999 = arith.addf %958, %998 : vector<8x256xf32>
    %c0_453 = arith.constant 0 : index
    %c0_454 = arith.constant 0 : index
    %c0_455 = arith.constant 0 : index
    %c0_456 = arith.constant 0 : index
    %1000 = vector.load %arg7[%c0_453, %c0_454, %c0_455, %c0_456] : memref<1x9x8x256xf32, #tpu.memory_space<vmem>>, vector<1x1x8x256xf32>
    %1001 = vector.shape_cast %1000 : vector<1x1x8x256xf32> to vector<8x256xf32>
    %cst_457 = arith.constant 0.000000e+00 : f32
    %1002 = vector.broadcast %cst_457 : f32 to vector<8x256xf32>
    %1003 = arith.select %9, %974, %1002 : vector<8x256xi1>, vector<8x256xf32>
    %1004 = arith.addf %1001, %1003 : vector<8x256xf32>
    %c0_458 = arith.constant 0 : index
    %c0_459 = arith.constant 0 : index
    %c0_460 = arith.constant 0 : index
    %c0_461 = arith.constant 0 : index
    %1005 = vector.load %arg7[%c0_458, %c0_459, %c0_460, %c0_461] : memref<1x9x8x256xf32, #tpu.memory_space<vmem>>, vector<1x1x8x256xf32>
    %1006 = vector.shape_cast %1005 : vector<1x1x8x256xf32> to vector<8x256xf32>
    %1007 = vector.shape_cast %1004 : vector<8x256xf32> to vector<1x1x8x256xf32>
    tpu.vector_store %arg7[%c0_458, %c0_459, %c0_460, %c0_461], %1007 {strides = array<i32>} : memref<1x9x8x256xf32, #tpu.memory_space<vmem>>, vector<1x1x8x256xf32>,
    %c0_462 = arith.constant 0 : index
    %c2_463 = arith.constant 2 : index
    %c0_464 = arith.constant 0 : index
    %c0_465 = arith.constant 0 : index
    %1008 = vector.load %arg7[%c0_462, %c2_463, %c0_464, %c0_465] : memref<1x9x8x256xf32, #tpu.memory_space<vmem>>, vector<1x1x8x256xf32>
    %1009 = vector.shape_cast %1008 : vector<1x1x8x256xf32> to vector<8x256xf32>
    %cst_466 = arith.constant 0.000000e+00 : f32
    %1010 = vector.broadcast %cst_466 : f32 to vector<8x256xf32>
    %1011 = arith.select %9, %978, %1010 : vector<8x256xi1>, vector<8x256xf32>
    %1012 = arith.addf %1009, %1011 : vector<8x256xf32>
    %c0_467 = arith.constant 0 : index
    %c2_468 = arith.constant 2 : index
    %c0_469 = arith.constant 0 : index
    %c0_470 = arith.constant 0 : index
    %1013 = vector.load %arg7[%c0_467, %c2_468, %c0_469, %c0_470] : memref<1x9x8x256xf32, #tpu.memory_space<vmem>>, vector<1x1x8x256xf32>
    %1014 = vector.shape_cast %1013 : vector<1x1x8x256xf32> to vector<8x256xf32>
    %1015 = vector.shape_cast %1012 : vector<8x256xf32> to vector<1x1x8x256xf32>
    tpu.vector_store %arg7[%c0_467, %c2_468, %c0_469, %c0_470], %1015 {strides = array<i32>} : memref<1x9x8x256xf32, #tpu.memory_space<vmem>>, vector<1x1x8x256xf32>,
    %c0_471 = arith.constant 0 : index
    %c1_472 = arith.constant 1 : index
    %c0_473 = arith.constant 0 : index
    %c0_474 = arith.constant 0 : index
    %1016 = vector.load %arg7[%c0_471, %c1_472, %c0_473, %c0_474] : memref<1x9x8x256xf32, #tpu.memory_space<vmem>>, vector<1x1x8x256xf32>
    %1017 = vector.shape_cast %1016 : vector<1x1x8x256xf32> to vector<8x256xf32>
    %1018 = arith.addf %1017, %984 : vector<8x256xf32>
    %c0_475 = arith.constant 0 : index
    %c1_476 = arith.constant 1 : index
    %c0_477 = arith.constant 0 : index
    %c0_478 = arith.constant 0 : index
    %1019 = vector.load %arg7[%c0_475, %c1_476, %c0_477, %c0_478] : memref<1x9x8x256xf32, #tpu.memory_space<vmem>>, vector<1x1x8x256xf32>
    %1020 = vector.shape_cast %1019 : vector<1x1x8x256xf32> to vector<8x256xf32>
    %1021 = vector.shape_cast %1018 : vector<8x256xf32> to vector<1x1x8x256xf32>
    tpu.vector_store %arg7[%c0_475, %c1_476, %c0_477, %c0_478], %1021 {strides = array<i32>} : memref<1x9x8x256xf32, #tpu.memory_space<vmem>>, vector<1x1x8x256xf32>,
    %c0_479 = arith.constant 0 : index
    %c3 = arith.constant 3 : index
    %c0_480 = arith.constant 0 : index
    %c0_481 = arith.constant 0 : index
    %1022 = vector.load %arg7[%c0_479, %c3, %c0_480, %c0_481] : memref<1x9x8x256xf32, #tpu.memory_space<vmem>>, vector<1x1x8x256xf32>
    %1023 = vector.shape_cast %1022 : vector<1x1x8x256xf32> to vector<8x256xf32>
    %1024 = arith.addf %1023, %988 : vector<8x256xf32>
    %c0_482 = arith.constant 0 : index
    %c3_483 = arith.constant 3 : index
    %c0_484 = arith.constant 0 : index
    %c0_485 = arith.constant 0 : index
    %1025 = vector.load %arg7[%c0_482, %c3_483, %c0_484, %c0_485] : memref<1x9x8x256xf32, #tpu.memory_space<vmem>>, vector<1x1x8x256xf32>
    %1026 = vector.shape_cast %1025 : vector<1x1x8x256xf32> to vector<8x256xf32>
    %1027 = vector.shape_cast %1024 : vector<8x256xf32> to vector<1x1x8x256xf32>
    tpu.vector_store %arg7[%c0_482, %c3_483, %c0_484, %c0_485], %1027 {strides = array<i32>} : memref<1x9x8x256xf32, #tpu.memory_space<vmem>>, vector<1x1x8x256xf32>,
    %c0_486 = arith.constant 0 : index
    %c4 = arith.constant 4 : index
    %c0_487 = arith.constant 0 : index
    %c0_488 = arith.constant 0 : index
    %1028 = vector.load %arg7[%c0_486, %c4, %c0_487, %c0_488] : memref<1x9x8x256xf32, #tpu.memory_space<vmem>>, vector<1x1x8x256xf32>
    %1029 = vector.shape_cast %1028 : vector<1x1x8x256xf32> to vector<8x256xf32>
    %1030 = arith.addf %1029, %991 : vector<8x256xf32>
    %c0_489 = arith.constant 0 : index
    %c4_490 = arith.constant 4 : index
    %c0_491 = arith.constant 0 : index
    %c0_492 = arith.constant 0 : index
    %1031 = vector.load %arg7[%c0_489, %c4_490, %c0_491, %c0_492] : memref<1x9x8x256xf32, #tpu.memory_space<vmem>>, vector<1x1x8x256xf32>
    %1032 = vector.shape_cast %1031 : vector<1x1x8x256xf32> to vector<8x256xf32>
    %1033 = vector.shape_cast %1030 : vector<8x256xf32> to vector<1x1x8x256xf32>
    tpu.vector_store %arg7[%c0_489, %c4_490, %c0_491, %c0_492], %1033 {strides = array<i32>} : memref<1x9x8x256xf32, #tpu.memory_space<vmem>>, vector<1x1x8x256xf32>,
    %c0_493 = arith.constant 0 : index
    %c5 = arith.constant 5 : index
    %c0_494 = arith.constant 0 : index
    %c0_495 = arith.constant 0 : index
    %1034 = vector.load %arg7[%c0_493, %c5, %c0_494, %c0_495] : memref<1x9x8x256xf32, #tpu.memory_space<vmem>>, vector<1x1x8x256xf32>
    %1035 = vector.shape_cast %1034 : vector<1x1x8x256xf32> to vector<8x256xf32>
    %1036 = arith.addf %1035, %993 : vector<8x256xf32>
    %c0_496 = arith.constant 0 : index
    %c5_497 = arith.constant 5 : index
    %c0_498 = arith.constant 0 : index
    %c0_499 = arith.constant 0 : index
    %1037 = vector.load %arg7[%c0_496, %c5_497, %c0_498, %c0_499] : memref<1x9x8x256xf32, #tpu.memory_space<vmem>>, vector<1x1x8x256xf32>
    %1038 = vector.shape_cast %1037 : vector<1x1x8x256xf32> to vector<8x256xf32>
    %1039 = vector.shape_cast %1036 : vector<8x256xf32> to vector<1x1x8x256xf32>
    tpu.vector_store %arg7[%c0_496, %c5_497, %c0_498, %c0_499], %1039 {strides = array<i32>} : memref<1x9x8x256xf32, #tpu.memory_space<vmem>>, vector<1x1x8x256xf32>,
    %c0_500 = arith.constant 0 : index
    %c6 = arith.constant 6 : index
    %c0_501 = arith.constant 0 : index
    %c0_502 = arith.constant 0 : index
    %1040 = vector.load %arg7[%c0_500, %c6, %c0_501, %c0_502] : memref<1x9x8x256xf32, #tpu.memory_space<vmem>>, vector<1x1x8x256xf32>
    %1041 = vector.shape_cast %1040 : vector<1x1x8x256xf32> to vector<8x256xf32>
    %1042 = arith.addf %1041, %995 : vector<8x256xf32>
    %c0_503 = arith.constant 0 : index
    %c6_504 = arith.constant 6 : index
    %c0_505 = arith.constant 0 : index
    %c0_506 = arith.constant 0 : index
    %1043 = vector.load %arg7[%c0_503, %c6_504, %c0_505, %c0_506] : memref<1x9x8x256xf32, #tpu.memory_space<vmem>>, vector<1x1x8x256xf32>
    %1044 = vector.shape_cast %1043 : vector<1x1x8x256xf32> to vector<8x256xf32>
    %1045 = vector.shape_cast %1042 : vector<8x256xf32> to vector<1x1x8x256xf32>
    tpu.vector_store %arg7[%c0_503, %c6_504, %c0_505, %c0_506], %1045 {strides = array<i32>} : memref<1x9x8x256xf32, #tpu.memory_space<vmem>>, vector<1x1x8x256xf32>,
    %c0_507 = arith.constant 0 : index
    %c7 = arith.constant 7 : index
    %c0_508 = arith.constant 0 : index
    %c0_509 = arith.constant 0 : index
    %1046 = vector.load %arg7[%c0_507, %c7, %c0_508, %c0_509] : memref<1x9x8x256xf32, #tpu.memory_space<vmem>>, vector<1x1x8x256xf32>
    %1047 = vector.shape_cast %1046 : vector<1x1x8x256xf32> to vector<8x256xf32>
    %1048 = arith.addf %1047, %997 : vector<8x256xf32>
    %c0_510 = arith.constant 0 : index
    %c7_511 = arith.constant 7 : index
    %c0_512 = arith.constant 0 : index
    %c0_513 = arith.constant 0 : index
    %1049 = vector.load %arg7[%c0_510, %c7_511, %c0_512, %c0_513] : memref<1x9x8x256xf32, #tpu.memory_space<vmem>>, vector<1x1x8x256xf32>
    %1050 = vector.shape_cast %1049 : vector<1x1x8x256xf32> to vector<8x256xf32>
    %1051 = vector.shape_cast %1048 : vector<8x256xf32> to vector<1x1x8x256xf32>
    tpu.vector_store %arg7[%c0_510, %c7_511, %c0_512, %c0_513], %1051 {strides = array<i32>} : memref<1x9x8x256xf32, #tpu.memory_space<vmem>>, vector<1x1x8x256xf32>,
    %c0_514 = arith.constant 0 : index
    %c8_515 = arith.constant 8 : index
    %c0_516 = arith.constant 0 : index
    %c0_517 = arith.constant 0 : index
    %1052 = vector.load %arg7[%c0_514, %c8_515, %c0_516, %c0_517] : memref<1x9x8x256xf32, #tpu.memory_space<vmem>>, vector<1x1x8x256xf32>
    %1053 = vector.shape_cast %1052 : vector<1x1x8x256xf32> to vector<8x256xf32>
    %1054 = arith.addf %1053, %999 : vector<8x256xf32>
    %c0_518 = arith.constant 0 : index
    %c8_519 = arith.constant 8 : index
    %c0_520 = arith.constant 0 : index
    %c0_521 = arith.constant 0 : index
    %1055 = vector.load %arg7[%c0_518, %c8_519, %c0_520, %c0_521] : memref<1x9x8x256xf32, #tpu.memory_space<vmem>>, vector<1x1x8x256xf32>
    %1056 = vector.shape_cast %1055 : vector<1x1x8x256xf32> to vector<8x256xf32>
    %1057 = vector.shape_cast %1054 : vector<8x256xf32> to vector<1x1x8x256xf32>
    tpu.vector_store %arg7[%c0_518, %c8_519, %c0_520, %c0_521], %1057 {strides = array<i32>} : memref<1x9x8x256xf32, #tpu.memory_space<vmem>>, vector<1x1x8x256xf32>,
    return
  }
  func.func @transform_0(%arg0: i32, %arg1: i32) -> (i32, i32, i32) {
    %c4_i32 = arith.constant 4 : i32
    %0 = arith.muli %arg0, %c4_i32 : i32
    %1 = arith.addi %0, %arg1 : i32
    %c0_i32 = arith.constant 0 : i32
    %c0_i32_0 = arith.constant 0 : i32
    %c0_i32_1 = arith.constant 0 : i32
    return %c0_i32, %1, %c0_i32_0 : i32, i32, i32
  }
  func.func @transform_1(%arg0: i32, %arg1: i32) -> (i32, i32, i32) {
    %c4_i32 = arith.constant 4 : i32
    %0 = arith.muli %arg0, %c4_i32 : i32
    %1 = arith.addi %0, %arg1 : i32
    %c0_i32 = arith.constant 0 : i32
    %c0_i32_0 = arith.constant 0 : i32
    %c0_i32_1 = arith.constant 0 : i32
    return %c0_i32, %1, %c0_i32_0 : i32, i32, i32
  }
  func.func @transform_2(%arg0: i32, %arg1: i32) -> (i32, i32, i32) {
    %c4_i32 = arith.constant 4 : i32
    %0 = arith.muli %arg0, %c4_i32 : i32
    %1 = arith.addi %0, %arg1 : i32
    %c0_i32 = arith.constant 0 : i32
    %c0_i32_0 = arith.constant 0 : i32
    %c0_i32_1 = arith.constant 0 : i32
    return %c0_i32, %1, %c0_i32_0 : i32, i32, i32
  }
  func.func @transform_3(%arg0: i32, %arg1: i32) -> (i32, i32, i32) {
    %c4_i32 = arith.constant 4 : i32
    %0 = arith.muli %arg0, %c4_i32 : i32
    %1 = arith.addi %0, %arg1 : i32
    %c0_i32 = arith.constant 0 : i32
    %c0_i32_0 = arith.constant 0 : i32
    %c0_i32_1 = arith.constant 0 : i32
    return %c0_i32, %1, %c0_i32_0 : i32, i32, i32
  }
  func.func @transform_4(%arg0: i32, %arg1: i32) -> (i32, i32, i32) {
    %c4_i32 = arith.constant 4 : i32
    %0 = arith.muli %arg0, %c4_i32 : i32
    %1 = arith.addi %0, %arg1 : i32
    %c0_i32 = arith.constant 0 : i32
    %c0_i32_0 = arith.constant 0 : i32
    %c0_i32_1 = arith.constant 0 : i32
    return %c0_i32, %1, %c0_i32_0 : i32, i32, i32
  }
  func.func @transform_5(%arg0: i32, %arg1: i32) -> (i32, i32, i32, i32) {
    %c0_i32 = arith.constant 0 : i32
    %c0_i32_0 = arith.constant 0 : i32
    %c0_i32_1 = arith.constant 0 : i32
    %c0_i32_2 = arith.constant 0 : i32
    return %arg0, %c0_i32, %c0_i32_0, %c0_i32_1 : i32, i32, i32, i32
  }
}

</mosaic_0001>

<bundles_post_ra>
// kernel: tpu_custom_call.1
= control target key start
LH: loop header
LB: loop body
LE: loop exit
PB: predicated region body
PF: predicated region fallthrough
CT: control target
= control target key end

     0   :  { %10 = vsyncpa [#allocation3], 0  ;;  %s6180_s0 = inlined_call_operand.hbm [shape: f32[3,256,256], index: 0, kind: input, shape index: {}]   ;;  %s6181_s1 = inlined_call_operand.hbm [shape: f32[3,256,256], index: 1, kind: input, shape index: {}]   ;;  %s6182_s2 = inlined_call_operand.hbm [shape: f32[3,256,256], index: 2, kind: input, shape index: {}]   ;;  %s6183_s3 = inlined_call_operand.hbm [shape: f32[3,256,256], index: 3, kind: input, shape index: {}]   ;;  %s6184_s4 = inlined_call_operand.hbm [shape: f32[3,256,256], index: 4, kind: input, shape index: {}]   ;;  %s6185_s5 = inlined_call_operand.hbm [shape: f32[1,9,8,256], index: 5, kind: output, shape index: {}]  }
   0x1   :  { %12 = vsyncpa [#allocation3 + $0x1], 0 }
   0x2   :  { %13 = vsyncpa [#allocation6], 0 }
   0x3   :  { %15 = vsyncpa [#allocation6 + $0x1], 0 }
   0x4   :  { %16 = vsyncpa [#allocation9], 0 }
   0x5   :  { %18 = vsyncpa [#allocation9 + $0x1], 0 }
   0x6   :  { %19 = vsyncpa [#allocation4], 0  ;;  %s3270_s18 = smov 0   ;;  %s3272_s19 = smov 0  }
   0x7   :  { %s3274_s20 = smov 0   ;;  %s3276_s21 = smov 0  }
   0x8   :  { %s3278_s22 = smov 0   ;;  %s3280_s23 = smov 0  }
   0x9 LB: > { %s3299_s24 = sadd.s32 4294967295, %s3203_s23   ;;  %s34_s25 = sadd.s32 1, %s3199_s22  ;;  %s3203_s23 = sphi %s3280_s23, %s25_s23   ;;  %s3199_s22 = sphi %s3278_s22, %s6697_s22   ;;  %s3195_s21 = sphi %s3276_s21, %s6696_s21   ;;  %s3191_s20 = sphi %s3274_s20, %s6695_s20   ;;  %s3187_s19 = sphi %s3272_s19, %s6694_s19   ;;  %s3183_s18 = sphi %s3270_s18, %s6693_s18  }
   0xa   : > { %p35_p0 = scmp.ge.s32.totalorder %s34_s25, 4  ;;  %s48_s26 = sadd.s32 1, %s3191_s20 }
   0xb   : > { %p55_p1 = scmp.ne.s32.totalorder %s3191_s20, %s3187_s19  ;;  %p56_p2 = scmp.eq.s32.totalorder %s3203_s23, 0 }
   0xc   : > { %s6699_s25 = smov (%p35_p0, %s34_s25), 0  ;;  %p61_p4 = scmp.ne.s32.totalorder %s3187_s19, %s3183_s18 }
   0xd   : > { %p3308_p3 = por %p56_p2, %p55_p1  ;;  %s45_s28 = ssub.s32 %s3199_s22, %s6699_s25 }
   0xe   : > { %p62_p5 = scmp.eq.s32.totalorder %s3299_s24, 0  ;;  %p46_p6 = scmp.eq.s32.totalorder %s45_s28, 0 }
   0xf   : > { %p2775_p8 = scmp.ge.s32.totalorder %s3203_s23, 4 }
  0x10   : > { %p3316_p7 = por %p62_p5, %p61_p4 }
  0x11   : > { %s3321_s30 = scalar_select %p46_p6, %s3191_s20, %s48_s26  }
  0x12   : > { %227 = sbr.rel (%p2775_p8) target bundleno = 85 (0x55), region = 16 }
  0x17   : > { %s231_s6 = sand.u32 1, %s3191_s20   ;;  %s3328_s8 = sshll.u32 %s3199_s22, 11 }
  0x18   : > { %s3325_s7 = smul.u32 384, %s231_s6  ;;  %s3205_s9 = smov 8192  }
  0x19   : > { %2984 = sst [smem:[#allocation13]] (%p3308_p3), %s3205_s9  ;;  %s244_s13 = scalar_lea.hbm %s6180_s0, %s3328_s8 }
  0x1a   : > { %s2983_s10 = scalar_select %p3308_p3, [#allocation0], [#allocation22] }
  0x1b   : > { %s235_s15 = scalar_lea.vmem [#allocation2], %s3325_s7  ;;  %s3206_s17 = smov 2048  }
  0x1c   : > { %s249_s14 = sld [smem:[%s2983_s10]]   ;;  %s257_s16 = sshll.u32 %s235_s15, 4  ;;  %s258_s16 = int_to_ptr.vmem [resolvable:$true] %s257_s16 }
  0x1d   : > { %2985 = sst [smem:[#allocation13 + $0x1]] (%p3308_p3), %s3206_s17  ;;  %s3207_s18 = smov 8  }
  0x1e   : > { %2986 = sst [smem:[#allocation13 + $0x2]] (%p3308_p3), %s3207_s18  ;;  %s3208_s26 = smov 256  }
  0x1f   : > { %2987 = sst [smem:[#allocation13 + $0x3]] (%p3308_p3), %s3208_s26  ;;  %s3209_s28 = smov 16  }
  0x20   : > { %2988 = sst [smem:[#allocation13 + $0x4]] (%p3308_p3), %s3208_s26  ;;  %s232_s11 = scalar_lea.sflag [#allocation3], %s231_s6 }
  0x21   : > { %2989 = sst [smem:[#allocation13 + $0x5]] (%p3308_p3), %s3209_s28  ;;  %s3210_s12 = smov 131072  }
  0x22   : > { %s2779_s9 = sshll.u32 %s249_s14, 26 }
  0x23   : > { %s2780_s10 = sadd.s32 134217728, %s2779_s9 }
  0x24   : > { %2990 = dma.general (%p3308_p3), %s244_s13, 6144, %s258_s16, %s232_s11, %s3210_s12, [#allocation13], %s2780_s10, 0  }
  0x25   : > { %s6186_s15 = sand.u32 1, %s3203_s23   ;;  %s293_s26 = scalar_lea.hbm %s6181_s1, %s3328_s8 }
  0x26   : > { %s2991_s14 = scalar_select %p3308_p3, [#allocation0], [#allocation23] }
  0x27   : > { %s284_s6 = scalar_lea.vmem [#allocation5], %s3325_s7  ;;  %s3211_s16 = smov 8192  }
  0x28   : > { %s306_s28 = sshll.u32 %s284_s6, 4  ;;  %s298_s13 = sld [smem:[%s2991_s14]]   ;;  %s307_s28 = int_to_ptr.vmem [resolvable:$true] %s306_s28 }
  0x29   : > { %2992 = sst [smem:[#allocation15]] (%p3308_p3), %s3211_s16  ;;  %s3212_s9 = smov 2048  }
  0x2a   : > { %2993 = sst [smem:[#allocation15 + $0x1]] (%p3308_p3), %s3212_s9  ;;  %s3213_s10 = smov 8  }
  0x2b   : > { %2994 = sst [smem:[#allocation15 + $0x2]] (%p3308_p3), %s3213_s10  ;;  %s3214_s11 = smov 256  }
  0x2c   : > { %2995 = sst [smem:[#allocation15 + $0x3]] (%p3308_p3), %s3214_s11  ;;  %s3215_s17 = smov 16  }
  0x2d   : > { %2996 = sst [smem:[#allocation15 + $0x4]] (%p3308_p3), %s3214_s11  ;;  %s281_s14 = scalar_lea.sflag [#allocation6], %s6186_s15 }
  0x2e   : > { %s2784_s12 = sshll.u32 %s298_s13, 26  ;;  %2997 = sst [smem:[#allocation15 + $0x5]] (%p3308_p3), %s3215_s17 }
  0x2f   : > { %s2785_s18 = sadd.s32 134217728, %s2784_s12  ;;  %s3216_s6 = smov 131072  }
  0x30   : > { %2998 = dma.general (%p3308_p3), %s293_s26, 6144, %s307_s28, %s281_s14, %s3216_s6, [#allocation15], %s2785_s18, 0  }
  0x31   : > { %s342_s13 = scalar_lea.hbm %s6182_s2, %s3328_s8  ;;  %s333_s11 = scalar_lea.vmem [#allocation7], %s3325_s7 }
  0x32   : > { %s2999_s10 = scalar_select %p3308_p3, [#allocation0], [#allocation24] }
  0x33   : > { %s355_s12 = sshll.u32 %s333_s11, 4  ;;  %s3217_s26 = smov 8192   ;;  %s356_s12 = int_to_ptr.vmem [resolvable:$true] %s355_s12 }
  0x34   : > { %s347_s17 = sld [smem:[%s2999_s10]]   ;;  %s3218_s28 = smov 2048  }
  0x35   : > { %3000 = sst [smem:[#allocation17]] (%p3308_p3), %s3217_s26  ;;  %s3219_s18 = smov 8  }
  0x36   : > { %3001 = sst [smem:[#allocation17 + $0x1]] (%p3308_p3), %s3218_s28  ;;  %s3220_s6 = smov 256  }
  0x37   : > { %3002 = sst [smem:[#allocation17 + $0x2]] (%p3308_p3), %s3219_s18  ;;  %s3221_s9 = smov 16  }
  0x38   : > { %3003 = sst [smem:[#allocation17 + $0x3]] (%p3308_p3), %s3220_s6  ;;  %s3222_s11 = smov 131072  }
  0x39   : > { %3004 = sst [smem:[#allocation17 + $0x4]] (%p3308_p3), %s3220_s6 }
  0x3a   : > { %s2789_s16 = sshll.u32 %s347_s17, 26  ;;  %3005 = sst [smem:[#allocation17 + $0x5]] (%p3308_p3), %s3221_s9 }
  0x3b   : > { %s2790_s10 = sadd.s32 134217728, %s2789_s16 }
  0x3c   : > { %3006 = dma.general (%p3308_p3), %s342_s13, 6144, %s356_s12, %s281_s14, %s3222_s11, [#allocation17], %s2790_s10, 0  }
  0x3d   : > { %s391_s28 = scalar_lea.hbm %s6183_s3, %s3328_s8  ;;  %s382_s18 = scalar_lea.vmem [#allocation8], %s3325_s7 }
  0x3e   : > { %s3007_s17 = scalar_select %p3308_p3, [#allocation0], [#allocation25] }
  0x3f   : > { %s404_s6 = sshll.u32 %s382_s18, 4  ;;  %s3223_s14 = smov 8192   ;;  %s405_s6 = int_to_ptr.vmem [resolvable:$true] %s404_s6 }
  0x40   : > { %s396_s16 = sld [smem:[%s3007_s17]]   ;;  %s3224_s15 = smov 2048  }
  0x41   : > { %3008 = sst [smem:[#allocation19]] (%p3308_p3), %s3223_s14  ;;  %s3225_s13 = smov 8  }
  0x42   : > { %3009 = sst [smem:[#allocation19 + $0x1]] (%p3308_p3), %s3224_s15  ;;  %s3226_s12 = smov 256  }
  0x43   : > { %3010 = sst [smem:[#allocation19 + $0x2]] (%p3308_p3), %s3225_s13  ;;  %s3227_s10 = smov 16  }
  0x44   : > { %3011 = sst [smem:[#allocation19 + $0x3]] (%p3308_p3), %s3226_s12  ;;  %s6320_s26 = sand.u32 1, %s3203_s23  }
  0x45   : > { %3012 = sst [smem:[#allocation19 + $0x4]] (%p3308_p3), %s3226_s12  ;;  %s379_s17 = scalar_lea.sflag [#allocation9], %s6320_s26 }
  0x46   : > { %s2794_s9 = sshll.u32 %s396_s16, 26  ;;  %3013 = sst [smem:[#allocation19 + $0x5]] (%p3308_p3), %s3227_s10 }
  0x47   : > { %s2795_s11 = sadd.s32 134217728, %s2794_s9  ;;  %s3228_s18 = smov 131072  }
  0x48   : > { %3014 = dma.general (%p3308_p3), %s391_s28, 6144, %s405_s6, %s379_s17, %s3228_s18, [#allocation19], %s2795_s11, 0  }
  0x49   : > { %s440_s16 = scalar_lea.hbm %s6184_s4, %s3328_s8  ;;  %s431_s12 = scalar_lea.vmem [#allocation10], %s3325_s7 }
  0x4a   : > { %s3015_s13 = scalar_select %p3308_p3, [#allocation0], [#allocation26] }
  0x4b   : > { %s453_s9 = sshll.u32 %s431_s12, 4  ;;  %s3229_s28 = smov 8192   ;;  %s454_s9 = int_to_ptr.vmem [resolvable:$true] %s453_s9 }
  0x4c   : > { %s445_s10 = sld [smem:[%s3015_s13]]   ;;  %s3230_s6 = smov 2048  }
  0x4d   : > { %3016 = sst [smem:[#allocation21]] (%p3308_p3), %s3229_s28  ;;  %s3231_s11 = smov 8  }
  0x4e   : > { %3017 = sst [smem:[#allocation21 + $0x1]] (%p3308_p3), %s3230_s6  ;;  %s3232_s26 = smov 256  }
  0x4f   : > { %3018 = sst [smem:[#allocation21 + $0x2]] (%p3308_p3), %s3231_s11  ;;  %s3233_s7 = smov 16  }
  0x50   : > { %3019 = sst [smem:[#allocation21 + $0x3]] (%p3308_p3), %s3232_s26  ;;  %s3234_s14 = smov 131072  }
  0x51   : > { %3020 = sst [smem:[#allocation21 + $0x4]] (%p3308_p3), %s3232_s26 }
  0x52   : > { %s2799_s8 = sshll.u32 %s445_s10, 26  ;;  %3021 = sst [smem:[#allocation21 + $0x5]] (%p3308_p3), %s3233_s7 }
  0x53   : > { %s2800_s18 = sadd.s32 134217728, %s2799_s8 }
  0x54   : > { %3022 = dma.general (%p3308_p3), %s440_s16, 6144, %s454_s9, %s379_s17, %s3234_s14, [#allocation21], %s2800_s18, 0  }
  0x55 PF: > { %p2801_p9 = scmp.ge.s32.totalorder %s3203_s23, 1  ;;  %p474_p10 = scmp.lt.s32.totalorder %s3203_s23, 5 }
  0x57   : > { %p475_p11 = pnand %p2801_p9, %p474_p10 }
  0x59   : > { %478 = sbr.rel (%p475_p11) target bundleno = 566 (0x236), region = 40 }
  0x5e   : > { %s480_s15 = sand.u32 1, %s3187_s19  }
  0x5f   : > { %s2982_s13 = smul.u32 384, %s480_s15  ;;  %s481_s12 = scalar_lea.sflag [#allocation3], %s480_s15 }
  0x61   : > { %s3443_s10 = scalar_lea.vmem [#allocation2], %s2982_s13 }
  0x62   : > { %3166 = dma.done.wait (%p3316_p7), %s481_s12, 6144  }
  0x63   : > { %3168 = vsyncadd (%p3316_p7), %s481_s12, 4294961152  ;;  %s489_s27 = sand.u32 1, %s3299_s24   ;;  %s3450_s16 = scalar_lea.vmem [#allocation5], %s2982_s13 }
  0x64   : > { %s490_s17 = scalar_lea.sflag [#allocation6], %s489_s27 }
  0x65   : > { %3170 = dma.done.wait (%p3316_p7), %s490_s17, 12288  }
  0x66   : > { %3172 = vsyncadd (%p3316_p7), %s490_s17, 4294955008  ;;  %s3456_s9 = scalar_lea.vmem [#allocation7], %s2982_s13  ;;  %s508_s28 = scalar_lea.sflag [#allocation9], %s489_s27 }
  0x67   : > { %s3458_s6 = scalar_lea.vmem [#allocation8], %s2982_s13 }
  0x68   : > { %3174 = dma.done.wait (%p3316_p7), %s508_s28, 12288  }
  0x69   : > { %3176 = vsyncadd (%p3316_p7), %s508_s28, 4294955008  ;;  %s3464_s11 = scalar_lea.vmem [#allocation10], %s2982_s13  ;;  %p2802_p12 = scmp.ne.s32.totalorder %s3195_s21, 0 }
  0x6b   : > { %580 = sbr.rel (%p2802_p12) target bundleno = 122 (0x7a), region = 64 }
  0x70   : > { %v3235_v0 = vmov 0.0  }
  0x71   : > { %581 = vst [vmem:[#allocation11] sm:$0xff] %v3235_v0  ;;  %582 = vst [vmem:[#allocation11 + $0x8] sm:$0xff] %v3235_v0 }
  0x72   : > { %583 = vst [vmem:[#allocation11 + $0x10] sm:$0xff] %v3235_v0  ;;  %584 = vst [vmem:[#allocation11 + $0x18] sm:$0xff] %v3235_v0 }
  0x73   : > { %585 = vst [vmem:[#allocation11 + $0x20] sm:$0xff] %v3235_v0  ;;  %586 = vst [vmem:[#allocation11 + $0x28] sm:$0xff] %v3235_v0 }
  0x74   : > { %587 = vst [vmem:[#allocation11 + $0x30] sm:$0xff] %v3235_v0  ;;  %588 = vst [vmem:[#allocation11 + $0x38] sm:$0xff] %v3235_v0 }
  0x75   : > { %589 = vst [vmem:[#allocation11 + $0x40] sm:$0xff] %v3235_v0  ;;  %590 = vst [vmem:[#allocation11 + $0x48] sm:$0xff] %v3235_v0 }
  0x76   : > { %591 = vst [vmem:[#allocation11 + $0x50] sm:$0xff] %v3235_v0  ;;  %592 = vst [vmem:[#allocation11 + $0x58] sm:$0xff] %v3235_v0 }
  0x77   : > { %593 = vst [vmem:[#allocation11 + $0x60] sm:$0xff] %v3235_v0  ;;  %594 = vst [vmem:[#allocation11 + $0x68] sm:$0xff] %v3235_v0 }
  0x78   : > { %595 = vst [vmem:[#allocation11 + $0x70] sm:$0xff] %v3235_v0  ;;  %596 = vst [vmem:[#allocation11 + $0x78] sm:$0xff] %v3235_v0 }
  0x79   : > { %597 = vst [vmem:[#allocation11 + $0x80] sm:$0xff] %v3235_v0  ;;  %598 = vst [vmem:[#allocation11 + $0x88] sm:$0xff] %v3235_v0 }
  0x7a PF: > { %v609_v1 = vld [vmem:[%s3450_s16] sm:$0xff]  ;;  %v6187_v3 = vlaneseq  ;;  %v610_v9 = vld [vmem:[%s3450_s16 + $0x8] sm:$0xff]  ;;  %s3236_s21 = smov 126   ;;  %v689_v22 = vld [vmem:[%s3443_s10 + $0x18] sm:$0xff]  ;;  %s3237_s29 = smov [#allocation11]  }
  0x7b   : > { %v615_v2 = vld [vmem:[%s3458_s6] sm:$0xff]  ;;  %v3472_v6 = vmul.f32 %v609_v1, %v609_v1  ;;  %v616_v14 = vld [vmem:[%s3458_s6 + $0x8] sm:$0xff]  ;;  %v685_v19 = vmul.f32 %v610_v9, %v610_v9  ;;  %v693_v23 = vld [vmem:[%s3456_s9 + $0x18] sm:$0xff]  ;;  %v761_v50 = vmul.f32 %v689_v22, %v689_v22  ;;  %s2613_s26 = sshll.u32 %s3237_s29, 4  ;;  %p3032_p13 = scmp.eq.s32.totalorder %s3299_s24, 3  ;;  %s2614_s26 = int_to_ptr.vmem [resolvable:$true] %s2613_s26 }
  0x7c   : > { %v607_v4 = vld [vmem:[%s3443_s10] sm:$0xff]  ;;  %v3470_v5 = vadd.f32 %v615_v2, %v609_v1  ;;  %v3478_v10 = vshrl.u32 %v6187_v3, 7  ;;  %v608_v15 = vld [vmem:[%s3443_s10 + $0x8] sm:$0xff]  ;;  %v3490_v18 = vadd.f32 %v616_v14, %v610_v9  ;;  %v3511_v34 = vadd.f32 %v693_v23, %v689_v22  ;;  %v688_v39 = vld [vmem:[%s3443_s10 + $0x10] sm:$0xff]  ;;  %s3117_s8 = scalar_lea.vmem %s2614_s26, 2304  ;;  %p3124_p3 = scmp.lt.s32.totalorder %s2614_s26, %s2614_s26 }
  0x7d   : > { %v611_v7 = vld [vmem:[%s3456_s9] sm:$0xff]  ;;  %v680_v13 = vmul.f32 %v607_v4, %v607_v4  ;;  %v612_v16 = vld [vmem:[%s3456_s9 + $0x8] sm:$0xff]  ;;  %v681_v26 = vmul.f32 %v608_v15, %v608_v15  ;;  %v692_v40 = vld [vmem:[%s3456_s9 + $0x10] sm:$0xff]  ;;  %v760_v58 = vmul.f32 %v688_v39, %v688_v39  ;;  %p3118_p0 = scmp.ne.s32.totalorder %s2614_s26, %s3117_s8  ;;  %p3125_p4 = scmp.lt.s32.totalorder %s3117_s8, %s3117_s8 }
  0x7e   : > { %6321 = vst [vmem:[#allocation31_spill] sm:$0xff] %v3470_v5  ;;  %v619_v8 = vld [vmem:[%s3464_s11] sm:$0xff]  ;;  %v3480_v11 = vadd.f32 %v611_v7, %v607_v4  ;;  %634 = vrot.lane.b32.xlu1 %v3470_v5, %s3236_s21  ;;  %v648_v17 = vrot.slane %v3470_v5, 2  ;;  %6323 = vst [vmem:[#allocation33_spill] sm:$0xff] %v3490_v18  ;;  %v3492_v20 = vadd.f32 %v612_v16, %v608_v15  ;;  %v620_v21 = vld [vmem:[%s3464_s11 + $0x8] sm:$0xff]  ;;  %vm604_vm0 = vcmp.lt.s32.totalorder %v3478_v10, 6 }
  0x7f   : > { %v3482_v12 = vmul.f32 %v619_v8, %v619_v8  ;;  %v649_v28 = vrot.slane %v3490_v18, 2  ;;  %v677_v33 = vmul.f32 %v620_v21, %v620_v21  ;;  %6325 = vst [vmem:[#allocation35_spill] sm:$0xff] %v3511_v34  ;;  %v727_v44 = vrot.slane %v3511_v34, 2  ;;  %v691_v45 = vld [vmem:[%s3450_s16 + $0x18] sm:$0xff]  ;;  %v690_v7 = vld [vmem:[%s3450_s16 + $0x10] sm:$0xff]  ;;  %p3119_p1 = pnand %p3118_p0, %p3032_p13  ;;  %p3126_p5 = por %p3125_p4, %p3124_p3 }
  0x80   : > { %6322 = vst [vmem:[#allocation32_spill] sm:$0xff] %v3480_v11  ;;  %6324 = vst [vmem:[#allocation34_spill] sm:$0xff] %v3492_v20  ;;  %621 = vrot.lane.b32.xlu0 %v3480_v11, %s3236_s21  ;;  %v646_v24 = vrot.slane %v3480_v11, 2  ;;  %v666_v25 = vmul.f32 %v3470_v5, %v3480_v11  ;;  %v658_v27 = vsub.f32 %v3470_v5, %v648_v17  ;;  %v647_v29 = vrot.slane %v3492_v20, 2  ;;  %v697_v46 = vld [vmem:[%s3458_s6 + $0x18] sm:$0xff]  ;;  %v700_v9 = vld [vmem:[%s3464_s11 + $0x10] sm:$0xff] }
  0x81   : > { %v667_v30 = vmul.f32 %v3490_v18, %v3492_v20  ;;  %v659_v37 = vsub.f32 %v3490_v18, %v649_v28  ;;  %v701_v51 = vld [vmem:[%s3464_s11 + $0x18] sm:$0xff]  ;;  %v731_v54 = vsel %vm604_vm0, %v3511_v34, %v3492_v20  ;;  %v3541_v55 = vadd.f32 %v692_v40, %v688_v39  ;;  %p3120_p2 = pneg %p3119_p1 }
  0x82   : > { %v650_v31 = vsub.f32 %v3480_v11, %v646_v24  ;;  %v3509_v32 = vmul.f32 %v666_v25, %v619_v8  ;;  %v660_v35 = vsel %vm604_vm0, %v658_v27, 0.0  ;;  %v3515_v36 = vmul.f32 %v666_v25, %v666_v25  ;;  %636 = vrot.lane.b32.xlu1 %v3490_v18, %s3236_s21  ;;  %v696_v8 = vld [vmem:[%s3458_s6 + $0x10] sm:$0xff] }
  0x83   : > { %v651_v38 = vsub.f32 %v3492_v20, %v647_v29  ;;  %v3523_v41 = vmul.f32 %v660_v35, %v660_v35  ;;  %v669_v43 = vmul.f32 %v667_v30, %v620_v21  ;;  %v673_v48 = vmul.f32 %v667_v30, %v667_v30  ;;  %6326 = vst [vmem:[#allocation36_spill] sm:$0xff] %v3541_v55  ;;  %v769_v21 = vld [vmem:[%s3443_s10 + $0x28] sm:$0xff]  ;;  %p3127_p6 = pnand %p3126_p5, %p3120_p2 }
  0x84   : > { %v652_v42 = vsel %vm604_vm0, %v650_v31, 0.0  ;;  %623 = vrot.lane.b32.xlu0 %v3492_v20, %s3236_s21  ;;  %v661_v52 = vsel %vm604_vm0, %v659_v37, 0.0  ;;  %v733_v56 = vsub.f32 %v731_v54, %v727_v44  ;;  %v763_v57 = vadd.f32 %v761_v50, %v681_v26  ;;  %v771_v44 = vld [vmem:[%s3450_s16 + $0x28] sm:$0xff] }
  0x85   : > { %v654_v47 = vand.u32 2147483647, %v652_v42  ;;  %v653_v49 = vsel %vm604_vm0, %v651_v38, 0.0  ;;  %v3545_v59 = vadd.f32 %v697_v46, %v691_v45  ;;  %v726_v60 = vrot.slane %v3541_v55, 2  ;;  %v772_v42 = vld [vmem:[%s3456_s9 + $0x20] sm:$0xff] }
  0x86   : > { %v655_v53 = vand.u32 2147483647, %v653_v49  ;;  %704 = vrot.lane.b32.xlu1 %v3511_v34, %s3236_s21  ;;  %v730_v61 = vsel %vm604_vm0, %v3541_v55, %v3480_v11  ;;  %v757_v62 = vmul.f32 %v701_v51, %v701_v51  ;;  %v765_v63 = vmul.f32 %v691_v45, %v691_v45  ;;  %v777_v45 = vld [vmem:[%s3458_s6 + $0x28] sm:$0xff] }
  0x87   : > { %6327 = vst [vmem:[#allocation37_spill] sm:$0xff] %v3545_v59  ;;  %v735_v0 = vand.u32 2147483647, %v733_v56  ;;  %v762_v1 = vadd.f32 %v760_v58, %v680_v13  ;;  %v729_v2 = vrot.slane %v3545_v59, 2  ;;  %v747_v4 = vmul.f32 %v3545_v59, %v3511_v34  ;;  %v773_v13 = vld [vmem:[%s3456_s9 + $0x28] sm:$0xff] }
  0x88   : > { %702 = vrot.lane.b32.xlu0 %v3541_v55, %s3236_s21  ;;  %v663_v14 = vmul.f32 %v661_v52, %v661_v52  ;;  %v732_v15 = vsub.f32 %v730_v61, %v726_v60  ;;  %v3560_v16 = vadd.f32 %v765_v63, %v685_v19  ;;  %v739_v17 = vsel %vm604_vm0, %v3545_v59, %v3490_v18 }
  0x89   : > { %v749_v22 = vmul.f32 %v747_v4, %v701_v51  ;;  %v753_v23 = vmul.f32 %v747_v4, %v747_v4  ;;  %v3568_v24 = vadd.f32 %v757_v62, %v677_v33  ;;  %v741_v25 = vsub.f32 %v739_v17, %v729_v2  ;;  %v768_v33 = vld [vmem:[%s3443_s10 + $0x20] sm:$0xff]  ;;  %v781_v62 = vld [vmem:[%s3464_s11 + $0x28] sm:$0xff] }
  0x8a   : > { %716 = vrot.lane.b32.xlu1 %v3545_v59, %s3236_s21  ;;  %v734_v19 = vand.u32 2147483647, %v732_v15  ;;  %v3572_v26 = vadd.f32 %v696_v8, %v690_v7  ;;  %v756_v27 = vmul.f32 %v700_v9, %v700_v9  ;;  %v764_v28 = vmul.f32 %v690_v7, %v690_v7  ;;  %v776_v7 = vld [vmem:[%s3458_s6 + $0x20] sm:$0xff] }
  0x8b   : > { %v3574_v29 = vadd.f32 %v735_v0, %v655_v53  ;;  %v743_v30 = vmul.f32 %v741_v25, %v741_v25  ;;  %v3576_v31 = vadd.f32 %v749_v22, %v669_v43  ;;  %v3578_v35 = vadd.f32 %v773_v13, %v769_v21  ;;  %v849_v13 = vld [vmem:[%s3443_s10 + $0x38] sm:$0xff] }
  0x8c   : > { %6328 = vst [vmem:[#allocation38_spill] sm:$0xff] %v3572_v26  ;;  %v3581_v37 = vadd.f32 %v734_v19, %v654_v47  ;;  %v3583_v38 = vadd.f32 %v753_v23, %v673_v48  ;;  %v728_v39 = vrot.slane %v3572_v26, 2  ;;  %v746_v40 = vmul.f32 %v3572_v26, %v3541_v55  ;;  %714 = vrot.lane.b32.xlu0 %v3572_v26, %s3236_s21  ;;  %v853_v19 = vld [vmem:[%s3456_s9 + $0x38] sm:$0xff] }
  0x8d   : > { %6329 = vst [vmem:[#allocation39_spill] sm:$0xff] %v3578_v35  ;;  %v3594_v43 = vadd.f32 %v756_v27, %v3482_v12  ;;  %v766_v46 = vadd.f32 %v764_v28, %v3472_v6  ;;  %v738_v47 = vsel %vm604_vm0, %v3572_v26, %v3470_v5  ;;  %v807_v48 = vrot.slane %v3578_v35, 2  ;;  %v848_v27 = vld [vmem:[%s3443_s10 + $0x30] sm:$0xff] }
  0x8e   : > { %784 = vrot.lane.b32.xlu1 %v3578_v35, %s3236_s21  ;;  %v748_v49 = vmul.f32 %v746_v40, %v700_v9  ;;  %v752_v50 = vmul.f32 %v746_v40, %v746_v40  ;;  %v740_v51 = vsub.f32 %v738_v47, %v728_v39  ;;  %v841_v52 = vmul.f32 %v769_v21, %v769_v21  ;;  %v780_v21 = vld [vmem:[%s3464_s11 + $0x20] sm:$0xff]  ;;  %v852_v28 = vld [vmem:[%s3456_s9 + $0x30] sm:$0xff] }
  0x8f   : > { %v811_v6 = vsel %vm604_vm0, %v3578_v35, %v3511_v34  ;;  %v3608_v12 = vadd.f32 %v772_v42, %v768_v33  ;;  %v840_v53 = vmul.f32 %v768_v33, %v768_v33  ;;  %v3610_v54 = vadd.f32 %v777_v45, %v771_v44 }
  0x90   : > { %v3612_v56 = vadd.f32 %v743_v30, %v663_v14  ;;  %v742_v58 = vmul.f32 %v740_v51, %v740_v51  ;;  %v3615_v60 = vadd.f32 %v748_v49, %v3509_v32  ;;  %v3617_v61 = vsub.f32 %v811_v6, %v807_v48  ;;  %v770_v32 = vld [vmem:[%s3450_s16 + $0x20] sm:$0xff]  ;;  %v851_v51 = vld [vmem:[%s3450_s16 + $0x38] sm:$0xff]  ;;  %v931_v14 = vld [vmem:[%s3450_s16 + $0x48] sm:$0xff] }
  0x91   : > { %6330 = vst [vmem:[#allocation40_spill] sm:$0xff] %v3608_v12  ;;  %6331 = vst [vmem:[#allocation41_spill] sm:$0xff] %v3610_v54  ;;  %v843_v63 = vadd.f32 %v841_v52, %v763_v57  ;;  %v806_v0 = vrot.slane %v3608_v12, 2  ;;  %v842_v2 = vadd.f32 %v840_v53, %v762_v1  ;;  %782 = vrot.lane.b32.xlu0 %v3608_v12, %s3236_s21  ;;  %v809_v8 = vrot.slane %v3610_v54, 2  ;;  %v857_v52 = vld [vmem:[%s3458_s6 + $0x38] sm:$0xff] }
  0x92   : > { %6332 = vst [vmem:[#allocation42_spill] sm:$0xff] %v3615_v60  ;;  %v810_v4 = vsel %vm604_vm0, %v3608_v12, %v3541_v55  ;;  %796 = vrot.lane.b32.xlu1 %v3610_v54, %s3236_s21  ;;  %v3632_v57 = vadd.f32 %v742_v58, %v3523_v41  ;;  %v3635_v1 = vadd.f32 %v752_v50, %v3515_v36  ;;  %v1092_v55 = vld [vmem:[%s3456_s9 + $0x60] sm:$0xff] }
  0x93   : > { %v827_v9 = vmul.f32 %v3610_v54, %v3578_v35  ;;  %v3641_v15 = vsub.f32 %v810_v4, %v806_v0  ;;  %v845_v17 = vmul.f32 %v771_v44, %v771_v44  ;;  %v819_v41 = vsel %vm604_vm0, %v3610_v54, %v3545_v59 }
  0x94   : > { %6333 = vst [vmem:[#allocation43_spill] sm:$0xff] %v3632_v57  ;;  %6334 = vst [vmem:[#allocation44_spill] sm:$0xff] %v3635_v1  ;;  %v3651_v36 = vmul.f32 %v781_v62, %v781_v62  ;;  %v821_v23 = vsub.f32 %v819_v41, %v809_v8  ;;  %v3653_v25 = vadd.f32 %v776_v7, %v770_v32  ;;  %v850_v7 = vld [vmem:[%s3450_s16 + $0x30] sm:$0xff] }
  0x95   : > { %v3649_v22 = vmul.f32 %v827_v9, %v781_v62  ;;  %v3659_v33 = vmul.f32 %v827_v9, %v827_v9  ;;  %v847_v39 = vadd.f32 %v845_v17, %v3560_v16  ;;  %v844_v40 = vmul.f32 %v770_v32, %v770_v32  ;;  %v856_v8 = vld [vmem:[%s3458_s6 + $0x30] sm:$0xff] }
  0x96   : > { %6335 = vst [vmem:[#allocation45_spill] sm:$0xff] %v3653_v25  ;;  %v808_v42 = vrot.slane %v3653_v25, 2  ;;  %v826_v44 = vmul.f32 %v3653_v25, %v3608_v12  ;;  %v3665_v45 = vmul.f32 %v780_v21, %v780_v21  ;;  %794 = vrot.lane.b32.xlu0 %v3653_v25, %s3236_s21  ;;  %v818_v47 = vsel %vm604_vm0, %v3653_v25, %v3572_v26 }
  0x97   : > { %v846_v48 = vadd.f32 %v844_v40, %v766_v46  ;;  %v3673_v16 = vadd.f32 %v853_v19, %v849_v13  ;;  %v921_v49 = vmul.f32 %v849_v13, %v849_v13  ;;  %v3675_v50 = vadd.f32 %v852_v28, %v848_v27 }
  0x98   : > { %v3679_v6 = vmul.f32 %v821_v23, %v821_v23  ;;  %v3681_v53 = vmul.f32 %v826_v44, %v780_v21  ;;  %v820_v58 = vsub.f32 %v818_v47, %v808_v42  ;;  %v920_v62 = vmul.f32 %v848_v27, %v848_v27  ;;  %v860_v27 = vld [vmem:[%s3464_s11 + $0x30] sm:$0xff]  ;;  %v929_v47 = vld [vmem:[%s3443_s10 + $0x48] sm:$0xff] }
  0x99   : > { %6336 = vst [vmem:[#allocation46_spill] sm:$0xff] %v3673_v16  ;;  %6337 = vst [vmem:[#allocation47_spill] sm:$0xff] %v3675_v50  ;;  %v887_v0 = vrot.slane %v3673_v16, 2  ;;  %864 = vrot.lane.b32.xlu1 %v3673_v16, %s3236_s21  ;;  %v891_v46 = vsel %vm604_vm0, %v3673_v16, %v3578_v35  ;;  %v923_v4 = vadd.f32 %v921_v49, %v843_v63  ;;  %v886_v32 = vrot.slane %v3675_v50, 2  ;;  %v861_v63 = vld [vmem:[%s3464_s11 + $0x38] sm:$0xff]  ;;  %v933_v49 = vld [vmem:[%s3456_s9 + $0x48] sm:$0xff] }
  0x9a   : > { %6338 = vst [vmem:[#allocation48_spill] sm:$0xff] %v3681_v53  ;;  %v3693_v9 = vmul.f32 %v826_v44, %v826_v44  ;;  %v3695_v17 = vadd.f32 %v920_v62, %v842_v2  ;;  %862 = vrot.lane.b32.xlu0 %v3675_v50, %s3236_s21  ;;  %v890_v41 = vsel %vm604_vm0, %v3675_v50, %v3608_v12  ;;  %v930_v35 = vld [vmem:[%s3450_s16 + $0x40] sm:$0xff] }
  0x9b   : > { %v3703_v21 = vadd.f32 %v857_v52, %v851_v51  ;;  %v3706_v13 = vmul.f32 %v820_v58, %v820_v58  ;;  %v3708_v23 = vsub.f32 %v891_v46, %v887_v0  ;;  %v3710_v19 = vsub.f32 %v890_v41, %v886_v32  ;;  %v928_v0 = vld [vmem:[%s3443_s10 + $0x40] sm:$0xff] }
  0x9c   : > { %6339 = vst [vmem:[#allocation49_spill] sm:$0xff] %v3693_v9  ;;  %v925_v2 = vmul.f32 %v851_v51, %v851_v51  ;;  %v3720_v44 = vadd.f32 %v856_v8, %v850_v7  ;;  %v3726_v51 = vmul.f32 %v861_v63, %v861_v63  ;;  %v932_v46 = vld [vmem:[%s3456_s9 + $0x40] sm:$0xff]  ;;  %v3735_v3 = vmul.f32 %v860_v27, %v860_v27 }
  0x9d   : > { %6340 = vst [vmem:[#allocation50_spill] sm:$0xff] %v3703_v21  ;;  %6341 = vst [vmem:[#allocation51_spill] sm:$0xff] %v3706_v13  ;;  %v889_v28 = vrot.slane %v3703_v21, 2  ;;  %v907_v40 = vmul.f32 %v3703_v21, %v3673_v16  ;;  %v899_v42 = vsel %vm604_vm0, %v3703_v21, %v3610_v54  ;;  %876 = vrot.lane.b32.xlu1 %v3703_v21, %s3236_s21  ;;  %v937_v54 = vld [vmem:[%s3458_s6 + $0x48] sm:$0xff] }
  0x9e   : > { %6342 = vst [vmem:[#allocation52_spill] sm:$0xff] %v3720_v44  ;;  %v927_v62 = vadd.f32 %v925_v2, %v847_v39  ;;  %v888_v41 = vrot.slane %v3720_v44, 2  ;;  %874 = vrot.lane.b32.xlu0 %v3720_v44, %s3236_s21  ;;  %v906_v39 = vmul.f32 %v3720_v44, %v3675_v50  ;;  %v924_v2 = vmul.f32 %v850_v7, %v850_v7 }
  0x9f   : > { %v3732_v32 = vmul.f32 %v907_v40, %v861_v63  ;;  %v901_v8 = vsub.f32 %v899_v42, %v889_v28  ;;  %v898_v63 = vsel %vm604_vm0, %v3720_v44, %v3653_v25  ;;  %v3745_v28 = vadd.f32 %v933_v49, %v929_v47  ;;  %v936_v49 = vld [vmem:[%s3458_s6 + $0x40] sm:$0xff] }
  0xa0   : > { %v3747_v42 = vmul.f32 %v907_v40, %v907_v40  ;;  %v900_v58 = vsub.f32 %v898_v63, %v888_v41  ;;  %v1001_v30 = vmul.f32 %v929_v47, %v929_v47  ;;  %v3749_v52 = vadd.f32 %v932_v46, %v928_v0  ;;  %v1009_v40 = vld [vmem:[%s3443_s10 + $0x58] sm:$0xff] }
  0xa1   : > { %6343 = vst [vmem:[#allocation53_spill] sm:$0xff] %v3745_v28  ;;  %v3754_v12 = vmul.f32 %v901_v8, %v901_v8  ;;  %v3756_v7 = vmul.f32 %v906_v39, %v860_v27  ;;  %v3758_v59 = vmul.f32 %v906_v39, %v906_v39  ;;  %v926_v26 = vadd.f32 %v924_v2, %v846_v48  ;;  %v1013_v47 = vld [vmem:[%s3456_s9 + $0x58] sm:$0xff]  ;;  %v1012_v8 = vld [vmem:[%s3456_s9 + $0x50] sm:$0xff] }
  0xa2   : > { %6344 = vst [vmem:[#allocation54_spill] sm:$0xff] %v3749_v52  ;;  %944 = vrot.lane.b32.xlu1 %v3745_v28, %s3236_s21  ;;  %v3765_v46 = vmul.f32 %v900_v58, %v900_v58  ;;  %v3772_v27 = vsel %vm604_vm0, %v3745_v28, %v3673_v16  ;;  %v3774_v48 = vadd.f32 %v1001_v30, %v923_v4  ;;  %v1008_v16 = vld [vmem:[%s3443_s10 + $0x50] sm:$0xff] }
  0xa3   : > { %6345 = vst [vmem:[#allocation55_spill] sm:$0xff] %v3756_v7  ;;  %6346 = vst [vmem:[#allocation56_spill] sm:$0xff] %v3758_v59  ;;  %942 = vrot.lane.b32.xlu0 %v3749_v52, %s3236_s21  ;;  %v1000_v39 = vmul.f32 %v928_v0, %v928_v0  ;;  %v3779_v58 = vadd.f32 %v937_v54, %v931_v14  ;;  %v1005_v2 = vmul.f32 %v931_v14, %v931_v14  ;;  %v1011_v0 = vld [vmem:[%s3450_s16 + $0x58] sm:$0xff]  ;;  %v1091_v59 = vld [vmem:[%s3450_s16 + $0x68] sm:$0xff] }
  0xa4   : > { %6347 = vst [vmem:[#allocation57_spill] sm:$0xff] %v3765_v46  ;;  %v3785_v63 = vsel %vm604_vm0, %v3749_v52, %v3675_v50  ;;  %v3787_v30 = vadd.f32 %v936_v49, %v930_v35  ;;  %v1004_v4 = vmul.f32 %v930_v35, %v930_v35  ;;  %v3789_v41 = vadd.f32 %v1013_v47, %v1009_v40  ;;  %v1017_v35 = vld [vmem:[%s3458_s6 + $0x58] sm:$0xff]  ;;  %v1010_v47 = vld [vmem:[%s3450_s16 + $0x50] sm:$0xff]  ;;  %v1097_v7 = vld [vmem:[%s3458_s6 + $0x68] sm:$0xff] }
  0xa5   : > { %6348 = vst [vmem:[#allocation58_spill] sm:$0xff] %v3779_v58  ;;  %v3795_v54 = vadd.f32 %v1000_v39, %v3695_v17  ;;  %v3798_v25 = vadd.f32 %v1005_v2, %v927_v62  ;;  %v1081_v49 = vmul.f32 %v1009_v40, %v1009_v40  ;;  %v1016_v50 = vld [vmem:[%s3458_s6 + $0x50] sm:$0xff]  ;;  %v3807_v34 = vmul.f32 %v3779_v58, %v3745_v28  ;;  %v1089_v40 = vld [vmem:[%s3443_s10 + $0x68] sm:$0xff] }
  0xa6   : > { %6349 = vst [vmem:[#allocation59_spill] sm:$0xff] %v3787_v30  ;;  %6350 = vst [vmem:[#allocation60_spill] sm:$0xff] %v3789_v41  ;;  %956 = vrot.lane.b32.xlu1 %v3779_v58, %s3236_s21  ;;  %v3813_v17 = vsel %vm604_vm0, %v3779_v58, %v3703_v21  ;;  %v3816_v39 = vadd.f32 %v1004_v4, %v926_v26  ;;  %v1093_v2 = vld [vmem:[%s3456_s9 + $0x68] sm:$0xff]  ;;  %v3824_v14 = vmul.f32 %v3787_v30, %v3749_v52  ;;  %v1088_v4 = vld [vmem:[%s3443_s10 + $0x60] sm:$0xff] }
  0xa7   : > { %954 = vrot.lane.b32.xlu0 %v3787_v30, %s3236_s21  ;;  %v3830_v21 = vsel %vm604_vm0, %v3787_v30, %v3720_v44  ;;  %v1047_v62 = vrot.slane %v3789_v41, 2  ;;  %v3833_v26 = vadd.f32 %v1012_v8, %v1008_v16  ;;  %v1080_v20 = vmul.f32 %v1008_v16, %v1008_v16  ;;  %v3846_v44 = vld [vmem:[%s3450_s16 + $0x60] sm:$0xff]  ;;  %v1173_v30 = vld [vmem:[%s3456_s9 + $0x78] sm:$0xff]  ;;  %v3883_v8 = vld [vmem:[%s3443_s10 + $0x88] sm:$0xff] }
  0xa8   : > { %6351 = vst [vmem:[#allocation61_spill] sm:$0xff] %v3816_v39  ;;  %6352 = vst [vmem:[#allocation62_spill] sm:$0xff] %v3830_v21  ;;  %v3837_v11 = vadd.f32 %v1017_v35, %v1011_v0  ;;  %v3839_v18 = vmul.f32 %v1011_v0, %v1011_v0  ;;  %v3841_v5 = vadd.f32 %v1016_v50, %v1010_v47  ;;  %v1096_v35 = vld [vmem:[%s3458_s6 + $0x60] sm:$0xff]  ;;  %v1169_v0 = vld [vmem:[%s3443_s10 + $0x78] sm:$0xff] }
  0xa9   : > { %6353 = vst [vmem:[#allocation63_spill] sm:$0xff] %v3833_v26  ;;  %v3851_v46 = vmul.f32 %v1010_v47, %v1010_v47  ;;  %v3853_v21 = vadd.f32 %v1093_v2, %v1089_v40  ;;  %v1161_v16 = vmul.f32 %v1089_v40, %v1089_v40  ;;  %v3866_v47 = vadd.f32 %v1092_v55, %v1088_v4 }
  0xaa   : > { %6354 = vst [vmem:[#allocation64_spill] sm:$0xff] %v3837_v11  ;;  %6355 = vst [vmem:[#allocation65_spill] sm:$0xff] %v3841_v5  ;;  %1024 = vrot.lane.b32.xlu1 %v3789_v41, %s3236_s21  ;;  %v3863_v9 = vmul.f32 %v3837_v11, %v3789_v41  ;;  %v3870_v40 = vmul.f32 %v3841_v5, %v3833_v26  ;;  %v1160_v2 = vmul.f32 %v1088_v4, %v1088_v4 }
  0xab   : > { %6356 = vst [vmem:[#allocation66_spill] sm:$0xff] %v3851_v46  ;;  %6357 = vst [vmem:[#allocation67_spill] sm:$0xff] %v3853_v21  ;;  %1022 = vrot.lane.b32.xlu0 %v3833_v26, %s3236_s21  ;;  %v3872_v1 = vadd.f32 %v1097_v7, %v1091_v59  ;;  %v3874_v53 = vmul.f32 %v1091_v59, %v1091_v59  ;;  %v3877_v50 = vadd.f32 %v1096_v35, %v3846_v44 }
  0xac   : > { %6358 = vst [vmem:[#allocation68_spill] sm:$0xff] %v3866_v47  ;;  %6359 = vst [vmem:[#allocation69_spill] sm:$0xff] %v3870_v40  ;;  %v1127_v60 = vrot.slane %v3853_v21, 2  ;;  %v3880_v13 = vadd.f32 %v1173_v30, %v1169_v0  ;;  %v1241_v55 = vmul.f32 %v1169_v0, %v1169_v0  ;;  %v1326_v7 = vmul.f32 %v3883_v8, %v3883_v8 }
  0xad   : > { %6360 = vst [vmem:[#allocation70_spill] sm:$0xff] %v3872_v1  ;;  %6361 = vst [vmem:[#allocation71_spill] sm:$0xff] %v3877_v50  ;;  %v6364_v59 = vand.u32 2147483647, %v3617_v61  ;;  %v6365_v35 = vrot.slane %v3745_v28, 2  ;;  %v1051_v30 = vsel %vm604_vm0, %v3789_v41, %v3745_v28  ;;  %v1168_v61 = vld [vmem:[%s3443_s10 + $0x70] sm:$0xff] }
  0xae   : > { %6362 = vst [vmem:[#allocation72_spill] sm:$0xff] %v3880_v13  ;;  %6363 = vst [vmem:[#allocation73_spill] sm:$0xff] %v3883_v8  ;;  %1036 = vrot.lane.b32.xlu1 %v3837_v11, %s3236_s21  ;;  %v1207_v0 = vrot.slane %v3880_v13, 2  ;;  %v1053_v46 = vsub.f32 %v1051_v30, %v1047_v62  ;;  %v1083_v8 = vadd.f32 %v1081_v49, %v3774_v48 }
  0xaf   : > { %v817_v4 = vadd.f32 %v6364_v59, %v3574_v29  ;;  %v973_v57 = vsub.f32 %v3772_v27, %v6365_v35  ;;  %1034 = vrot.lane.b32.xlu0 %v3841_v5, %s3236_s21  ;;  %v1131_v29 = vsel %vm604_vm0, %v3853_v21, %v3789_v41  ;;  %v1172_v27 = vld [vmem:[%s3456_s9 + $0x70] sm:$0xff]  ;;  %v6366_v59 = vand.u32 2147483647, %v3708_v23 }
  0xb0   : > { %v1133_v28 = vsub.f32 %v1131_v29, %v1127_v60  ;;  %v1211_v62 = vsel %vm604_vm0, %v3880_v13, %v3853_v21  ;;  %v1055_v30 = vand.u32 2147483647, %v1053_v46  ;;  %v1163_v48 = vadd.f32 %v1161_v16, %v1083_v8  ;;  %v3924_v8 = vld [vmem:[%s3443_s10 + $0x80] sm:$0xff] }
  0xb1   : > { %v897_v35 = vadd.f32 %v6366_v59, %v817_v4  ;;  %v975_v39 = vand.u32 2147483647, %v973_v57  ;;  %v1213_v49 = vsub.f32 %v1211_v62, %v1207_v0  ;;  %v1082_v5 = vadd.f32 %v1080_v20, %v3795_v54  ;;  %v941_v59 = vld [vmem:[%s3464_s11 + $0x48] sm:$0xff] }
  0xb2   : > { %1104 = vrot.lane.b32.xlu1 %v3853_v21, %s3236_s21  ;;  %v1135_v40 = vand.u32 2147483647, %v1133_v28  ;;  %v1126_v23 = vrot.slane %v3866_v47, 2  ;;  %v3919_v57 = vadd.f32 %v1172_v27, %v1168_v61  ;;  %v1243_v4 = vadd.f32 %v1241_v55, %v1163_v48 }
  0xb3   : > { %v977_v41 = vadd.f32 %v975_v39, %v897_v35  ;;  %1102 = vrot.lane.b32.xlu0 %v3866_v47, %s3236_s21  ;;  %v1215_v60 = vand.u32 2147483647, %v1213_v49  ;;  %v1162_v29 = vadd.f32 %v1160_v2, %v1082_v5  ;;  %v1240_v46 = vmul.f32 %v1168_v61, %v1168_v61 }
  0xb4   : > { %6367 = vst [vmem:[#allocation74_spill] sm:$0xff] %v3919_v57  ;;  %v1206_v54 = vrot.slane %v3919_v57, 2  ;;  %v1325_v28 = vmul.f32 %v3924_v8, %v3924_v8  ;;  %v6368_v39 = vand.u32 2147483647, %v3641_v15  ;;  %v3932_v0 = vadd.f32 %v1326_v7, %v1243_v4 }
  0xb5   : > { %v1057_v20 = vadd.f32 %v1055_v30, %v977_v41  ;;  %v1242_v27 = vadd.f32 %v1240_v46, %v1162_v29  ;;  %v6369_v55 = vrot.slane %v3749_v52, 2  ;;  %v1050_v41 = vsel %vm604_vm0, %v3833_v26, %v3749_v52  ;;  %v1021_v29 = vld [vmem:[%s3464_s11 + $0x58] sm:$0xff]  ;;  %v2864_v52 = vld [vmem:[%s3443_s10 + $0xe8] sm:$0xff] }
  0xb6   : > { %v816_v16 = vadd.f32 %v6368_v39, %v3581_v37  ;;  %1116 = vrot.lane.b32.xlu1 %v3872_v1, %s3236_s21  ;;  %v6370_v15 = vand.u32 2147483647, %v3710_v19  ;;  %v6371_v7 = vrot.slane %v3833_v26, 2  ;;  %v1210_v19 = vsel %vm604_vm0, %v3919_v57, %v3866_v47  ;;  %v1101_v39 = vld [vmem:[%s3464_s11 + $0x68] sm:$0xff] }
  0xb7   : > { %v972_v5 = vsub.f32 %v3785_v63, %v6369_v55  ;;  %v1137_v2 = vadd.f32 %v1135_v40, %v1057_v20  ;;  %v1130_v63 = vsel %vm604_vm0, %v3866_v47, %v3833_v26  ;;  %1114 = vrot.lane.b32.xlu0 %v3877_v50, %s3236_s21  ;;  %v3954_v35 = vadd.f32 %v1325_v28, %v1242_v27  ;;  %v2859_v26 = vld [vmem:[%s3458_s6 + $0xd0] sm:$0xff] }
  0xb8   : > { %v896_v37 = vadd.f32 %v6370_v15, %v816_v16  ;;  %v1052_v61 = vsub.f32 %v1050_v41, %v6371_v7  ;;  %v1132_v40 = vsub.f32 %v1130_v63, %v1126_v23  ;;  %v3962_v30 = vmul.f32 %v3846_v44, %v3846_v44 }
  0xb9   : > { %v974_v62 = vand.u32 2147483647, %v972_v5  ;;  %v1212_v49 = vsub.f32 %v1210_v19, %v1206_v54  ;;  %v839_v4 = vadd.f32 %v3651_v36, %v3568_v24  ;;  %v3967_v46 = vadd.f32 %v1215_v60, %v1137_v2  ;;  %v1171_v24 = vld [vmem:[%s3450_s16 + $0x78] sm:$0xff] }
  0xba   : > { %v1054_v48 = vand.u32 2147483647, %v1052_v61  ;;  %v1134_v20 = vand.u32 2147483647, %v1132_v40  ;;  %v989_v28 = vmul.f32 %v3807_v34, %v941_v59  ;;  %1184 = vrot.lane.b32.xlu1 %v3880_v13, %s3236_s21  ;;  %v993_v54 = vmul.f32 %v3807_v34, %v3807_v34  ;;  %v1177_v36 = vld [vmem:[%s3458_s6 + $0x78] sm:$0xff] }
  0xbb   : > { %v976_v23 = vadd.f32 %v974_v62, %v896_v37  ;;  %v1214_v44 = vand.u32 2147483647, %v1212_v49  ;;  %v919_v16 = vadd.f32 %v3726_v51, %v839_v4  ;;  %v997_v27 = vmul.f32 %v941_v59, %v941_v59  ;;  %1182 = vrot.lane.b32.xlu0 %v3919_v57, %s3236_s21  ;;  %v1181_v51 = vld [vmem:[%s3464_s11 + $0x78] sm:$0xff]  ;;  %v3993_v62 = vld [vmem:[%s3464_s11 + $0x88] sm:$0xff] }
  0xbc   : > { %v1069_v55 = vmul.f32 %v3863_v9, %v1021_v29  ;;  %v1077_v5 = vmul.f32 %v1021_v29, %v1021_v29  ;;  %v1087_v41 = vadd.f32 %v3839_v18, %v3798_v25  ;;  %v1073_v34 = vmul.f32 %v3863_v9, %v3863_v9  ;;  %v3999_v9 = vld [vmem:[%s3464_s11 + $0xa8] sm:$0xff] }
  0xbd   : > { %v1056_v60 = vadd.f32 %v1054_v48, %v976_v23  ;;  %v999_v2 = vadd.f32 %v997_v27, %v919_v16  ;;  %v1147_v15 = vmul.f32 %v3872_v1, %v3853_v21  ;;  %v1157_v37 = vmul.f32 %v1101_v39, %v1101_v39  ;;  %v3996_v48 = vld [vmem:[%s3464_s11 + $0x98] sm:$0xff]  ;;  %v4007_v23 = vld [vmem:[%s3450_s16 + $0x88] sm:$0xff] }
  0xbe   : > { %v1129_v61 = vrot.slane %v3872_v1, 2  ;;  %v1167_v63 = vadd.f32 %v3874_v53, %v1087_v41  ;;  %v3990_v59 = vadd.f32 %v1177_v36, %v1171_v24  ;;  %v1237_v40 = vmul.f32 %v1181_v51, %v1181_v51 }
  0xbf   : > { %v1136_v7 = vadd.f32 %v1134_v20, %v1056_v60  ;;  %v1079_v18 = vadd.f32 %v1077_v5, %v999_v2  ;;  %v1149_v25 = vmul.f32 %v1147_v15, %v1101_v39  ;;  %v1245_v19 = vmul.f32 %v1171_v24, %v1171_v24 }
  0xc0   : > { %6372 = vst [vmem:[#allocation75_spill] sm:$0xff] %v3990_v59  ;;  %v1153_v4 = vmul.f32 %v1147_v15, %v1147_v15  ;;  %v1209_v29 = vrot.slane %v3990_v59, 2  ;;  %v1227_v53 = vmul.f32 %v3990_v59, %v3880_v13  ;;  %1196 = vrot.lane.b32.xlu1 %v3990_v59, %s3236_s21  ;;  %v1322_v16 = vmul.f32 %v3993_v62, %v3993_v62 }
  0xc1   : > { %v4001_v49 = vadd.f32 %v1214_v44, %v1136_v7  ;;  %v1159_v20 = vadd.f32 %v1157_v37, %v1079_v18  ;;  %v1247_v39 = vadd.f32 %v1245_v19, %v1167_v63  ;;  %v1330_v44 = vmul.f32 %v4007_v23, %v4007_v23 }
  0xc2   : > { %v1229_v27 = vmul.f32 %v1227_v53, %v1181_v51  ;;  %v1402_v24 = vmul.f32 %v3996_v48, %v3996_v48  ;;  %v1482_v36 = vmul.f32 %v3999_v9, %v3999_v9  ;;  %v825_v60 = vadd.f32 %v3679_v6, %v3612_v56 }
  0xc3   : > { %v1239_v5 = vadd.f32 %v1237_v40, %v1159_v20  ;;  %v4021_v41 = vadd.f32 %v1330_v44, %v1247_v39  ;;  %v831_v2 = vadd.f32 %v3649_v22, %v3576_v31  ;;  %v835_v15 = vadd.f32 %v3659_v33, %v3583_v38 }
  0xc4   : > { %v905_v51 = vadd.f32 %v3754_v12, %v825_v60  ;;  %v6373_v37 = vrot.slane %v3779_v58, 2  ;;  %v1059_v56 = vsel %vm604_vm0, %v3837_v11, %v3779_v58  ;;  %v1139_v31 = vsel %vm604_vm0, %v3872_v1, %v3837_v11 }
  0xc5   : > { %v1324_v22 = vadd.f32 %v1322_v16, %v1239_v5  ;;  %v911_v38 = vadd.f32 %v3732_v32, %v831_v2  ;;  %v915_v12 = vadd.f32 %v3747_v42, %v835_v15  ;;  %v6374_v33 = vrot.slane %v3837_v11, 2  ;;  %v940_v16 = vld [vmem:[%s3464_s11 + $0x40] sm:$0xff] }
  0xc6   : > { %v981_v7 = vsub.f32 %v3813_v17, %v6373_v37  ;;  %v1141_v63 = vsub.f32 %v1139_v31, %v1129_v61  ;;  %v1219_v18 = vsel %vm604_vm0, %v3990_v59, %v3872_v1  ;;  %v838_v40 = vadd.f32 %v3665_v45, %v3594_v43  ;;  %v1020_v61 = vld [vmem:[%s3464_s11 + $0x50] sm:$0xff]  ;;  %v6376_v31 = vld [vmem:[#allocation61_spill] sm:$0xff] }
  0xc7   : > { %v1061_v6 = vsub.f32 %v1059_v56, %v6374_v33  ;;  %v1404_v19 = vadd.f32 %v1402_v24, %v1324_v22  ;;  %v991_v20 = vadd.f32 %v989_v28, %v911_v38  ;;  %v995_v39 = vadd.f32 %v993_v54, %v915_v12  ;;  %v6377_v22 = vld [vmem:[#allocation66_spill] sm:$0xff]  ;;  %v1170_v12 = vld [vmem:[%s3450_s16 + $0x70] sm:$0xff] }
  0xc8   : > { %v983_v17 = vmul.f32 %v981_v7, %v981_v7  ;;  %v1143_v42 = vmul.f32 %v1141_v63, %v1141_v63  ;;  %v1221_v60 = vsub.f32 %v1219_v18, %v1209_v29  ;;  %v918_v5 = vadd.f32 %v3735_v3, %v838_v40  ;;  %v6375_v29 = vld [vmem:[#allocation69_spill] sm:$0xff]  ;;  %v1176_v33 = vld [vmem:[%s3458_s6 + $0x70] sm:$0xff] }
  0xc9   : > { %v1063_v32 = vmul.f32 %v1061_v6, %v1061_v6  ;;  %v1233_v2 = vmul.f32 %v1227_v53, %v1227_v53  ;;  %v4052_v15 = vadd.f32 %v1482_v36, %v1404_v19  ;;  %v1071_v37 = vadd.f32 %v1069_v55, %v991_v20  ;;  %v1100_v36 = vld [vmem:[%s3464_s11 + $0x60] sm:$0xff] }
  0xca   : > { %v985_v44 = vadd.f32 %v983_v17, %v905_v51  ;;  %v1075_v7 = vadd.f32 %v1073_v34, %v995_v39  ;;  %v1223_v45 = vmul.f32 %v1221_v60, %v1221_v60  ;;  %v988_v28 = vmul.f32 %v3824_v14, %v940_v16  ;;  %v4075_v63 = vld [vmem:[%s3464_s11 + $0x80] sm:$0xff]  ;;  %v4080_v39 = vld [vmem:[%s3464_s11 + $0x90] sm:$0xff] }
  0xcb   : > { %v996_v54 = vmul.f32 %v940_v16, %v940_v16  ;;  %v1151_v24 = vadd.f32 %v1149_v25, %v1071_v37  ;;  %v992_v3 = vmul.f32 %v3824_v14, %v3824_v14  ;;  %v4058_v53 = vmul.f32 %v6375_v29, %v1020_v61  ;;  %v1180_v25 = vld [vmem:[%s3464_s11 + $0x70] sm:$0xff]  ;;  %v4090_v37 = vld [vmem:[%s3464_s11 + $0xa0] sm:$0xff] }
  0xcc   : > { %v1065_v43 = vadd.f32 %v1063_v32, %v985_v44  ;;  %v1155_v51 = vadd.f32 %v1153_v4, %v1075_v7  ;;  %v1076_v34 = vmul.f32 %v1020_v61, %v1020_v61  ;;  %v1086_v38 = vadd.f32 %v6377_v22, %v6376_v31 }
  0xcd   : > { %v998_v55 = vadd.f32 %v996_v54, %v918_v5  ;;  %v4066_v6 = vadd.f32 %v1229_v27, %v1151_v24  ;;  %v1072_v14 = vmul.f32 %v6375_v29, %v6375_v29  ;;  %v1146_v17 = vmul.f32 %v3877_v50, %v3866_v47  ;;  %v6380_v29 = vld [vmem:[#allocation51_spill] sm:$0xff]  ;;  %v2845_v47 = vld [vmem:[%s3450_s16 + $0xc0] sm:$0xff] }
  0xce   : > { %v1145_v56 = vadd.f32 %v1143_v42, %v1065_v43  ;;  %v4068_v4 = vadd.f32 %v1233_v2, %v1155_v51  ;;  %v1128_v40 = vrot.slane %v3877_v50, 2  ;;  %v1156_v19 = vmul.f32 %v1100_v36, %v1100_v36  ;;  %v2805_v42 = vld [vmem:[%s3450_s16 + $0x80] sm:$0xff]  ;;  %v6379_v51 = vld [vmem:[#allocation43_spill] sm:$0xff] }
  0xcf   : > { %v1078_v18 = vadd.f32 %v1076_v34, %v998_v55  ;;  %v1166_v20 = vadd.f32 %v3962_v30, %v1086_v38  ;;  %v1148_v32 = vmul.f32 %v1146_v17, %v1100_v36  ;;  %v4084_v16 = vadd.f32 %v1176_v33, %v1170_v12  ;;  %v6382_v55 = vld [vmem:[#allocation48_spill] sm:$0xff] }
  0xd0   : > { %v4082_v27 = vadd.f32 %v1223_v45, %v1145_v56  ;;  %v1236_v44 = vmul.f32 %v1180_v25, %v1180_v25  ;;  %v1244_v5 = vmul.f32 %v1170_v12, %v1170_v12  ;;  %v1321_v61 = vmul.f32 %v4075_v63, %v4075_v63  ;;  %v6381_v56 = vld [vmem:[#allocation42_spill] sm:$0xff]  ;;  %v6383_v38 = vld [vmem:[#allocation44_spill] sm:$0xff]  ;;  %v6384_v12 = vld [vmem:[#allocation49_spill] sm:$0xff] }
  0xd1   : > { %6378 = vst [vmem:[#allocation69_spill] sm:$0xff] %v4084_v16  ;;  %v1158_v60 = vadd.f32 %v1156_v19, %v1078_v18  ;;  %v1329_v2 = vmul.f32 %v2805_v42, %v2805_v42  ;;  %v1152_v7 = vmul.f32 %v1146_v17, %v1146_v17  ;;  %v1208_v30 = vrot.slane %v4084_v16, 2  ;;  %1194 = vrot.lane.b32.xlu0 %v4084_v16, %s3236_s21  ;;  %v6385_v17 = vld [vmem:[#allocation59_spill] sm:$0xff]  ;;  %v6387_v19 = vld [vmem:[#allocation62_spill] sm:$0xff] }
  0xd2   : > { %v1226_v43 = vmul.f32 %v4084_v16, %v3919_v57  ;;  %v1401_v45 = vmul.f32 %v4080_v39, %v4080_v39  ;;  %v1246_v24 = vadd.f32 %v1244_v5, %v1166_v20  ;;  %v824_v36 = vadd.f32 %v6380_v29, %v6379_v51  ;;  %v6389_v51 = vld [vmem:[#allocation55_spill] sm:$0xff]  ;;  %v6391_v57 = vld [vmem:[#allocation65_spill] sm:$0xff] }
  0xd3   : > { %v1238_v54 = vadd.f32 %v1236_v44, %v1158_v60  ;;  %v830_v34 = vadd.f32 %v6382_v55, %v6381_v56  ;;  %v1481_v22 = vmul.f32 %v4090_v37, %v4090_v37  ;;  %v834_v33 = vadd.f32 %v6384_v12, %v6383_v38  ;;  %v6388_v60 = vld [vmem:[#allocation57_spill] sm:$0xff]  ;;  %v6390_v56 = vld [vmem:[#allocation56_spill] sm:$0xff] }
  0xd4   : > { %v1228_v31 = vmul.f32 %v1226_v43, %v1180_v25  ;;  %v6386_v18 = vrot.slane %v6385_v17, 2  ;;  %v4110_v20 = vadd.f32 %v1329_v2, %v1246_v24  ;;  %v904_v5 = vadd.f32 %v6388_v60, %v824_v36  ;;  %v2808_v25 = vld [vmem:[%s3456_s9 + $0x88] sm:$0xff]  ;;  %v2807_v12 = vld [vmem:[%s3456_s9 + $0x80] sm:$0xff] }
  0xd5   : > { %v1323_v44 = vadd.f32 %v1321_v61, %v1238_v54  ;;  %v910_v29 = vadd.f32 %v6389_v51, %v830_v34  ;;  %v914_v55 = vadd.f32 %v6390_v56, %v834_v33  ;;  %v1058_v38 = vsel %vm604_vm0, %v6391_v57, %v6385_v17  ;;  %v2810_v51 = vld [vmem:[%s3458_s6 + $0x88] sm:$0xff] }
  0xd6   : > { %v980_v59 = vsub.f32 %v6387_v19, %v6386_v18  ;;  %v1138_v61 = vsel %vm604_vm0, %v3877_v50, %v6391_v57  ;;  %v6392_v24 = vrot.slane %v6391_v57, 2  ;;  %v1218_v18 = vsel %vm604_vm0, %v4084_v16, %v3877_v50  ;;  %v6393_v19 = vld [vmem:[#allocation73_spill] sm:$0xff]  ;;  %v2855_v57 = vld [vmem:[%s3450_s16 + $0xd0] sm:$0xff] }
  0xd7   : > { %v1403_v2 = vadd.f32 %v1401_v45, %v1323_v44  ;;  %v990_v54 = vadd.f32 %v988_v28, %v910_v29  ;;  %v1140_v34 = vsub.f32 %v1138_v61, %v1128_v40  ;;  %v4132_v60 = vadd.f32 %v2808_v25, %v6393_v19  ;;  %v2809_v44 = vld [vmem:[%s3458_s6 + $0x80] sm:$0xff] }
  0xd8   : > { %v982_v13 = vmul.f32 %v980_v59, %v980_v59  ;;  %v1060_v36 = vsub.f32 %v1058_v38, %v6392_v24  ;;  %v994_v59 = vadd.f32 %v992_v3, %v914_v55  ;;  %v1232_v56 = vmul.f32 %v1226_v43, %v1226_v43 }
  0xd9   : > { %6394 = vst [vmem:[#allocation61_spill] sm:$0xff] %v4132_v60  ;;  %v1070_v28 = vadd.f32 %v4058_v53, %v990_v54  ;;  %v1142_v45 = vmul.f32 %v1140_v34, %v1140_v34  ;;  %v1220_v40 = vsub.f32 %v1218_v18, %v1208_v30  ;;  %1269 = vrot.lane.b32.xlu1 %v4132_v60, %s3236_s21  ;;  %v2818_v18 = vld [vmem:[%s3456_s9 + $0x98] sm:$0xff] }
  0xda   : > { %v984_v33 = vadd.f32 %v982_v13, %v904_v5  ;;  %v1062_v1 = vmul.f32 %v1060_v36, %v1060_v36  ;;  %v1074_v29 = vadd.f32 %v1072_v14, %v994_v59  ;;  %v1292_v13 = vrot.slane %v4132_v60, 2  ;;  %v2814_v59 = vld [vmem:[%s3443_s10 + $0x98] sm:$0xff] }
  0xdb   : > { %v4141_v3 = vadd.f32 %v2807_v12, %v3924_v8  ;;  %v4143_v5 = vadd.f32 %v1481_v22, %v1403_v2  ;;  %v1150_v55 = vadd.f32 %v1148_v32, %v1070_v28  ;;  %v4146_v43 = vadd.f32 %v2810_v51, %v4007_v23 }
  0xdc   : > { %v1064_v25 = vadd.f32 %v1062_v1, %v984_v33  ;;  %v1154_v53 = vadd.f32 %v1152_v7, %v1074_v29  ;;  %v1296_v38 = vsub.f32 %v4132_v60, %v1292_v13  ;;  %v4152_v30 = vadd.f32 %v2809_v44, %v2805_v42  ;;  %v2817_v13 = vld [vmem:[%s3456_s9 + $0x90] sm:$0xff] }
  0xdd   : > { %6395 = vst [vmem:[#allocation66_spill] sm:$0xff] %v4141_v3  ;;  %6396 = vst [vmem:[#allocation43_spill] sm:$0xff] %v4143_v5  ;;  %v1291_v14 = vrot.slane %v4141_v3, 2  ;;  %1267 = vrot.lane.b32.xlu0 %v4141_v3, %s3236_s21  ;;  %v1222_v8 = vmul.f32 %v1220_v40, %v1220_v40  ;;  %v1294_v22 = vrot.slane %v4146_v43, 2  ;;  %v1312_v1 = vmul.f32 %v4146_v43, %v4132_v60  ;;  %v2813_v40 = vld [vmem:[%s3443_s10 + $0x90] sm:$0xff] }
  0xde   : > { %6397 = vst [vmem:[#allocation51_spill] sm:$0xff] %v4146_v43  ;;  %6398 = vst [vmem:[#allocation42_spill] sm:$0xff] %v4152_v30  ;;  %v1144_v61 = vadd.f32 %v1142_v45, %v1064_v25  ;;  %v1230_v23 = vadd.f32 %v1228_v31, %v1150_v55  ;;  %v1298_v32 = vsel %vm604_vm0, %v1296_v38, 0.0  ;;  %1281 = vrot.lane.b32.xlu1 %v4146_v43, %s3236_s21  ;;  %v1293_v42 = vrot.slane %v4152_v30, 2  ;;  %v2816_v38 = vld [vmem:[%s3450_s16 + $0x98] sm:$0xff] }
  0xdf   : > { %v1295_v7 = vsub.f32 %v4141_v3, %v1291_v14  ;;  %v1234_v2 = vadd.f32 %v1232_v56, %v1154_v53  ;;  %v1300_v54 = vand.u32 2147483647, %v1298_v32  ;;  %v1304_v24 = vsub.f32 %v4146_v43, %v1294_v22  ;;  %v2820_v14 = vld [vmem:[%s3458_s6 + $0x98] sm:$0xff] }
  0xe0   : > { %v1314_v36 = vmul.f32 %v3993_v62, %v1312_v1  ;;  %v1318_v34 = vmul.f32 %v1312_v1, %v1312_v1  ;;  %v1303_v12 = vsub.f32 %v4152_v30, %v1293_v42  ;;  %v1311_v33 = vmul.f32 %v4152_v30, %v4141_v3  ;;  %v2819_v1 = vld [vmem:[%s3458_s6 + $0x90] sm:$0xff] }
  0xe1   : > { %v1297_v31 = vsel %vm604_vm0, %v1295_v7, 0.0  ;;  %1279 = vrot.lane.b32.xlu0 %v4152_v30, %s3236_s21  ;;  %v1224_v19 = vadd.f32 %v1222_v8, %v1144_v61  ;;  %v1302_v62 = vadd.f32 %v1300_v54, %v3967_v46  ;;  %v1306_v56 = vsel %vm604_vm0, %v1304_v24, 0.0 }
  0xe2   : > { %v1299_v51 = vand.u32 2147483647, %v1297_v31  ;;  %v1308_v28 = vmul.f32 %v1306_v56, %v1306_v56  ;;  %v1316_v45 = vadd.f32 %v1314_v36, %v4066_v6  ;;  %v1313_v44 = vmul.f32 %v4075_v63, %v1311_v33  ;;  %v2815_v63 = vld [vmem:[%s3450_s16 + $0x90] sm:$0xff] }
  0xe3   : > { %v1317_v29 = vmul.f32 %v1311_v33, %v1311_v33  ;;  %v1320_v25 = vadd.f32 %v1318_v34, %v4068_v4  ;;  %v1305_v55 = vsel %vm604_vm0, %v1303_v12, 0.0  ;;  %v4184_v46 = vadd.f32 %v2818_v18, %v2814_v59 }
  0xe4   : > { %v1406_v53 = vmul.f32 %v2814_v59, %v2814_v59  ;;  %v1301_v61 = vadd.f32 %v1299_v51, %v4001_v49  ;;  %v1310_v6 = vadd.f32 %v1308_v28, %v4082_v27  ;;  %v1307_v8 = vmul.f32 %v1305_v55, %v1305_v55 }
  0xe5   : > { %6399 = vst [vmem:[#allocation48_spill] sm:$0xff] %v4184_v46  ;;  %v1315_v22 = vadd.f32 %v1313_v44, %v1230_v23  ;;  %v1372_v32 = vrot.slane %v4184_v46, 2  ;;  %1349 = vrot.lane.b32.xlu1 %v4184_v46, %s3236_s21  ;;  %v1376_v4 = vsel %vm604_vm0, %v4184_v46, %v4132_v60  ;;  %v4200_v42 = vadd.f32 %v2817_v13, %v2813_v40  ;;  %v2846_v60 = vld [vmem:[%s3450_s16 + $0xc8] sm:$0xff] }
  0xe6   : > { %v1408_v7 = vadd.f32 %v1406_v53, %v3932_v0  ;;  %v1319_v49 = vadd.f32 %v1317_v29, %v1234_v2  ;;  %v1405_v27 = vmul.f32 %v2813_v40, %v2813_v40  ;;  %v4202_v54 = vadd.f32 %v2820_v14, %v2816_v38  ;;  %v2828_v53 = vld [vmem:[%s3456_s9 + $0xa8] sm:$0xff] }
  0xe7   : > { %6400 = vst [vmem:[#allocation44_spill] sm:$0xff] %v4200_v42  ;;  %v1410_v23 = vmul.f32 %v2816_v38, %v2816_v38  ;;  %v1378_v24 = vsub.f32 %v1376_v4, %v1372_v32  ;;  %v1371_v36 = vrot.slane %v4200_v42, 2  ;;  %1347 = vrot.lane.b32.xlu0 %v4200_v42, %s3236_s21  ;;  %v1375_v31 = vsel %vm604_vm0, %v4200_v42, %v4141_v3 }
  0xe8   : > { %6401 = vst [vmem:[#allocation49_spill] sm:$0xff] %v4202_v54  ;;  %v4211_v34 = vadd.f32 %v2819_v1, %v2815_v63  ;;  %v1407_v0 = vadd.f32 %v1405_v27, %v3954_v35  ;;  %v1374_v2 = vrot.slane %v4202_v54, 2  ;;  %v1392_v12 = vmul.f32 %v4202_v54, %v4184_v46 }
  0xe9   : > { %v1412_v33 = vadd.f32 %v1410_v23, %v4021_v41  ;;  %v1380_v59 = vand.u32 2147483647, %v1378_v24  ;;  %v1377_v18 = vsub.f32 %v1375_v31, %v1371_v36  ;;  %1361 = vrot.lane.b32.xlu1 %v4202_v54, %s3236_s21  ;;  %v1384_v51 = vsel %vm604_vm0, %v4202_v54, %v4146_v43  ;;  %v2826_v24 = vld [vmem:[%s3450_s16 + $0xa8] sm:$0xff] }
  0xea   : > { %6402 = vst [vmem:[#allocation62_spill] sm:$0xff] %v4211_v34  ;;  %v1373_v35 = vrot.slane %v4211_v34, 2  ;;  %v1394_v56 = vmul.f32 %v3996_v48, %v1392_v12  ;;  %v1398_v28 = vmul.f32 %v1392_v12, %v1392_v12  ;;  %v1386_v44 = vsub.f32 %v1384_v51, %v1374_v2  ;;  %v2824_v48 = vld [vmem:[%s3443_s10 + $0xa8] sm:$0xff]  ;;  %v2825_v51 = vld [vmem:[%s3450_s16 + $0xa0] sm:$0xff] }
  0xeb   : > { %v1391_v41 = vmul.f32 %v4211_v34, %v4200_v42  ;;  %v1309_v29 = vadd.f32 %v1307_v8, %v1224_v19  ;;  %v1379_v40 = vand.u32 2147483647, %v1377_v18  ;;  %v1409_v13 = vmul.f32 %v2815_v63, %v2815_v63  ;;  %1359 = vrot.lane.b32.xlu0 %v4211_v34, %s3236_s21  ;;  %v2823_v8 = vld [vmem:[%s3443_s10 + $0xa0] sm:$0xff]  ;;  %v2830_v36 = vld [vmem:[%s3458_s6 + $0xa8] sm:$0xff] }
  0xec   : > { %v1383_v55 = vsel %vm604_vm0, %v4211_v34, %v4152_v30  ;;  %v4236_v38 = vadd.f32 %v1380_v59, %v1302_v62  ;;  %v1388_v14 = vmul.f32 %v1386_v44, %v1386_v44  ;;  %v4238_v1 = vadd.f32 %v1394_v56, %v1316_v45  ;;  %v2827_v63 = vld [vmem:[%s3456_s9 + $0xa0] sm:$0xff] }
  0xed   : > { %v1393_v19 = vmul.f32 %v4080_v39, %v1391_v41  ;;  %v4243_v32 = vadd.f32 %v1398_v28, %v1320_v25  ;;  %v1397_v4 = vmul.f32 %v1391_v41, %v1391_v41  ;;  %v1411_v27 = vadd.f32 %v1409_v13, %v4110_v20 }
  0xee   : > { %v1385_v23 = vsub.f32 %v1383_v55, %v1373_v35  ;;  %v4248_v31 = vadd.f32 %v1379_v40, %v1301_v61  ;;  %v4250_v62 = vadd.f32 %v1388_v14, %v1310_v6  ;;  %v4252_v45 = vadd.f32 %v2828_v53, %v2824_v48  ;;  %v2834_v53 = vld [vmem:[%s3443_s10 + $0xb8] sm:$0xff] }
  0xef   : > { %v1486_v2 = vmul.f32 %v2824_v48, %v2824_v48  ;;  %v4254_v12 = vadd.f32 %v1393_v19, %v1315_v22  ;;  %v4256_v25 = vadd.f32 %v2827_v63, %v2823_v8  ;;  %v1485_v59 = vmul.f32 %v2823_v8, %v2823_v8  ;;  %v2829_v22 = vld [vmem:[%s3458_s6 + $0xa0] sm:$0xff]  ;;  %v2838_v14 = vld [vmem:[%s3456_s9 + $0xb8] sm:$0xff]  ;;  %v2839_v8 = vld [vmem:[%s3458_s6 + $0xb0] sm:$0xff] }
  0xf0   : > { %6403 = vst [vmem:[#allocation57_spill] sm:$0xff] %v4252_v45  ;;  %v1387_v39 = vmul.f32 %v1385_v23, %v1385_v23  ;;  %v1452_v20 = vrot.slane %v4252_v45, 2  ;;  %1429 = vrot.lane.b32.xlu1 %v4252_v45, %s3236_s21  ;;  %v1456_v61 = vsel %vm604_vm0, %v4252_v45, %v4184_v46  ;;  %v4265_v18 = vadd.f32 %v2830_v36, %v2826_v24 }
  0xf1   : > { %6404 = vst [vmem:[#allocation55_spill] sm:$0xff] %v4254_v12  ;;  %6405 = vst [vmem:[#allocation56_spill] sm:$0xff] %v4256_v25  ;;  %v1488_v6 = vadd.f32 %v1486_v2, %v1408_v7  ;;  %v4269_v35 = vadd.f32 %v1397_v4, %v1319_v49  ;;  %v1451_v56 = vrot.slane %v4256_v25, 2  ;;  %v1487_v28 = vadd.f32 %v1485_v59, %v1407_v0  ;;  %v2833_v2 = vld [vmem:[%s3443_s10 + $0xb0] sm:$0xff] }
  0xf2   : > { %6406 = vst [vmem:[#allocation73_spill] sm:$0xff] %v4265_v18  ;;  %1427 = vrot.lane.b32.xlu0 %v4256_v25, %s3236_s21  ;;  %v1455_v44 = vsel %vm604_vm0, %v4256_v25, %v4200_v42  ;;  %v4278_v7 = vsub.f32 %v1456_v61, %v1452_v20  ;;  %v1454_v41 = vrot.slane %v4265_v18, 2  ;;  %v1472_v40 = vmul.f32 %v4265_v18, %v4252_v45  ;;  %v2836_v61 = vld [vmem:[%s3450_s16 + $0xb8] sm:$0xff] }
  0xf3   : > { %6407 = vst [vmem:[#allocation76_spill] sm:$0xff] %v4269_v35  ;;  %v1490_v49 = vmul.f32 %v2826_v24, %v2826_v24  ;;  %v4283_v13 = vsub.f32 %v1455_v44, %v1451_v56  ;;  %v1464_v0 = vsel %vm604_vm0, %v4265_v18, %v4202_v54  ;;  %v4289_v55 = vadd.f32 %v2829_v22, %v2825_v51  ;;  %v2835_v22 = vld [vmem:[%s3450_s16 + $0xb0] sm:$0xff]  ;;  %v2869_v35 = vld [vmem:[%s3458_s6 + $0xe0] sm:$0xff] }
  0xf4   : > { %v1489_v48 = vmul.f32 %v2825_v51, %v2825_v51  ;;  %v4293_v19 = vadd.f32 %v1387_v39, %v1309_v29  ;;  %v4297_v63 = vmul.f32 %v3999_v9, %v1472_v40  ;;  %1441 = vrot.lane.b32.xlu1 %v4265_v18, %s3236_s21  ;;  %v4301_v23 = vmul.f32 %v1472_v40, %v1472_v40  ;;  %v2837_v39 = vld [vmem:[%s3456_s9 + $0xb0] sm:$0xff]  ;;  %v2840_v51 = vld [vmem:[%s3458_s6 + $0xb8] sm:$0xff] }
  0xf5   : > { %6408 = vst [vmem:[#allocation77_spill] sm:$0xff] %v4289_v55  ;;  %v1492_v4 = vadd.f32 %v1490_v49, %v1412_v33  ;;  %v1466_v24 = vsub.f32 %v1464_v0, %v1454_v41  ;;  %v1453_v36 = vrot.slane %v4289_v55, 2  ;;  %v1471_v29 = vmul.f32 %v4289_v55, %v4256_v25  ;;  %v4324_v41 = vpop.permute.xlu1 %634 }
  0xf6   : > { %6409 = vst [vmem:[#allocation78_spill] sm:$0xff] %v4293_v19  ;;  %1439 = vrot.lane.b32.xlu0 %v4289_v55, %s3236_s21  ;;  %v1491_v59 = vadd.f32 %v1489_v48, %v1411_v27  ;;  %v1463_v9 = vsel %vm604_vm0, %v4289_v55, %v4211_v34  ;;  %v4314_v33 = vadd.f32 %v2838_v14, %v2834_v53 }
  0xf7   : > { %v1566_v20 = vmul.f32 %v2834_v53, %v2834_v53  ;;  %v4319_v56 = vmul.f32 %v1466_v24, %v1466_v24  ;;  %v4322_v44 = vmul.f32 %v4090_v37, %v1471_v29  ;;  %v1465_v27 = vsub.f32 %v1463_v9, %v1453_v36  ;;  %v4335_v53 = vpop.permute.xlu0 %621  ;;  %v2842_v9 = vld [vmem:[%s3464_s11 + $0xb8] sm:$0xff] }
  0xf8   : > { %6410 = vst [vmem:[#allocation79_spill] sm:$0xff] %v4314_v33  ;;  %v1532_v40 = vrot.slane %v4314_v33, 2  ;;  %1509 = vrot.lane.b32.xlu1 %v4314_v33, %s3236_s21  ;;  %v1536_v49 = vsel %vm604_vm0, %v4314_v33, %v4252_v45  ;;  %v4333_v48 = vadd.f32 %v2837_v39, %v2833_v2  ;;  %v4337_v37 = vmul.f32 %v1471_v29, %v1471_v29 }
  0xf9   : > { %6411 = vst [vmem:[#allocation80_spill] sm:$0xff] %v4322_v44  ;;  %v1568_v0 = vadd.f32 %v1566_v20, %v1488_v6  ;;  %v4339_v14 = vmul.f32 %v1465_v27, %v1465_v27  ;;  %v1565_v24 = vmul.f32 %v2833_v2, %v2833_v2  ;;  %v4341_v36 = vadd.f32 %v2840_v51, %v2836_v61 }
  0xfa   : > { %6412 = vst [vmem:[#allocation81_spill] sm:$0xff] %v4333_v48  ;;  %6413 = vst [vmem:[#allocation82_spill] sm:$0xff] %v4337_v37  ;;  %v4346_v54 = vsub.f32 %v1536_v49, %v1532_v40  ;;  %v1531_v6 = vrot.slane %v4333_v48, 2  ;;  %1507 = vrot.lane.b32.xlu0 %v4333_v48, %s3236_s21  ;;  %v1535_v29 = vsel %vm604_vm0, %v4333_v48, %v4256_v25  ;;  %v2841_v40 = vld [vmem:[%s3464_s11 + $0xb0] sm:$0xff] }
  0xfb   : > { %6414 = vst [vmem:[#allocation83_spill] sm:$0xff] %v4339_v14  ;;  %6415 = vst [vmem:[#allocation84_spill] sm:$0xff] %v4341_v36  ;;  %v1570_v2 = vmul.f32 %v2836_v61, %v2836_v61  ;;  %v1567_v39 = vadd.f32 %v1565_v24, %v1487_v28  ;;  %v1534_v20 = vrot.slane %v4341_v36, 2  ;;  %v1552_v51 = vmul.f32 %v4341_v36, %v4314_v33  ;;  %v2844_v61 = vld [vmem:[%s3443_s10 + $0xc8] sm:$0xff]  ;;  %v4389_v25 = vpop.permute.xlu0 %623 }
  0xfc   : > { %v1544_v27 = vsel %vm604_vm0, %v4341_v36, %v4265_v18  ;;  %v4363_v49 = vsub.f32 %v1535_v29, %v1531_v6  ;;  %v4365_v45 = vmul.f32 %v2842_v9, %v2842_v9  ;;  %1521 = vrot.lane.b32.xlu1 %v4341_v36, %s3236_s21  ;;  %v4369_v28 = vadd.f32 %v2839_v8, %v2835_v22  ;;  %v2848_v24 = vld [vmem:[%s3456_s9 + $0xc8] sm:$0xff]  ;;  %v4378_v29 = vpop.permute.xlu1 %636 }
  0xfd   : > { %v1572_v34 = vadd.f32 %v1570_v2, %v1492_v4  ;;  %v4374_v46 = vmul.f32 %v2842_v9, %v1552_v51  ;;  %v4376_v18 = vmul.f32 %v1552_v51, %v1552_v51  ;;  %v1546_v6 = vsub.f32 %v1544_v27, %v1534_v20  ;;  %v2843_v9 = vld [vmem:[%s3443_s10 + $0xc0] sm:$0xff] }
  0xfe   : > { %6416 = vst [vmem:[#allocation85_spill] sm:$0xff] %v4369_v28  ;;  %v1533_v4 = vrot.slane %v4369_v28, 2  ;;  %v1551_v2 = vmul.f32 %v4369_v28, %v4333_v48  ;;  %v4383_v8 = vmul.f32 %v2841_v40, %v2841_v40  ;;  %v1569_v42 = vmul.f32 %v2835_v22, %v2835_v22  ;;  %1519 = vrot.lane.b32.xlu0 %v4369_v28, %s3236_s21  ;;  %v2847_v51 = vld [vmem:[%s3456_s9 + $0xc0] sm:$0xff]  ;;  %v2850_v22 = vld [vmem:[%s3458_s6 + $0xc8] sm:$0xff] }
  0xff   : > { %6417 = vst [vmem:[#allocation86_spill] sm:$0xff] %v4374_v46  ;;  %6418 = vst [vmem:[#allocation87_spill] sm:$0xff] %v4376_v18  ;;  %v1543_v27 = vsel %vm604_vm0, %v4369_v28, %v4289_v55  ;;  %v4396_v43 = vadd.f32 %v2848_v24, %v2844_v61  ;;  %v1646_v30 = vmul.f32 %v2844_v61, %v2844_v61  ;;  %v2849_v20 = vld [vmem:[%s3458_s6 + $0xc0] sm:$0xff]  ;;  %v2853_v55 = vld [vmem:[%s3443_s10 + $0xd0] sm:$0xff]  ;;  %v4451_v58 = vpop.permute.xlu0 %702 }
 0x100   : > { %6419 = vst [vmem:[#allocation88_spill] sm:$0xff] %v4383_v8  ;;  %v4400_v3 = vmul.f32 %v1546_v6, %v1546_v6  ;;  %v4402_v16 = vmul.f32 %v2841_v40, %v1551_v2  ;;  %v1571_v50 = vadd.f32 %v1569_v42, %v1491_v59  ;;  %v1545_v21 = vsub.f32 %v1543_v27, %v1533_v4  ;;  %v2854_v4 = vld [vmem:[%s3443_s10 + $0xd8] sm:$0xff] }
 0x101   : > { %6420 = vst [vmem:[#allocation89_spill] sm:$0xff] %v4396_v43  ;;  %v4406_v11 = vmul.f32 %v1551_v2, %v1551_v2  ;;  %1589 = vrot.lane.b32.xlu1 %v4396_v43, %s3236_s21  ;;  %v4411_v61 = vadd.f32 %v1646_v30, %v1568_v0  ;;  %v4413_v24 = vadd.f32 %v2847_v51, %v2843_v9  ;;  %v2858_v2 = vld [vmem:[%s3456_s9 + $0xd8] sm:$0xff] }
 0x102   : > { %6421 = vst [vmem:[#allocation90_spill] sm:$0xff] %v4402_v16  ;;  %v4419_v42 = vsel %vm604_vm0, %v4396_v43, %v4314_v33  ;;  %v1645_v59 = vmul.f32 %v2843_v9, %v2843_v9  ;;  %v4421_v40 = vadd.f32 %v2850_v22, %v2846_v60  ;;  %v1650_v6 = vmul.f32 %v2846_v60, %v2846_v60  ;;  %v2857_v9 = vld [vmem:[%s3456_s9 + $0xd0] sm:$0xff]  ;;  %v2856_v22 = vld [vmem:[%s3450_s16 + $0xd8] sm:$0xff]  ;;  %v4435_v33 = vpop.permute.xlu1 %704  ;;  %v2866_v16 = vld [vmem:[%s3450_s16 + $0xe8] sm:$0xff] }
 0x103   : > { %6422 = vst [vmem:[#allocation91_spill] sm:$0xff] %v4406_v11  ;;  %6423 = vst [vmem:[#allocation92_spill] sm:$0xff] %v4413_v24  ;;  %v4425_v27 = vmul.f32 %v1545_v21, %v1545_v21  ;;  %1587 = vrot.lane.b32.xlu0 %v4413_v24, %s3236_s21  ;;  %v4430_v0 = vadd.f32 %v2849_v20, %v2845_v47  ;;  %v1649_v51 = vmul.f32 %v2845_v47, %v2845_v47  ;;  %v2860_v47 = vld [vmem:[%s3458_s6 + $0xd8] sm:$0xff] }
 0x104   : > { %6424 = vst [vmem:[#allocation93_spill] sm:$0xff] %v4421_v40  ;;  %v4437_v60 = vadd.f32 %v1645_v59, %v1567_v39  ;;  %v4443_v21 = vsel %vm604_vm0, %v4413_v24, %v4333_v48  ;;  %v4446_v20 = vadd.f32 %v1650_v6, %v1572_v34  ;;  %v4455_v39 = vmul.f32 %v4421_v40, %v4396_v43 }
 0x105   : > { %6425 = vst [vmem:[#allocation94_spill] sm:$0xff] %v4425_v27  ;;  %6426 = vst [vmem:[#allocation95_spill] sm:$0xff] %v4430_v0  ;;  %1601 = vrot.lane.b32.xlu1 %v4421_v40, %s3236_s21  ;;  %v4463_v34 = vsel %vm604_vm0, %v4421_v40, %v4341_v36  ;;  %v4466_v6 = vadd.f32 %v1649_v51, %v1571_v50  ;;  %v4470_v30 = vmul.f32 %v4430_v0, %v4413_v24  ;;  %v2868_v50 = vld [vmem:[%s3456_s9 + $0xe8] sm:$0xff] }
 0x106   : > { %v4476_v48 = vsel %vm604_vm0, %v4430_v0, %v4369_v28  ;;  %v4478_v17 = vadd.f32 %v2858_v2, %v2854_v4  ;;  %v4480_v36 = vadd.f32 %v2857_v9, %v2853_v55  ;;  %v4486_v51 = vmul.f32 %v2854_v4, %v2854_v4  ;;  %v2863_v2 = vld [vmem:[%s3443_s10 + $0xe0] sm:$0xff]  ;;  %v2870_v4 = vld [vmem:[%s3458_s6 + $0xe8] sm:$0xff] }
 0x107   : > { %6427 = vst [vmem:[#allocation96_spill] sm:$0xff] %v4466_v6  ;;  %6428 = vst [vmem:[#allocation97_spill] sm:$0xff] %v4470_v30  ;;  %1599 = vrot.lane.b32.xlu0 %v4430_v0, %s3236_s21  ;;  %v4488_v59 = vmul.f32 %v2853_v55, %v2853_v55  ;;  %v4490_v11 = vadd.f32 %v2860_v47, %v2856_v22  ;;  %v4492_v28 = vadd.f32 %v2859_v26, %v2855_v57  ;;  %v2867_v9 = vld [vmem:[%s3456_s9 + $0xe0] sm:$0xff]  ;;  %v4526_v6 = vpop.permute.xlu0 %714 }
 0x108   : > { %6429 = vst [vmem:[#allocation98_spill] sm:$0xff] %v4476_v48  ;;  %6430 = vst [vmem:[#allocation99_spill] sm:$0xff] %v4478_v17  ;;  %v1692_v27 = vrot.slane %v4478_v17, 2  ;;  %v4499_v37 = vmul.f32 %v2856_v22, %v2856_v22  ;;  %v4501_v0 = vmul.f32 %v2855_v57, %v2855_v57  ;;  %v2865_v55 = vld [vmem:[%s3450_s16 + $0xe0] sm:$0xff]  ;;  %v4514_v12 = vadd.f32 %v2868_v50, %v2864_v52  ;;  %v2874_v22 = vld [vmem:[%s3443_s10 + $0xf8] sm:$0xff]  ;;  %v4518_v57 = vpop.permute.xlu1 %716 }
 0x109   : > { %6431 = vst [vmem:[#allocation100_spill] sm:$0xff] %v4480_v36  ;;  %6432 = vst [vmem:[#allocation101_spill] sm:$0xff] %v4490_v11  ;;  %1669 = vrot.lane.b32.xlu1 %v4478_v17, %s3236_s21  ;;  %v4511_v47 = vmul.f32 %v4490_v11, %v4478_v17  ;;  %v2878_v48 = vld [vmem:[%s3456_s9 + $0xf8] sm:$0xff]  ;;  %v4522_v14 = vmul.f32 %v4492_v28, %v4480_v36  ;;  %v1806_v19 = vmul.f32 %v2864_v52, %v2864_v52 }
 0x10a   : > { %6433 = vst [vmem:[#allocation102_spill] sm:$0xff] %v4492_v28  ;;  %6434 = vst [vmem:[#allocation103_spill] sm:$0xff] %v4501_v0  ;;  %v4524_v0 = vadd.f32 %v2867_v9, %v2863_v2  ;;  %v1805_v26 = vmul.f32 %v2863_v2, %v2863_v2  ;;  %v4530_v44 = vadd.f32 %v2870_v4, %v2866_v16  ;;  %v1772_v52 = vrot.slane %v4514_v12, 2 }
 0x10b   : > { %6435 = vst [vmem:[#allocation104_spill] sm:$0xff] %v4514_v12  ;;  %6436 = vst [vmem:[#allocation105_spill] sm:$0xff] %v4518_v57  ;;  %1667 = vrot.lane.b32.xlu0 %v4480_v36, %s3236_s21  ;;  %v4532_v50 = vmul.f32 %v2866_v16, %v2866_v16  ;;  %v4534_v30 = vadd.f32 %v2869_v35, %v2865_v55  ;;  %v6442_v57 = vlaneseq  ;;  %v4542_v2 = vadd.f32 %v2878_v48, %v2874_v22 }
 0x10c   : > { %6437 = vst [vmem:[#allocation106_spill] sm:$0xff] %v4522_v14  ;;  %6438 = vst [vmem:[#allocation107_spill] sm:$0xff] %v4524_v0  ;;  %v4539_v14 = vmul.f32 %v2865_v55, %v2865_v55  ;;  %v1886_v9 = vmul.f32 %v2874_v22, %v2874_v22  ;;  %v6445_v16 = vand.u32 2147483647, %v4278_v7  ;;  %v6446_v4 = vrot.slane %v4396_v43, 2  ;;  %v4574_v22 = vld [vmem:[%s3443_s10 + $0x108] sm:$0xff]  ;;  %v4583_v5 = vpop.permute.xlu1 %784 }
 0x10d   : > { %6439 = vst [vmem:[#allocation108_spill] sm:$0xff] %v4526_v6  ;;  %6440 = vst [vmem:[#allocation109_spill] sm:$0xff] %v4530_v44  ;;  %v4537_v8 = vand.u32 127, %v6442_v57  ;;  %1681 = vrot.lane.b32.xlu1 %v4490_v11, %s3236_s21  ;;  %v1696_v48 = vsel %vm604_vm0, %v4478_v17, %v4396_v43  ;;  %v6448_v43 = vld [vmem:[#allocation33_spill] sm:$0xff]  ;;  %v4588_v11 = vpop.permute.xlu0 %782 }
 0x10e   : > { %6441 = vst [vmem:[#allocation110_spill] sm:$0xff] %v4534_v30  ;;  %6443 = vst [vmem:[#allocation111_spill] sm:$0xff] %v4539_v14  ;;  %v1462_v35 = vadd.f32 %v6445_v16, %v4236_v38  ;;  %v1618_v57 = vsub.f32 %v4419_v42, %v6446_v4  ;;  %v6447_v16 = vld [vmem:[#allocation31_spill] sm:$0xff]  ;;  %v1971_v14 = vmul.f32 %v4574_v22, %v4574_v22 }
 0x10f   : > { %6444 = vst [vmem:[#allocation112_spill] sm:$0xff] %v4542_v2  ;;  %vm625_vm1 = vcmp.lt.s32.totalorder %v4537_v8, 126  ;;  %1679 = vrot.lane.b32.xlu0 %v4492_v28, %s3236_s21  ;;  %6450 = vst [vmem:[#allocation31_spill] sm:$0xff] %v4583_v5  ;;  %v1698_v28 = vsub.f32 %v1696_v48, %v1692_v27  ;;  %v2877_v5 = vld [vmem:[%s3456_s9 + $0xf0] sm:$0xff]  ;;  %v1728_v27 = vadd.f32 %v4486_v51, %v4411_v61 }
 0x110   : > { %v638_v55 = vsel %vm625_vm1, %v4324_v41, %v4378_v29  ;;  %v639_v7 = vsel %vm625_vm1, %v4378_v29, %v4324_v41  ;;  %v626_v38 = vsel %vm625_vm1, %v4335_v53, %v4389_v25  ;;  %v627_v42 = vsel %vm625_vm1, %v4389_v25, %v4335_v53  ;;  %v6449_v29 = vld [vmem:[#allocation32_spill] sm:$0xff] }
 0x111   : > { %v640_v4 = vsub.f32 %v6447_v16, %v638_v55  ;;  %v641_v41 = vsub.f32 %v6448_v43, %v639_v7  ;;  %v628_v6 = vsub.f32 %v6449_v29, %v626_v38  ;;  %v1852_v25 = vrot.slane %v4542_v2, 2  ;;  %1749 = vrot.lane.b32.xlu1 %v4514_v12, %s3236_s21  ;;  %v6452_v7 = vld [vmem:[#allocation34_spill] sm:$0xff]  ;;  %v2873_v29 = vld [vmem:[%s3443_s10 + $0xf0] sm:$0xff] }
 0x112   : > { %v6451_v53 = vand.u32 2147483647, %v4346_v54  ;;  %v1620_v46 = vand.u32 2147483647, %v1618_v57  ;;  %v629_v38 = vsub.f32 %v6452_v7, %v627_v42  ;;  %v1776_v57 = vsel %vm604_vm0, %v4514_v12, %v4478_v17  ;;  %v6465_v17 = vld [vmem:[#allocation101_spill] sm:$0xff] }
 0x113   : > { %v4592_v43 = vmul.f32 %v640_v4, %v640_v4  ;;  %v4594_v55 = vmul.f32 %v641_v41, %v641_v41  ;;  %v4597_v16 = vand.u32 2147483647, %v628_v6  ;;  %1747 = vrot.lane.b32.xlu0 %v4524_v0, %s3236_s21  ;;  %v1778_v48 = vsub.f32 %v1776_v57, %v1772_v52  ;;  %v4619_v4 = vld [vmem:[%s3443_s10 + $0x100] sm:$0xff]  ;;  %v4625_v57 = vpop.permute.xlu1 %796 }
 0x114   : > { %v1542_v18 = vadd.f32 %v6451_v53, %v1462_v35  ;;  %v1700_v35 = vand.u32 2147483647, %v1698_v28  ;;  %v1856_v6 = vsel %vm604_vm0, %v4542_v2, %v4514_v12  ;;  %v1808_v61 = vadd.f32 %v1806_v19, %v1728_v27 }
 0x115   : > { %v1858_v51 = vsub.f32 %v1856_v6, %v1852_v25  ;;  %v4616_v42 = vadd.f32 %v2877_v5, %v2873_v29  ;;  %1761 = vrot.lane.b32.xlu1 %v4530_v44, %s3236_s21  ;;  %v1780_v52 = vand.u32 2147483647, %v1778_v48  ;;  %v1885_v53 = vmul.f32 %v2873_v29, %v2873_v29 }
 0x116   : > { %v1622_v54 = vadd.f32 %v1620_v46, %v1542_v18  ;;  %v1727_v46 = vadd.f32 %v4488_v59, %v4437_v60  ;;  %v1771_v18 = vrot.slane %v4524_v0, 2  ;;  %v1970_v7 = vmul.f32 %v4619_v4, %v4619_v4 }
 0x117   : > { %6453 = vst [vmem:[#allocation33_spill] sm:$0xff] %v4616_v42  ;;  %v1860_v60 = vand.u32 2147483647, %v1858_v51  ;;  %v1888_v59 = vadd.f32 %v1886_v9, %v1808_v61  ;;  %v1851_v19 = vrot.slane %v4616_v42, 2  ;;  %v6454_v5 = vand.u32 2147483647, %v4283_v13  ;;  %1759 = vrot.lane.b32.xlu0 %v4534_v30, %s3236_s21 }
 0x118   : > { %v1702_v28 = vadd.f32 %v1700_v35, %v1622_v54  ;;  %v1807_v41 = vadd.f32 %v1805_v26, %v1727_v46  ;;  %v4631_v54 = vpop.permute.xlu0 %794  ;;  %v6455_v35 = vrot.slane %v4413_v24, 2  ;;  %v1695_v9 = vsel %vm604_vm0, %v4480_v36, %v4413_v24 }
 0x119   : > { %v1461_v25 = vadd.f32 %v6454_v5, %v4248_v31  ;;  %v4642_v48 = vadd.f32 %v1971_v14, %v1888_v59  ;;  %v6456_v31 = vand.u32 2147483647, %v4363_v49  ;;  %v6457_v6 = vrot.slane %v4480_v36, 2  ;;  %1829 = vrot.lane.b32.xlu1 %v4542_v2, %s3236_s21  ;;  %v6458_v5 = vld [vmem:[#allocation36_spill] sm:$0xff] }
 0x11a   : > { %v1782_v26 = vadd.f32 %v1780_v52, %v1702_v28  ;;  %v1887_v29 = vadd.f32 %v1885_v53, %v1807_v41  ;;  %v1617_v27 = vsub.f32 %v4443_v21, %v6455_v35  ;;  %v1775_v28 = vsel %vm604_vm0, %v4524_v0, %v4480_v36  ;;  %v2852_v52 = vld [vmem:[%s3464_s11 + $0xc8] sm:$0xff]  ;;  %v4673_v35 = vpop.permute.xlu1 %864 }
 0x11b   : > { %v1541_v13 = vadd.f32 %v6456_v31, %v1461_v25  ;;  %v1697_v46 = vsub.f32 %v1695_v9, %v6457_v6  ;;  %v631_v21 = vand.u32 2147483647, %v629_v38  ;;  %v1777_v51 = vsub.f32 %v1775_v28, %v1771_v18  ;;  %1827 = vrot.lane.b32.xlu0 %v4616_v42, %s3236_s21  ;;  %v6459_v9 = vld [vmem:[#allocation35_spill] sm:$0xff] }
 0x11c   : > { %v4654_v61 = vadd.f32 %v1970_v7, %v1887_v29  ;;  %v1619_v14 = vand.u32 2147483647, %v1617_v27  ;;  %v1855_v41 = vsel %vm604_vm0, %v4616_v42, %v4524_v0  ;;  %v706_v53 = vsel %vm625_vm1, %v4451_v58, %v4435_v33  ;;  %v2862_v29 = vld [vmem:[%s3464_s11 + $0xd8] sm:$0xff] }
 0x11d   : > { %v1699_v49 = vand.u32 2147483647, %v1697_v46  ;;  %v707_v38 = vsel %vm625_vm1, %v4435_v33, %v4451_v58  ;;  %v1779_v7 = vand.u32 2147483647, %v1777_v51  ;;  %v1857_v59 = vsub.f32 %v1855_v41, %v1851_v19  ;;  %v2880_v41 = vld [vmem:[%s3458_s6 + $0xf8] sm:$0xff] }
 0x11e   : > { %v1621_v18 = vadd.f32 %v1619_v14, %v1541_v13  ;;  %v708_v25 = vsub.f32 %v6458_v5, %v706_v53  ;;  %v4675_v27 = vadd.f32 %v1860_v60, %v1782_v26  ;;  %v709_v31 = vsub.f32 %v6459_v9, %v707_v38  ;;  %v4683_v13 = vpop.permute.xlu0 %862  ;;  %v2872_v60 = vld [vmem:[%s3464_s11 + $0xe8] sm:$0xff] }
 0x11f   : > { %v1564_v58 = vadd.f32 %v4365_v45, %v4052_v15  ;;  %v4681_v33 = vmul.f32 %v2852_v52, %v4455_v39  ;;  %v4687_v46 = vmul.f32 %v4455_v39, %v4455_v39  ;;  %v1642_v28 = vmul.f32 %v2852_v52, %v2852_v52  ;;  %v2876_v45 = vld [vmem:[%s3450_s16 + $0xf8] sm:$0xff] }
 0x120   : > { %v1701_v19 = vadd.f32 %v1699_v49, %v1621_v18  ;;  %v710_v6 = vand.u32 2147483647, %v708_v25  ;;  %v1859_v26 = vand.u32 2147483647, %v1857_v59  ;;  %v711_v14 = vand.u32 2147483647, %v709_v31 }
 0x121   : > { %v4691_v51 = vmul.f32 %v2862_v29, %v4511_v47  ;;  %v1722_v15 = vmul.f32 %v2862_v29, %v2862_v29  ;;  %v1644_v38 = vadd.f32 %v1642_v28, %v1564_v58  ;;  %v1732_v39 = vadd.f32 %v4499_v37, %v4446_v20  ;;  %v2882_v52 = vld [vmem:[%s3464_s11 + $0xf8] sm:$0xff]  ;;  %v4708_v29 = vld [vmem:[%s3464_s11 + $0x108] sm:$0xff] }
 0x122   : > { %v1781_v53 = vadd.f32 %v1779_v7, %v1701_v19  ;;  %v4696_v49 = vadd.f32 %v710_v6, %v4597_v16  ;;  %v4701_v18 = vadd.f32 %v711_v14, %v631_v21  ;;  %v1718_v59 = vmul.f32 %v4511_v47, %v4511_v47  ;;  %v4715_v20 = vld [vmem:[%s3464_s11 + $0x118] sm:$0xff]  ;;  %v4717_v21 = vpop.permute.xlu1 %876  ;;  %v4722_v6 = vld [vmem:[%s3464_s11 + $0x128] sm:$0xff]  ;;  %v4724_v28 = vpop.permute.xlu0 %874 }
 0x123   : > { %v1792_v5 = vmul.f32 %v4530_v44, %v4514_v12  ;;  %v1802_v25 = vmul.f32 %v2872_v60, %v2872_v60  ;;  %v1724_v16 = vadd.f32 %v1722_v15, %v1644_v38  ;;  %v1774_v7 = vrot.slane %v4530_v44, 2  ;;  %6461 = vst [vmem:[#allocation34_spill] sm:$0xff] %v4717_v21  ;;  %6462 = vst [vmem:[#allocation36_spill] sm:$0xff] %v4722_v6  ;;  %v6494_v21 = vld [vmem:[#allocation94_spill] sm:$0xff] }
 0x124   : > { %v1812_v9 = vadd.f32 %v4532_v50, %v1732_v39  ;;  %v4712_v37 = vadd.f32 %v2880_v41, %v2876_v45  ;;  %v4719_v31 = vadd.f32 %v1859_v26, %v1781_v53  ;;  %v1882_v58 = vmul.f32 %v2882_v52, %v2882_v52  ;;  %6463 = vst [vmem:[#allocation35_spill] sm:$0xff] %v4724_v28  ;;  %v4729_v41 = vld [vmem:[%s3450_s16 + $0x108] sm:$0xff] }
 0x125   : > { %v1794_v47 = vmul.f32 %v2872_v60, %v1792_v5  ;;  %v1890_v19 = vmul.f32 %v2876_v45, %v2876_v45  ;;  %v1798_v14 = vmul.f32 %v1792_v5, %v1792_v5  ;;  %v1804_v15 = vadd.f32 %v1802_v25, %v1724_v16 }
 0x126   : > { %6460 = vst [vmem:[#allocation32_spill] sm:$0xff] %v4712_v37  ;;  %v1872_v50 = vmul.f32 %v4712_v37, %v4542_v2  ;;  %v1967_v38 = vmul.f32 %v4708_v29, %v4708_v29  ;;  %1841 = vrot.lane.b32.xlu1 %v4712_v37, %s3236_s21  ;;  %v1854_v60 = vrot.slane %v4712_v37, 2  ;;  %v1975_v45 = vmul.f32 %v4729_v41, %v4729_v41 }
 0x127   : > { %v1892_v26 = vadd.f32 %v1890_v19, %v1812_v9  ;;  %v2047_v53 = vmul.f32 %v4715_v20, %v4715_v20  ;;  %v1884_v5 = vadd.f32 %v1882_v58, %v1804_v15  ;;  %v2127_v25 = vmul.f32 %v4722_v6, %v4722_v6 }
 0x128   : > { %v1874_v39 = vmul.f32 %v2882_v52, %v1872_v50  ;;  %v1470_v16 = vadd.f32 %v4319_v56, %v4250_v62  ;;  %v1476_v12 = vadd.f32 %v4297_v63, %v4238_v1  ;;  %v1480_v9 = vadd.f32 %v4301_v23, %v4243_v32  ;;  %v4762_v32 = vpop.permute.xlu1 %944  ;;  %v6467_v63 = vld [vmem:[#allocation86_spill] sm:$0xff]  ;;  %v6468_v56 = vld [vmem:[#allocation87_spill] sm:$0xff] }
 0x129   : > { %v4744_v2 = vadd.f32 %v1975_v45, %v1892_v26  ;;  %v6464_v19 = vrot.slane %v4421_v40, 2  ;;  %v1969_v58 = vadd.f32 %v1967_v38, %v1884_v5  ;;  %v1704_v62 = vsel %vm604_vm0, %v6465_v17, %v4421_v40  ;;  %6466 = vst [vmem:[#allocation113_spill] sm:$0xff] %v4762_v32  ;;  %v4768_v45 = vpop.permute.xlu0 %942  ;;  %v2851_v40 = vld [vmem:[%s3464_s11 + $0xc0] sm:$0xff] }
 0x12a   : > { %v1550_v15 = vadd.f32 %v4400_v3, %v1470_v16  ;;  %v1784_v1 = vsel %vm604_vm0, %v4530_v44, %v6465_v17  ;;  %v1556_v23 = vadd.f32 %v6467_v63, %v1476_v12  ;;  %v6469_v3 = vrot.slane %v6465_v17, 2  ;;  %6470 = vst [vmem:[#allocation86_spill] sm:$0xff] %v4768_v45  ;;  %v2861_v63 = vld [vmem:[%s3464_s11 + $0xd0] sm:$0xff] }
 0x12b   : > { %v1626_v52 = vsub.f32 %v4463_v34, %v6464_v19  ;;  %v1560_v34 = vadd.f32 %v6468_v56, %v1480_v9  ;;  %v1878_v5 = vmul.f32 %v1872_v50, %v1872_v50  ;;  %v2049_v16 = vadd.f32 %v2047_v53, %v1969_v58  ;;  %v6472_v53 = vld [vmem:[#allocation43_spill] sm:$0xff] }
 0x12c   : > { %v1706_v26 = vsub.f32 %v1704_v62, %v6469_v3  ;;  %v1786_v19 = vsub.f32 %v1784_v1, %v1774_v7  ;;  %v1864_v36 = vsel %vm604_vm0, %v4712_v37, %v4530_v44  ;;  %v1636_v12 = vadd.f32 %v4681_v33, %v1556_v23  ;;  %v6473_v7 = vld [vmem:[#allocation88_spill] sm:$0xff]  ;;  %v6474_v44 = vld [vmem:[#allocation97_spill] sm:$0xff] }
 0x12d   : > { %v1628_v38 = vmul.f32 %v1626_v52, %v1626_v52  ;;  %v1640_v9 = vadd.f32 %v4687_v46, %v1560_v34  ;;  %v4778_v62 = vadd.f32 %v2127_v25, %v2049_v16  ;;  %v1866_v50 = vsub.f32 %v1864_v36, %v1854_v60  ;;  %v6475_v36 = vld [vmem:[#allocation106_spill] sm:$0xff]  ;;  %v2871_v23 = vld [vmem:[%s3464_s11 + $0xe0] sm:$0xff] }
 0x12e   : > { %v1708_v52 = vmul.f32 %v1706_v26, %v1706_v26  ;;  %v1788_v56 = vmul.f32 %v1786_v19, %v1786_v19  ;;  %v1563_v58 = vadd.f32 %v6473_v7, %v6472_v53  ;;  %v1716_v3 = vadd.f32 %v4691_v51, %v1636_v12  ;;  %v4796_v26 = vpop.permute.xlu0 %954  ;;  %v6478_v19 = vld [vmem:[#allocation96_spill] sm:$0xff]  ;;  %v4813_v53 = vld [vmem:[%s3464_s11 + $0x100] sm:$0xff]  ;;  %v4816_v7 = vld [vmem:[%s3464_s11 + $0x110] sm:$0xff] }
 0x12f   : > { %v1630_v24 = vadd.f32 %v1628_v38, %v1550_v15  ;;  %6471 = vst [vmem:[#allocation87_spill] sm:$0xff] %v4778_v62  ;;  %v1720_v37 = vadd.f32 %v1718_v59, %v1640_v9  ;;  %v4784_v15 = vmul.f32 %v2851_v40, %v6474_v44  ;;  %v1868_v33 = vmul.f32 %v1866_v50, %v1866_v50  ;;  %v2881_v50 = vld [vmem:[%s3464_s11 + $0xf0] sm:$0xff]  ;;  %v6488_v62 = vld [vmem:[#allocation80_spill] sm:$0xff] }
 0x130   : > { %v4788_v46 = vmul.f32 %v6474_v44, %v6474_v44  ;;  %v1641_v25 = vmul.f32 %v2851_v40, %v2851_v40  ;;  %v4791_v60 = vmul.f32 %v2861_v63, %v6475_v36  ;;  %v1796_v59 = vadd.f32 %v1794_v47, %v1716_v3  ;;  %6477 = vst [vmem:[#allocation88_spill] sm:$0xff] %v4796_v26  ;;  %v6479_v40 = vld [vmem:[#allocation103_spill] sm:$0xff] }
 0x131   : > { %v1710_v1 = vadd.f32 %v1708_v52, %v1630_v24  ;;  %v4794_v24 = vpop.permute.xlu1 %956  ;;  %v1800_v34 = vadd.f32 %v1798_v14, %v1720_v37  ;;  %v1721_v38 = vmul.f32 %v2861_v63, %v2861_v63  ;;  %v1717_v44 = vmul.f32 %v6475_v36, %v6475_v36  ;;  %v2875_v52 = vld [vmem:[%s3450_s16 + $0xf0] sm:$0xff] }
 0x132   : > { %6476 = vst [vmem:[#allocation43_spill] sm:$0xff] %v4794_v24  ;;  %v1643_v16 = vadd.f32 %v1641_v25, %v1563_v58  ;;  %v1731_v12 = vadd.f32 %v6479_v40, %v6478_v19  ;;  %v1791_v9 = vmul.f32 %v4534_v30, %v4524_v0  ;;  %v4809_v37 = vadd.f32 %v1874_v39, %v1796_v59  ;;  %v6480_v25 = vld [vmem:[#allocation111_spill] sm:$0xff]  ;;  %v4822_v19 = vld [vmem:[%s3464_s11 + $0x120] sm:$0xff]  ;;  %v6490_v24 = vld [vmem:[#allocation82_spill] sm:$0xff] }
 0x133   : > { %v1790_v51 = vadd.f32 %v1788_v56, %v1710_v1  ;;  %v2879_v56 = vld [vmem:[%s3458_s6 + $0xf0] sm:$0xff]  ;;  %v1773_v14 = vrot.slane %v4534_v30, 2  ;;  %v1801_v63 = vmul.f32 %v2871_v23, %v2871_v23  ;;  %v4818_v58 = vadd.f32 %v1878_v5, %v1800_v34  ;;  %6481 = vst [vmem:[#allocation97_spill] sm:$0xff] %v4822_v19  ;;  %v4827_v59 = vld [vmem:[%s3450_s16 + $0x100] sm:$0xff] }
 0x134   : > { %v1723_v1 = vadd.f32 %v1721_v38, %v1643_v16  ;;  %v1793_v3 = vmul.f32 %v2871_v23, %v1791_v9  ;;  %v1811_v36 = vadd.f32 %v6480_v25, %v1731_v12  ;;  %v1797_v40 = vmul.f32 %v1791_v9, %v1791_v9  ;;  %v6484_v9 = vld [vmem:[#allocation78_spill] sm:$0xff]  ;;  %v6487_v25 = vld [vmem:[#allocation55_spill] sm:$0xff] }
 0x135   : > { %v4807_v47 = vadd.f32 %v1868_v33, %v1790_v51  ;;  %v4824_v33 = vadd.f32 %v2879_v56, %v2875_v52  ;;  %v1881_v39 = vmul.f32 %v2881_v50, %v2881_v50  ;;  %v1889_v51 = vmul.f32 %v2875_v52, %v2875_v52  ;;  %v4835_v34 = vpop.permute.xlu1 %1024  ;;  %v6485_v52 = vld [vmem:[#allocation83_spill] sm:$0xff] }
 0x136   : > { %v1803_v0 = vadd.f32 %v1801_v63, %v1723_v1  ;;  %v1966_v17 = vmul.f32 %v4813_v53, %v4813_v53  ;;  %v1974_v5 = vmul.f32 %v4827_v59, %v4827_v59  ;;  %v2046_v23 = vmul.f32 %v4816_v7, %v4816_v7  ;;  %6483 = vst [vmem:[#allocation96_spill] sm:$0xff] %v4835_v34  ;;  %v4845_v63 = vpop.permute.xlu0 %1022  ;;  %v6489_v34 = vld [vmem:[#allocation76_spill] sm:$0xff] }
 0x137   : > { %6482 = vst [vmem:[#allocation106_spill] sm:$0xff] %v4824_v33  ;;  %v1871_v38 = vmul.f32 %v4824_v33, %v4616_v42  ;;  %v1891_v16 = vadd.f32 %v1889_v51, %v1811_v36  ;;  %v2126_v12 = vmul.f32 %v4822_v19, %v4822_v19  ;;  %1839 = vrot.lane.b32.xlu0 %v4824_v33, %s3236_s21  ;;  %6486 = vst [vmem:[#allocation103_spill] sm:$0xff] %v4845_v63  ;;  %v6491_v42 = vld [vmem:[#allocation95_spill] sm:$0xff]  ;;  %v6493_v51 = vld [vmem:[#allocation98_spill] sm:$0xff] }
 0x138   : > { %v1469_v56 = vadd.f32 %v6485_v52, %v6484_v9  ;;  %v1883_v1 = vadd.f32 %v1881_v39, %v1803_v0  ;;  %v1475_v26 = vadd.f32 %v6488_v62, %v6487_v25  ;;  %v1479_v6 = vadd.f32 %v6490_v24, %v6489_v34  ;;  %v6495_v63 = vld [vmem:[#allocation90_spill] sm:$0xff]  ;;  %v6496_v39 = vld [vmem:[#allocation91_spill] sm:$0xff] }
 0x139   : > { %v6492_v36 = vrot.slane %v6491_v42, 2  ;;  %v1853_v19 = vrot.slane %v4824_v33, 2  ;;  %v1873_v32 = vmul.f32 %v2881_v50, %v1871_v38  ;;  %v4855_v28 = vadd.f32 %v1974_v5, %v1891_v16  ;;  %v6497_v24 = vld [vmem:[#allocation102_spill] sm:$0xff] }
 0x13a   : > { %v1549_v9 = vadd.f32 %v6494_v21, %v1469_v56  ;;  %v1968_v52 = vadd.f32 %v1966_v17, %v1883_v1  ;;  %v1555_v0 = vadd.f32 %v6495_v63, %v1475_v26  ;;  %v1559_v62 = vadd.f32 %v6496_v39, %v1479_v6  ;;  %v6498_v21 = vld [vmem:[#allocation105_spill] sm:$0xff]  ;;  %v6499_v26 = vld [vmem:[#allocation108_spill] sm:$0xff]  ;;  %v4878_v63 = vpop.permute.xlu1 %1036 }
 0x13b   : > { %v1625_v45 = vsub.f32 %v6493_v51, %v6492_v36  ;;  %v1703_v34 = vsel %vm604_vm0, %v6497_v24, %v6491_v42  ;;  %v1783_v50 = vsel %vm604_vm0, %v4534_v30, %v6497_v24  ;;  %v1863_v17 = vsel %vm604_vm0, %v4824_v33, %v4534_v30  ;;  %v2888_v30 = vld [vmem:[%s3456_s9 + $0x108] sm:$0xff]  ;;  %v4887_v42 = vpop.permute.xlu0 %1034 }
 0x13c   : > { %v718_v6 = vsel %vm625_vm1, %v6499_v26, %v6498_v21  ;;  %v2048_v5 = vadd.f32 %v2046_v23, %v1968_v52  ;;  %v1635_v16 = vadd.f32 %v4784_v15, %v1555_v0  ;;  %v1639_v56 = vadd.f32 %v4788_v46, %v1559_v62 }
 0x13d   : > { %v1627_v25 = vmul.f32 %v1625_v45, %v1625_v45  ;;  %v1877_v45 = vmul.f32 %v1871_v38, %v1871_v38  ;;  %v6500_v36 = vrot.slane %v6497_v24, 2  ;;  %v1785_v39 = vsub.f32 %v1783_v50, %v1773_v14  ;;  %v6501_v38 = vld [vmem:[#allocation38_spill] sm:$0xff]  ;;  %v2916_v24 = vld [vmem:[%s3450_s16 + $0x138] sm:$0xff] }
 0x13e   : > { %v719_v33 = vsel %vm625_vm1, %v6498_v21, %v6499_v26  ;;  %v1715_v23 = vadd.f32 %v4791_v60, %v1635_v16  ;;  %v1719_v15 = vadd.f32 %v1717_v44, %v1639_v56  ;;  %v1865_v46 = vsub.f32 %v1863_v17, %v1853_v19  ;;  %v6506_v17 = vld [vmem:[#allocation31_spill] sm:$0xff] }
 0x13f   : > { %v1629_v1 = vadd.f32 %v1627_v25, %v1549_v9  ;;  %v1705_v51 = vsub.f32 %v1703_v34, %v6500_v36  ;;  %v720_v52 = vsub.f32 %v6501_v38, %v718_v6  ;;  %v2887_v9 = vld [vmem:[%s3456_s9 + $0x100] sm:$0xff]  ;;  %v4892_v0 = vadd.f32 %v2126_v12, %v2048_v5  ;;  %v2890_v6 = vld [vmem:[%s3458_s6 + $0x108] sm:$0xff] }
 0x140   : > { %v1787_v14 = vmul.f32 %v1785_v39, %v1785_v39  ;;  %v6503_v25 = vld [vmem:[#allocation37_spill] sm:$0xff]  ;;  %v1795_v50 = vadd.f32 %v1793_v3, %v1715_v23  ;;  %v1799_v21 = vadd.f32 %v1797_v40, %v1719_v15  ;;  %v4896_v36 = vadd.f32 %v2888_v30, %v4574_v22  ;;  %v4913_v22 = vpop.permute.xlu1 %1104 }
 0x141   : > { %6502 = vst [vmem:[#allocation111_spill] sm:$0xff] %v4892_v0  ;;  %v1707_v62 = vmul.f32 %v1705_v51, %v1705_v51  ;;  %v721_v34 = vsub.f32 %v6503_v25, %v719_v33  ;;  %v722_v26 = vmul.f32 %v720_v52, %v720_v52  ;;  %v4899_v19 = vadd.f32 %v2887_v9, %v4619_v4  ;;  %v2889_v30 = vld [vmem:[%s3458_s6 + $0x100] sm:$0xff]  ;;  %v6507_v51 = vld [vmem:[#allocation40_spill] sm:$0xff] }
 0x142   : > { %6504 = vst [vmem:[#allocation78_spill] sm:$0xff] %v4896_v36  ;;  %v786_v12 = vsel %vm625_vm1, %v4588_v11, %v6506_v17  ;;  %v1867_v5 = vmul.f32 %v1865_v46, %v1865_v46  ;;  %v1875_v16 = vadd.f32 %v1873_v32, %v1795_v50  ;;  %v1937_v40 = vrot.slane %v4896_v36, 2  ;;  %1914 = vrot.lane.b32.xlu1 %v4896_v36, %s3236_s21  ;;  %v4925_v32 = vpop.permute.xlu0 %1102 }
 0x143   : > { %v1709_v60 = vadd.f32 %v1707_v62, %v1629_v1  ;;  %v723_v44 = vmul.f32 %v721_v34, %v721_v34  ;;  %6505 = vst [vmem:[#allocation83_spill] sm:$0xff] %v4899_v19  ;;  %v4907_v3 = vadd.f32 %v722_v26, %v4592_v43  ;;  %v1879_v4 = vadd.f32 %v1877_v45, %v1799_v21  ;;  %v6508_v45 = vld [vmem:[#allocation39_spill] sm:$0xff] }
 0x144   : > { %v1936_v56 = vrot.slane %v4899_v19, 2  ;;  %1912 = vrot.lane.b32.xlu0 %v4899_v19, %s3236_s21  ;;  %v787_v43 = vsel %vm625_vm1, %v6506_v17, %v4588_v11  ;;  %v1941_v1 = vsub.f32 %v4896_v36, %v1937_v40  ;;  %v788_v39 = vsub.f32 %v6507_v51, %v786_v12 }
 0x145   : > { %v4916_v33 = vadd.f32 %v723_v44, %v4594_v55  ;;  %v789_v23 = vsub.f32 %v6508_v45, %v787_v43  ;;  %v4931_v55 = vadd.f32 %v2890_v6, %v4729_v41  ;;  %v1789_v15 = vadd.f32 %v1787_v14, %v1709_v60  ;;  %v4960_v44 = vpop.permute.xlu1 %1116  ;;  %v2898_v43 = vld [vmem:[%s3456_s9 + $0x118] sm:$0xff] }
 0x146   : > { %v1940_v46 = vsub.f32 %v4899_v19, %v1936_v56  ;;  %v4935_v38 = vadd.f32 %v2889_v30, %v4827_v59  ;;  %v798_v11 = vsel %vm625_vm1, %v4631_v54, %v4625_v57  ;;  %v1943_v52 = vsel %vm604_vm0, %v1941_v1, 0.0  ;;  %v4964_v30 = vpop.permute.xlu0 %1114 }
 0x147   : > { %6509 = vst [vmem:[#allocation55_spill] sm:$0xff] %v4931_v55  ;;  %v790_v9 = vand.u32 2147483647, %v788_v39  ;;  %v791_v62 = vand.u32 2147483647, %v789_v23  ;;  %v1939_v25 = vrot.slane %v4931_v55, 2  ;;  %1926 = vrot.lane.b32.xlu1 %v4931_v55, %s3236_s21  ;;  %v1957_v14 = vmul.f32 %v4931_v55, %v4896_v36 }
 0x148   : > { %6510 = vst [vmem:[#allocation80_spill] sm:$0xff] %v4935_v38  ;;  %v1945_v41 = vand.u32 2147483647, %v1943_v52  ;;  %v1942_v59 = vsel %vm604_vm0, %v1940_v46, 0.0  ;;  %v1938_v34 = vrot.slane %v4935_v38, 2  ;;  %1924 = vrot.lane.b32.xlu0 %v4935_v38, %s3236_s21  ;;  %v1869_v17 = vadd.f32 %v1867_v5, %v1789_v15  ;;  %v2894_v5 = vld [vmem:[%s3443_s10 + $0x118] sm:$0xff] }
 0x149   : > { %v1944_v50 = vand.u32 2147483647, %v1942_v59  ;;  %v4954_v21 = vadd.f32 %v790_v9, %v4696_v49  ;;  %v4957_v26 = vadd.f32 %v791_v62, %v4701_v18  ;;  %v1949_v60 = vsub.f32 %v4931_v55, %v1939_v25  ;;  %v6511_v46 = vld [vmem:[#allocation45_spill] sm:$0xff]  ;;  %v2897_v25 = vld [vmem:[%s3456_s9 + $0x110] sm:$0xff] }
 0x14a   : > { %v1959_v12 = vmul.f32 %v4708_v29, %v1957_v14  ;;  %v1963_v6 = vmul.f32 %v1957_v14, %v1957_v14  ;;  %v1948_v40 = vsub.f32 %v4935_v38, %v1938_v34  ;;  %v4967_v56 = vadd.f32 %v1945_v41, %v4675_v27  ;;  %v5004_v14 = vpop.permute.xlu1 %1184 }
 0x14b   : > { %v1951_v49 = vsel %vm604_vm0, %v1949_v60, 0.0  ;;  %v1956_v18 = vmul.f32 %v4935_v38, %v4899_v19  ;;  %v799_v29 = vsel %vm625_vm1, %v4625_v57, %v4631_v54  ;;  %v4980_v1 = vadd.f32 %v1944_v50, %v4719_v31  ;;  %v6512_v31 = vld [vmem:[#allocation41_spill] sm:$0xff]  ;;  %v5015_v50 = vpop.permute.xlu0 %1182 }
 0x14c   : > { %v1953_v27 = vmul.f32 %v1951_v49, %v1951_v49  ;;  %v4983_v51 = vadd.f32 %v1959_v12, %v4809_v37  ;;  %v1950_v39 = vsel %vm604_vm0, %v1948_v40, 0.0  ;;  %v800_v52 = vsub.f32 %v6511_v46, %v798_v11  ;;  %v2893_v37 = vld [vmem:[%s3443_s10 + $0x110] sm:$0xff]  ;;  %v2900_v40 = vld [vmem:[%s3458_s6 + $0x118] sm:$0xff] }
 0x14d   : > { %v1958_v45 = vmul.f32 %v4813_v53, %v1956_v18  ;;  %v1962_v23 = vmul.f32 %v1956_v18, %v1956_v18  ;;  %v1952_v15 = vmul.f32 %v1950_v39, %v1950_v39  ;;  %v4993_v54 = vadd.f32 %v1963_v6, %v4818_v58  ;;  %v2896_v6 = vld [vmem:[%s3450_s16 + $0x118] sm:$0xff] }
 0x14e   : > { %v4990_v57 = vadd.f32 %v1953_v27, %v4807_v47  ;;  %v801_v9 = vsub.f32 %v6512_v31, %v799_v29  ;;  %v4996_v62 = vadd.f32 %v2898_v43, %v2894_v5  ;;  %v802_v59 = vmul.f32 %v800_v52, %v800_v52  ;;  %v6515_v29 = vld [vmem:[#allocation47_spill] sm:$0xff] }
 0x14f   : > { %v5000_v41 = vadd.f32 %v1952_v15, %v1869_v17  ;;  %v5002_v53 = vadd.f32 %v1958_v45, %v1875_v16  ;;  %v2051_v11 = vmul.f32 %v2894_v5, %v2894_v5  ;;  %v5006_v47 = vadd.f32 %v1962_v23, %v1879_v4  ;;  %v2895_v43 = vld [vmem:[%s3450_s16 + $0x110] sm:$0xff]  ;;  %v6516_v23 = vld [vmem:[#allocation46_spill] sm:$0xff] }
 0x150   : > { %6513 = vst [vmem:[#allocation76_spill] sm:$0xff] %v4996_v62  ;;  %v803_v58 = vmul.f32 %v801_v9, %v801_v9  ;;  %v2017_v34 = vrot.slane %v4996_v62, 2  ;;  %1994 = vrot.lane.b32.xlu1 %v4996_v62, %s3236_s21  ;;  %v2021_v16 = vsel %vm604_vm0, %v4996_v62, %v4896_v36  ;;  %v5018_v60 = vadd.f32 %v802_v59, %v4907_v3  ;;  %v2899_v27 = vld [vmem:[%s3458_s6 + $0x110] sm:$0xff] }
 0x151   : > { %v5020_v4 = vadd.f32 %v2897_v25, %v2893_v37  ;;  %v2050_v17 = vmul.f32 %v2893_v37, %v2893_v37  ;;  %v866_v12 = vsel %vm625_vm1, %v4683_v13, %v4673_v35  ;;  %v867_v3 = vsel %vm625_vm1, %v4673_v35, %v4683_v13  ;;  %v5053_v25 = vpop.permute.xlu1 %1196  ;;  %v6541_v36 = vld [vmem:[#allocation59_spill] sm:$0xff] }
 0x152   : > { %v5029_v49 = vadd.f32 %v803_v58, %v4916_v33  ;;  %v2023_v18 = vsub.f32 %v2021_v16, %v2017_v34  ;;  %v868_v5 = vsub.f32 %v6515_v29, %v866_v12  ;;  %v5039_v39 = vadd.f32 %v2051_v11, %v4642_v48  ;;  %v5066_v16 = vpop.permute.xlu0 %1194 }
 0x153   : > { %6514 = vst [vmem:[#allocation82_spill] sm:$0xff] %v5020_v4  ;;  %v2016_v45 = vrot.slane %v5020_v4, 2  ;;  %1992 = vrot.lane.b32.xlu0 %v5020_v4, %s3236_s21  ;;  %v2020_v33 = vsel %vm604_vm0, %v5020_v4, %v4899_v19  ;;  %v869_v15 = vsub.f32 %v6516_v23, %v867_v3  ;;  %v5049_v46 = vadd.f32 %v2900_v40, %v2896_v6 }
 0x154   : > { %v2025_v35 = vand.u32 2147483647, %v2023_v18  ;;  %v870_v13 = vand.u32 2147483647, %v868_v5  ;;  %v2055_v52 = vmul.f32 %v2896_v6, %v2896_v6  ;;  %v5051_v9 = vadd.f32 %v2899_v27, %v2895_v43 }
 0x155   : > { %6517 = vst [vmem:[#allocation98_spill] sm:$0xff] %v5049_v46  ;;  %v2022_v31 = vsub.f32 %v2020_v33, %v2016_v45  ;;  %v871_v48 = vand.u32 2147483647, %v869_v15  ;;  %v2054_v37 = vmul.f32 %v2895_v43, %v2895_v43  ;;  %v5056_v59 = vadd.f32 %v2050_v17, %v4654_v61  ;;  %2006 = vrot.lane.b32.xlu1 %v5049_v46, %s3236_s21  ;;  %v2904_v45 = vld [vmem:[%s3443_s10 + $0x128] sm:$0xff] }
 0x156   : > { %6518 = vst [vmem:[#allocation94_spill] sm:$0xff] %v5051_v9  ;;  %v5059_v11 = vadd.f32 %v870_v13, %v4954_v21  ;;  %v2019_v58 = vrot.slane %v5049_v46, 2  ;;  %v2037_v34 = vmul.f32 %v5049_v46, %v4996_v62  ;;  %v5072_v61 = vadd.f32 %v2055_v52, %v4744_v2  ;;  %v2908_v33 = vld [vmem:[%s3456_s9 + $0x128] sm:$0xff]  ;;  %v2903_v52 = vld [vmem:[%s3443_s10 + $0x120] sm:$0xff] }
 0x157   : > { %v2024_v12 = vand.u32 2147483647, %v2022_v31  ;;  %v5069_v6 = vadd.f32 %v871_v48, %v4957_v26  ;;  %v2029_v21 = vsel %vm604_vm0, %v5049_v46, %v4931_v55  ;;  %2004 = vrot.lane.b32.xlu0 %v5051_v9, %s3236_s21  ;;  %v2018_v26 = vrot.slane %v5051_v9, 2  ;;  %v2907_v31 = vld [vmem:[%s3456_s9 + $0x120] sm:$0xff] }
 0x158   : > { %v2039_v17 = vmul.f32 %v4715_v20, %v2037_v34  ;;  %v2043_v40 = vmul.f32 %v2037_v34, %v2037_v34  ;;  %v2031_v18 = vsub.f32 %v2029_v21, %v2019_v58  ;;  %v5083_v2 = vadd.f32 %v2025_v35, %v4967_v56  ;;  %v6520_v35 = vld [vmem:[#allocation35_spill] sm:$0xff]  ;;  %v6522_v34 = vld [vmem:[#allocation50_spill] sm:$0xff]  ;;  %v5120_v21 = vpop.permute.xlu0 %1267 }
 0x159   : > { %v2036_v3 = vmul.f32 %v5051_v9, %v5020_v4  ;;  %v5088_v29 = vadd.f32 %v2054_v37, %v4855_v28  ;;  %v2028_v20 = vsel %vm604_vm0, %v5051_v9, %v4935_v38  ;;  %v5095_v5 = vadd.f32 %v2024_v12, %v4980_v1  ;;  %v6519_v28 = vld [vmem:[#allocation34_spill] sm:$0xff] }
 0x15a   : > { %v2033_v43 = vmul.f32 %v2031_v18, %v2031_v18  ;;  %v5098_v27 = vadd.f32 %v2039_v17, %v4983_v51  ;;  %v2030_v56 = vsub.f32 %v2028_v20, %v2018_v26  ;;  %v878_v13 = vsel %vm625_vm1, %v6520_v35, %v6519_v28  ;;  %v5113_v51 = vpop.permute.xlu1 %1269 }
 0x15b   : > { %v2038_v23 = vmul.f32 %v4816_v7, %v2036_v3  ;;  %v2042_v15 = vmul.f32 %v2036_v3, %v2036_v3  ;;  %v879_v1 = vsel %vm625_vm1, %v6519_v28, %v6520_v35  ;;  %v5116_v48 = vadd.f32 %v2043_v40, %v4993_v54  ;;  %v6521_v7 = vld [vmem:[#allocation52_spill] sm:$0xff]  ;;  %v2905_v35 = vld [vmem:[%s3450_s16 + $0x120] sm:$0xff] }
 0x15c   : > { %v2032_v37 = vmul.f32 %v2030_v56, %v2030_v56  ;;  %v880_v58 = vsub.f32 %v6521_v7, %v878_v13  ;;  %v881_v12 = vsub.f32 %v6522_v34, %v879_v1  ;;  %v5123_v17 = vadd.f32 %v2033_v43, %v4990_v57  ;;  %v2906_v43 = vld [vmem:[%s3450_s16 + $0x128] sm:$0xff]  ;;  %v2909_v13 = vld [vmem:[%s3458_s6 + $0x120] sm:$0xff] }
 0x15d   : > { %v5126_v18 = vadd.f32 %v2038_v23, %v5002_v53  ;;  %v5128_v26 = vadd.f32 %v2908_v33, %v2904_v45  ;;  %v2131_v3 = vmul.f32 %v2904_v45, %v2904_v45  ;;  %v5131_v54 = vadd.f32 %v2042_v15, %v5006_v47  ;;  %v2910_v45 = vld [vmem:[%s3458_s6 + $0x128] sm:$0xff] }
 0x15e   : > { %v882_v40 = vmul.f32 %v880_v58, %v880_v58  ;;  %v883_v20 = vmul.f32 %v881_v12, %v881_v12  ;;  %v5133_v56 = vadd.f32 %v2907_v31, %v2903_v52  ;;  %v5136_v28 = vadd.f32 %v2032_v37, %v5000_v41  ;;  %v6529_v31 = vld [vmem:[#allocation86_spill] sm:$0xff]  ;;  %v5173_v7 = vpop.permute.xlu1 %1281 }
 0x15f   : > { %6523 = vst [vmem:[#allocation90_spill] sm:$0xff] %v5126_v18  ;;  %6524 = vst [vmem:[#allocation91_spill] sm:$0xff] %v5128_v26  ;;  %v2097_v57 = vrot.slane %v5128_v26, 2  ;;  %2074 = vrot.lane.b32.xlu1 %v5128_v26, %s3236_s21  ;;  %v2101_v53 = vsel %vm604_vm0, %v5128_v26, %v4996_v62  ;;  %v2130_v47 = vmul.f32 %v2903_v52, %v2903_v52  ;;  %v6528_v52 = vld [vmem:[#allocation113_spill] sm:$0xff]  ;;  %v6530_v34 = vld [vmem:[#allocation54_spill] sm:$0xff] }
 0x160   : > { %6525 = vst [vmem:[#allocation105_spill] sm:$0xff] %v5131_v54  ;;  %6526 = vst [vmem:[#allocation108_spill] sm:$0xff] %v5133_v56  ;;  %v5148_v33 = vadd.f32 %v882_v40, %v5018_v60  ;;  %v5151_v23 = vadd.f32 %v883_v20, %v5029_v49  ;;  %v2096_v41 = vrot.slane %v5133_v56, 2  ;;  %2072 = vrot.lane.b32.xlu0 %v5133_v56, %s3236_s21  ;;  %v6531_v40 = vld [vmem:[#allocation53_spill] sm:$0xff]  ;;  %v2921_v18 = vld [vmem:[%s3464_s11 + $0x130] sm:$0xff] }
 0x161   : > { %6527 = vst [vmem:[#allocation38_spill] sm:$0xff] %v5136_v28  ;;  %v2100_v15 = vsel %vm604_vm0, %v5133_v56, %v5020_v4  ;;  %v5162_v1 = vsub.f32 %v2101_v53, %v2097_v57  ;;  %v2133_v60 = vadd.f32 %v2131_v3, %v5039_v39  ;;  %v946_v49 = vsel %vm625_vm1, %v6529_v31, %v6528_v52  ;;  %v5181_v39 = vpop.permute.xlu0 %1279 }
 0x162   : > { %v947_v37 = vsel %vm625_vm1, %v6528_v52, %v6529_v31  ;;  %v5175_v58 = vsub.f32 %v2100_v15, %v2096_v41  ;;  %v948_v12 = vsub.f32 %v6530_v34, %v946_v49  ;;  %v5179_v57 = vadd.f32 %v2910_v45, %v2906_v43 }
 0x163   : > { %v949_v20 = vsub.f32 %v6531_v40, %v947_v37  ;;  %v2132_v3 = vadd.f32 %v2130_v47, %v5056_v59  ;;  %v2135_v53 = vmul.f32 %v2906_v43, %v2906_v43  ;;  %v5184_v62 = vadd.f32 %v2909_v13, %v2905_v35  ;;  %v2914_v43 = vld [vmem:[%s3443_s10 + $0x138] sm:$0xff] }
 0x164   : > { %6532 = vst [vmem:[#allocation37_spill] sm:$0xff] %v5179_v57  ;;  %v2134_v52 = vmul.f32 %v2905_v35, %v2905_v35  ;;  %v950_v41 = vand.u32 2147483647, %v948_v12  ;;  %v2117_v49 = vmul.f32 %v5179_v57, %v5128_v26  ;;  %2086 = vrot.lane.b32.xlu1 %v5179_v57, %s3236_s21  ;;  %v2099_v37 = vrot.slane %v5179_v57, 2  ;;  %v2918_v35 = vld [vmem:[%s3456_s9 + $0x138] sm:$0xff] }
 0x165   : > { %6533 = vst [vmem:[#allocation31_spill] sm:$0xff] %v5184_v62  ;;  %v951_v15 = vand.u32 2147483647, %v949_v20  ;;  %v2109_v59 = vsel %vm604_vm0, %v5179_v57, %v5049_v46  ;;  %v2098_v47 = vrot.slane %v5184_v62, 2  ;;  %2084 = vrot.lane.b32.xlu0 %v5184_v62, %s3236_s21  ;;  %v6534_v12 = vld [vmem:[#allocation36_spill] sm:$0xff]  ;;  %v5212_v20 = vadd.f32 %v2135_v53, %v5072_v61 }
 0x166   : > { %v5203_v13 = vadd.f32 %v950_v41, %v5059_v11  ;;  %v5209_v40 = vmul.f32 %v6534_v12, %v2117_v49  ;;  %v2111_v45 = vsub.f32 %v2109_v59, %v2099_v37  ;;  %v2116_v31 = vmul.f32 %v5184_v62, %v5133_v56  ;;  %v6536_v12 = vld [vmem:[#allocation88_spill] sm:$0xff]  ;;  %v2917_v37 = vld [vmem:[%s3456_s9 + $0x130] sm:$0xff]  ;;  %v5237_v59 = vpop.permute.xlu0 %1347 }
 0x167   : > { %v5206_v34 = vadd.f32 %v951_v15, %v5069_v6  ;;  %v5217_v46 = vadd.f32 %v2134_v52, %v5088_v29  ;;  %v2108_v11 = vsel %vm604_vm0, %v5184_v62, %v5051_v9  ;;  %v5223_v6 = vpop.permute.xlu1 %1349  ;;  %v6535_v15 = vld [vmem:[#allocation43_spill] sm:$0xff]  ;;  %v5233_v29 = vadd.f32 %v2918_v35, %v2914_v43 }
 0x168   : > { %v2110_v41 = vsub.f32 %v2108_v11, %v2098_v47  ;;  %v958_v61 = vsel %vm625_vm1, %v6536_v12, %v6535_v15  ;;  %v959_v53 = vsel %vm625_vm1, %v6535_v15, %v6536_v12  ;;  %v2913_v52 = vld [vmem:[%s3443_s10 + $0x130] sm:$0xff]  ;;  %v5239_v9 = vmul.f32 %v2117_v49, %v2117_v49  ;;  %v6539_v47 = vld [vmem:[#allocation97_spill] sm:$0xff]  ;;  %v6543_v15 = vld [vmem:[#allocation58_spill] sm:$0xff] }
 0x169   : > { %6537 = vst [vmem:[#allocation40_spill] sm:$0xff] %v5233_v29  ;;  %v5241_v4 = vmul.f32 %v2111_v45, %v2111_v45  ;;  %v5244_v11 = vmul.f32 %v6539_v47, %v2116_v31  ;;  %v960_v19 = vsub.f32 %v6541_v36, %v958_v61  ;;  %v5247_v55 = vmul.f32 %v2116_v31, %v2116_v31 }
 0x16a   : > { %6538 = vst [vmem:[#allocation39_spill] sm:$0xff] %v5239_v9  ;;  %v961_v35 = vsub.f32 %v6543_v15, %v959_v53  ;;  %v2177_v12 = vrot.slane %v5233_v29, 2  ;;  %v2211_v38 = vmul.f32 %v2914_v43, %v2914_v43  ;;  %2154 = vrot.lane.b32.xlu1 %v5233_v29, %s3236_s21  ;;  %v2181_v45 = vsel %vm604_vm0, %v5233_v29, %v5128_v26  ;;  %v6546_v43 = vld [vmem:[#allocation96_spill] sm:$0xff]  ;;  %v6547_v15 = vld [vmem:[#allocation103_spill] sm:$0xff] }
 0x16b   : > { %6540 = vst [vmem:[#allocation45_spill] sm:$0xff] %v5244_v11  ;;  %6542 = vst [vmem:[#allocation41_spill] sm:$0xff] %v5247_v55  ;;  %v962_v49 = vmul.f32 %v960_v19, %v960_v19  ;;  %v5257_v36 = vadd.f32 %v2917_v37, %v2913_v52  ;;  %v2210_v31 = vmul.f32 %v2913_v52, %v2913_v52  ;;  %v2920_v55 = vld [vmem:[%s3458_s6 + $0x138] sm:$0xff] }
 0x16c   : > { %v5259_v61 = vmul.f32 %v2110_v41, %v2110_v41  ;;  %v963_v53 = vmul.f32 %v961_v35, %v961_v35  ;;  %v5261_v47 = vsub.f32 %v2181_v45, %v2177_v12  ;;  %v1026_v19 = vsel %vm625_vm1, %v6547_v15, %v6546_v43  ;;  %v2922_v37 = vld [vmem:[%s3464_s11 + $0x138] sm:$0xff]  ;;  %v2915_v35 = vld [vmem:[%s3450_s16 + $0x130] sm:$0xff]  ;;  %v5284_v45 = vpop.permute.xlu1 %1361 }
 0x16d   : > { %6544 = vst [vmem:[#allocation47_spill] sm:$0xff] %v5257_v36  ;;  %v5270_v54 = vadd.f32 %v962_v49, %v5148_v33  ;;  %v5272_v26 = vadd.f32 %v2211_v38, %v2133_v60  ;;  %v2176_v52 = vrot.slane %v5257_v36, 2  ;;  %2152 = vrot.lane.b32.xlu0 %v5257_v36, %s3236_s21  ;;  %v2180_v41 = vsel %vm604_vm0, %v5257_v36, %v5133_v56  ;;  %v2919_v12 = vld [vmem:[%s3458_s6 + $0x130] sm:$0xff] }
 0x16e   : > { %6545 = vst [vmem:[#allocation46_spill] sm:$0xff] %v5259_v61  ;;  %6548 = vst [vmem:[#allocation34_spill] sm:$0xff] %v5284_v45  ;;  %v5287_v33 = vadd.f32 %v963_v53, %v5151_v23  ;;  %v5289_v38 = vadd.f32 %v2210_v31, %v2132_v3  ;;  %v1027_v60 = vsel %vm625_vm1, %v6546_v43, %v6547_v15  ;;  %v6549_v49 = vld [vmem:[#allocation63_spill] sm:$0xff]  ;;  %v5297_v61 = vpop.permute.xlu0 %1359  ;;  %v6551_v45 = vld [vmem:[#allocation60_spill] sm:$0xff] }
 0x16f   : > { %v1028_v11 = vsub.f32 %v6549_v49, %v1026_v19  ;;  %6550 = vst [vmem:[#allocation35_spill] sm:$0xff] %v5297_v61  ;;  %v5300_v28 = vsub.f32 %v2180_v41, %v2176_v52  ;;  %v1029_v0 = vsub.f32 %v6551_v45, %v1027_v60  ;;  %v5303_v23 = vadd.f32 %v2920_v55, %v2916_v24 }
 0x170   : > { %v5305_v31 = vmul.f32 %v2922_v37, %v2922_v37  ;;  %v2215_v53 = vmul.f32 %v2916_v24, %v2916_v24  ;;  %v5307_v9 = vadd.f32 %v2919_v12, %v2915_v35  ;;  %v5314_v52 = vmul.f32 %v2921_v18, %v2921_v18  ;;  %v5333_v60 = vpop.permute.xlu1 %1429 }
 0x171   : > { %6552 = vst [vmem:[#allocation52_spill] sm:$0xff] %v5303_v23  ;;  %v1030_v3 = vand.u32 2147483647, %v1028_v11  ;;  %v1031_v43 = vand.u32 2147483647, %v1029_v0  ;;  %v2179_v15 = vrot.slane %v5303_v23, 2  ;;  %v2197_v19 = vmul.f32 %v5303_v23, %v5233_v29  ;;  %2166 = vrot.lane.b32.xlu1 %v5303_v23, %s3236_s21 }
 0x172   : > { %6553 = vst [vmem:[#allocation50_spill] sm:$0xff] %v5307_v9  ;;  %6554 = vst [vmem:[#allocation113_spill] sm:$0xff] %v5314_v52  ;;  %v2189_v24 = vsel %vm604_vm0, %v5303_v23, %v5179_v57  ;;  %v2178_v0 = vrot.slane %v5307_v9, 2  ;;  %2164 = vrot.lane.b32.xlu0 %v5307_v9, %s3236_s21  ;;  %v2196_v49 = vmul.f32 %v5307_v9, %v5257_v36  ;;  %v2923_v57 = vld [vmem:[%s3443_s10 + $0x140] sm:$0xff] }
 0x173   : > { %v5318_v11 = vadd.f32 %v1030_v3, %v5203_v13  ;;  %v5328_v41 = vadd.f32 %v1031_v43, %v5206_v34  ;;  %v5330_v12 = vmul.f32 %v2922_v37, %v2197_v19  ;;  %v2217_v13 = vadd.f32 %v2215_v53, %v5212_v20  ;;  %6556 = vst [vmem:[#allocation54_spill] sm:$0xff] %v5333_v60  ;;  %v2924_v37 = vld [vmem:[%s3443_s10 + $0x148] sm:$0xff]  ;;  %v5347_v20 = vpop.permute.xlu0 %1427 }
 0x174   : > { %v2191_v45 = vsub.f32 %v2189_v24, %v2179_v15  ;;  %v2214_v3 = vmul.f32 %v2915_v35, %v2915_v35  ;;  %v2188_v55 = vsel %vm604_vm0, %v5307_v9, %v5184_v62  ;;  %v1038_v34 = vsel %vm625_vm1, %v4887_v42, %v4878_v63  ;;  %v2928_v43 = vld [vmem:[%s3456_s9 + $0x148] sm:$0xff]  ;;  %6557 = vst [vmem:[#allocation53_spill] sm:$0xff] %v5347_v20  ;;  %v6559_v24 = vld [vmem:[#allocation65_spill] sm:$0xff] }
 0x175   : > { %6555 = vst [vmem:[#allocation86_spill] sm:$0xff] %v5330_v12  ;;  %v5349_v53 = vmul.f32 %v2197_v19, %v2197_v19  ;;  %v2190_v15 = vsub.f32 %v2188_v55, %v2178_v0  ;;  %v1039_v35 = vsel %vm625_vm1, %v4878_v63, %v4887_v42  ;;  %v1040_v56 = vsub.f32 %v6559_v24, %v1038_v34  ;;  %v2927_v62 = vld [vmem:[%s3456_s9 + $0x140] sm:$0xff]  ;;  %v6562_v19 = vld [vmem:[#allocation64_spill] sm:$0xff]  ;;  %v2950_v12 = vld [vmem:[%s3458_s6 + $0x168] sm:$0xff] }
 0x176   : > { %v5358_v60 = vmul.f32 %v2191_v45, %v2191_v45  ;;  %v5360_v61 = vmul.f32 %v2921_v18, %v2196_v49  ;;  %v5362_v52 = vmul.f32 %v2196_v49, %v2196_v49  ;;  %v1041_v20 = vsub.f32 %v6562_v19, %v1039_v35  ;;  %v2926_v45 = vld [vmem:[%s3450_s16 + $0x148] sm:$0xff] }
 0x177   : > { %6558 = vst [vmem:[#allocation36_spill] sm:$0xff] %v5349_v53  ;;  %v2216_v55 = vadd.f32 %v2214_v3, %v5217_v46  ;;  %v1042_v0 = vmul.f32 %v1040_v56, %v1040_v56  ;;  %v5366_v42 = vadd.f32 %v2928_v43, %v2924_v37  ;;  %v2291_v63 = vmul.f32 %v2924_v37, %v2924_v37  ;;  %v2930_v49 = vld [vmem:[%s3458_s6 + $0x148] sm:$0xff]  ;;  %v2929_v3 = vld [vmem:[%s3458_s6 + $0x140] sm:$0xff]  ;;  %v5392_v37 = vpop.permute.xlu1 %1441  ;;  %v5404_v19 = vpop.permute.xlu0 %1439 }
 0x178   : > { %6560 = vst [vmem:[#allocation43_spill] sm:$0xff] %v5360_v61  ;;  %6561 = vst [vmem:[#allocation88_spill] sm:$0xff] %v5362_v52  ;;  %v1043_v34 = vmul.f32 %v1041_v20, %v1041_v20  ;;  %v5368_v24 = vadd.f32 %v2927_v62, %v2923_v57  ;;  %v2290_v53 = vmul.f32 %v2923_v57, %v2923_v57  ;;  %v2925_v57 = vld [vmem:[%s3450_s16 + $0x140] sm:$0xff] }
 0x179   : > { %6563 = vst [vmem:[#allocation97_spill] sm:$0xff] %v5366_v42  ;;  %v1106_v18 = vsel %vm625_vm1, %v4925_v32, %v4913_v22  ;;  %v5376_v35 = vmul.f32 %v2190_v15, %v2190_v15  ;;  %v5379_v46 = vadd.f32 %v1042_v0, %v5270_v54  ;;  %2234 = vrot.lane.b32.xlu1 %v5366_v42, %s3236_s21  ;;  %6565 = vst [vmem:[#allocation58_spill] sm:$0xff] %v5392_v37  ;;  %v6567_v0 = vld [vmem:[#allocation68_spill] sm:$0xff] }
 0x17a   : > { %v5388_v62 = vsel %vm604_vm0, %v5366_v42, %v5233_v29  ;;  %v1045_v43 = vadd.f32 %v1043_v34, %v5287_v33  ;;  %v5396_v54 = vadd.f32 %v2291_v63, %v5272_v26  ;;  %v5400_v15 = vadd.f32 %v2290_v53, %v5289_v38  ;;  %2232 = vrot.lane.b32.xlu0 %v5368_v24, %s3236_s21  ;;  %v6568_v53 = vld [vmem:[#allocation67_spill] sm:$0xff] }
 0x17b   : > { %6564 = vst [vmem:[#allocation59_spill] sm:$0xff] %v5376_v35  ;;  %6566 = vst [vmem:[#allocation96_spill] sm:$0xff] %v5404_v19  ;;  %v1107_v33 = vsel %vm625_vm1, %v4913_v22, %v4925_v32  ;;  %v1108_v26 = vsub.f32 %v6567_v0, %v1106_v18  ;;  %v5411_v63 = vadd.f32 %v2930_v49, %v2926_v45  ;;  %v2938_v49 = vld [vmem:[%s3456_s9 + $0x158] sm:$0xff]  ;;  %v5459_v0 = vpop.permute.xlu1 %1509  ;;  %v5473_v61 = vpop.permute.xlu0 %1507 }
 0x17c   : > { %v2295_v34 = vmul.f32 %v2926_v45, %v2926_v45  ;;  %v5417_v38 = vsel %vm604_vm0, %v5368_v24, %v5257_v36  ;;  %v1109_v20 = vsub.f32 %v6568_v53, %v1107_v33  ;;  %v5420_v56 = vadd.f32 %v2929_v3, %v2925_v57  ;;  %v2934_v45 = vld [vmem:[%s3443_s10 + $0x158] sm:$0xff]  ;;  %v2937_v53 = vld [vmem:[%s3456_s9 + $0x150] sm:$0xff]  ;;  %6572 = vst [vmem:[#allocation65_spill] sm:$0xff] %v5459_v0  ;;  %v6575_v36 = vld [vmem:[#allocation70_spill] sm:$0xff] }
 0x17d   : > { %v2294_v29 = vmul.f32 %v2925_v57, %v2925_v57  ;;  %v1110_v19 = vand.u32 2147483647, %v1108_v26  ;;  %v5425_v32 = vmul.f32 %v5411_v63, %v5366_v42  ;;  %2246 = vrot.lane.b32.xlu1 %v5411_v63, %s3236_s21  ;;  %v1118_v18 = vsel %vm625_vm1, %v4964_v30, %v4960_v44  ;;  %v2933_v26 = vld [vmem:[%s3443_s10 + $0x150] sm:$0xff]  ;;  %6577 = vst [vmem:[#allocation67_spill] sm:$0xff] %v5473_v61 }
 0x17e   : > { %6569 = vst [vmem:[#allocation103_spill] sm:$0xff] %v5420_v56  ;;  %v1111_v3 = vand.u32 2147483647, %v1109_v20  ;;  %v5435_v57 = vadd.f32 %v2295_v34, %v2217_v13  ;;  %v5441_v33 = vsel %vm604_vm0, %v5411_v63, %v5303_v23  ;;  %2244 = vrot.lane.b32.xlu0 %v5420_v56, %s3236_s21  ;;  %v5451_v13 = vmul.f32 %v5420_v56, %v5368_v24 }
 0x17f   : > { %v1112_v22 = vadd.f32 %v1110_v19, %v5318_v11  ;;  %v5453_v20 = vadd.f32 %v2294_v29, %v2216_v55  ;;  %v1119_v34 = vsel %vm625_vm1, %v4960_v44, %v4964_v30  ;;  %v5465_v11 = vsel %vm604_vm0, %v5420_v56, %v5307_v9  ;;  %v6574_v19 = vld [vmem:[#allocation71_spill] sm:$0xff]  ;;  %v2936_v29 = vld [vmem:[%s3450_s16 + $0x158] sm:$0xff] }
 0x180   : > { %6570 = vst [vmem:[#allocation63_spill] sm:$0xff] %v5451_v13  ;;  %6573 = vst [vmem:[#allocation64_spill] sm:$0xff] %v5465_v11  ;;  %v1120_v23 = vsub.f32 %v6574_v19, %v1118_v18  ;;  %v1121_v37 = vsub.f32 %v6575_v36, %v1119_v34  ;;  %v5469_v52 = vadd.f32 %v2938_v49, %v2934_v45  ;;  %v2940_v55 = vld [vmem:[%s3458_s6 + $0x158] sm:$0xff]  ;;  %v2935_v18 = vld [vmem:[%s3450_s16 + $0x150] sm:$0xff] }
 0x181   : > { %6571 = vst [vmem:[#allocation60_spill] sm:$0xff] %v5453_v20  ;;  %v1113_v44 = vadd.f32 %v1111_v3, %v5328_v41  ;;  %v5476_v30 = vmul.f32 %v2934_v45, %v2934_v45  ;;  %v5478_v0 = vadd.f32 %v2937_v53, %v2933_v26  ;;  %v1186_v9 = vsel %vm625_vm1, %v5015_v50, %v5004_v14  ;;  %v2939_v36 = vld [vmem:[%s3458_s6 + $0x150] sm:$0xff]  ;;  %v6578_v53 = vld [vmem:[#allocation74_spill] sm:$0xff]  ;;  %v6579_v19 = vld [vmem:[#allocation72_spill] sm:$0xff] }
 0x182   : > { %6576 = vst [vmem:[#allocation68_spill] sm:$0xff] %v5469_v52  ;;  %v1122_v49 = vmul.f32 %v1120_v23, %v1120_v23  ;;  %v1123_v34 = vmul.f32 %v1121_v37, %v1121_v37  ;;  %2314 = vrot.lane.b32.xlu1 %v5469_v52, %s3236_s21  ;;  %v5488_v41 = vmul.f32 %v2933_v26, %v2933_v26  ;;  %v2943_v3 = vld [vmem:[%s3443_s10 + $0x160] sm:$0xff] }
 0x183   : > { %v1187_v45 = vsel %vm625_vm1, %v5004_v14, %v5015_v50  ;;  %2312 = vrot.lane.b32.xlu0 %v5478_v0, %s3236_s21  ;;  %v1188_v23 = vsub.f32 %v6578_v53, %v1186_v9  ;;  %v5499_v61 = vadd.f32 %v2940_v55, %v2936_v29  ;;  %v5503_v35 = vadd.f32 %v2939_v36, %v2935_v18  ;;  %v2944_v14 = vld [vmem:[%s3443_s10 + $0x168] sm:$0xff]  ;;  %v2947_v55 = vld [vmem:[%s3456_s9 + $0x160] sm:$0xff] }
 0x184   : > { %v1189_v37 = vsub.f32 %v6579_v19, %v1187_v45  ;;  %v1124_v26 = vadd.f32 %v1122_v49, %v5379_v46  ;;  %v1125_v11 = vadd.f32 %v1123_v34, %v1045_v43  ;;  %v2948_v50 = vld [vmem:[%s3456_s9 + $0x168] sm:$0xff]  ;;  %v5509_v9 = vmul.f32 %v2936_v29, %v2936_v29  ;;  %v5512_v45 = vpop.permute.xlu1 %1521  ;;  %v5529_v49 = vpop.permute.xlu0 %1519  ;;  %v6585_v19 = vld [vmem:[#allocation69_spill] sm:$0xff] }
 0x185   : > { %6580 = vst [vmem:[#allocation71_spill] sm:$0xff] %v5499_v61  ;;  %6581 = vst [vmem:[#allocation70_spill] sm:$0xff] %v5503_v35  ;;  %v1190_v20 = vand.u32 2147483647, %v1188_v23  ;;  %v5516_v46 = vmul.f32 %v5499_v61, %v5469_v52  ;;  %v5523_v36 = vmul.f32 %v5503_v35, %v5478_v0  ;;  %v1198_v29 = vsel %vm625_vm1, %v5066_v16, %v5053_v25  ;;  %v2946_v43 = vld [vmem:[%s3450_s16 + $0x168] sm:$0xff] }
 0x186   : > { %v1191_v13 = vand.u32 2147483647, %v1189_v37  ;;  %6582 = vst [vmem:[#allocation74_spill] sm:$0xff] %v5512_v45  ;;  %2326 = vrot.lane.b32.xlu1 %v5499_v61, %s3236_s21  ;;  %6584 = vst [vmem:[#allocation114_spill] sm:$0xff] %v5529_v49  ;;  %v1199_v23 = vsel %vm625_vm1, %v5053_v25, %v5066_v16  ;;  %v1200_v37 = vsub.f32 %v6585_v19, %v1198_v29  ;;  %v6587_v45 = vld [vmem:[#allocation75_spill] sm:$0xff]  ;;  %v2958_v19 = vld [vmem:[%s3456_s9 + $0x178] sm:$0xff] }
 0x187   : > { %6583 = vst [vmem:[#allocation72_spill] sm:$0xff] %v5523_v36  ;;  %v1192_v34 = vadd.f32 %v1190_v20, %v1112_v22  ;;  %2324 = vrot.lane.b32.xlu0 %v5503_v35, %s3236_s21  ;;  %v5540_v56 = vmul.f32 %v2935_v18, %v2935_v18  ;;  %v1201_v49 = vsub.f32 %v6587_v45, %v1199_v23  ;;  %v5548_v20 = vld [vmem:[%s3450_s16 + $0x160] sm:$0xff] }
 0x188   : > { %v1193_v53 = vadd.f32 %v1191_v13, %v1113_v44  ;;  %v5543_v22 = vadd.f32 %v2948_v50, %v2944_v14  ;;  %v5545_v13 = vadd.f32 %v2947_v55, %v2943_v3  ;;  %v2949_v44 = vld [vmem:[%s3458_s6 + $0x160] sm:$0xff]  ;;  %v1202_v35 = vmul.f32 %v1200_v37, %v1200_v37  ;;  %v6588_v50 = vld [vmem:[#allocation66_spill] sm:$0xff] }
 0x189   : > { %6586 = vst [vmem:[#allocation69_spill] sm:$0xff] %v5540_v56  ;;  %v2451_v36 = vmul.f32 %v2944_v14, %v2944_v14  ;;  %v1271_v25 = vsel %vm625_vm1, %v5120_v21, %v5113_v51  ;;  %v1272_v16 = vsel %vm625_vm1, %v5113_v51, %v5120_v21  ;;  %v1203_v18 = vmul.f32 %v1201_v49, %v1201_v49  ;;  %v6589_v45 = vld [vmem:[#allocation61_spill] sm:$0xff]  ;;  %v2954_v14 = vld [vmem:[%s3443_s10 + $0x178] sm:$0xff]  ;;  %v5574_v21 = vpop.permute.xlu1 %1589 }
 0x18a   : > { %2394 = vrot.lane.b32.xlu1 %v5543_v22, %s3236_s21  ;;  %v1273_v55 = vsub.f32 %v6588_v50, %v1271_v25  ;;  %v1274_v29 = vsub.f32 %v6589_v45, %v1272_v16  ;;  %v5563_v23 = vadd.f32 %v2950_v12, %v2946_v43  ;;  %v1204_v37 = vadd.f32 %v1202_v35, %v1124_v26  ;;  %v5580_v35 = vpop.permute.xlu0 %1587  ;;  %v6591_v26 = vld [vmem:[#allocation42_spill] sm:$0xff] }
 0x18b   : > { %v2450_v56 = vmul.f32 %v2943_v3, %v2943_v3  ;;  %2392 = vrot.lane.b32.xlu0 %v5545_v13, %s3236_s21  ;;  %v5569_v61 = vmul.f32 %v2946_v43, %v2946_v43  ;;  %v5572_v51 = vadd.f32 %v2949_v44, %v5548_v20  ;;  %v1205_v49 = vadd.f32 %v1203_v18, %v1125_v11 }
 0x18c   : > { %6590 = vst [vmem:[#allocation75_spill] sm:$0xff] %v5563_v23  ;;  %v1275_v25 = vand.u32 2147483647, %v1273_v55  ;;  %v1276_v50 = vand.u32 2147483647, %v1274_v29  ;;  %v1283_v12 = vsel %vm625_vm1, %v5181_v39, %v5173_v7  ;;  %v1284_v3 = vsel %vm625_vm1, %v5173_v7, %v5181_v39  ;;  %v6592_v55 = vld [vmem:[#allocation51_spill] sm:$0xff] }
 0x18d   : > { %v1285_v43 = vsub.f32 %v6591_v26, %v1283_v12  ;;  %v2417_v44 = vrot.slane %v5543_v22, 2  ;;  %v5588_v16 = vadd.f32 %v2958_v19, %v2954_v14  ;;  %v1286_v45 = vsub.f32 %v6592_v55, %v1284_v3 }
 0x18e   : > { %v5590_v11 = vadd.f32 %v1275_v25, %v1192_v34  ;;  %v5592_v18 = vadd.f32 %v1276_v50, %v1193_v53  ;;  %2406 = vrot.lane.b32.xlu1 %v5563_v23, %s3236_s21  ;;  %v2531_v29 = vmul.f32 %v2954_v14, %v2954_v14  ;;  %v6593_v34 = vand.u32 2147483647, %v5162_v1 }
 0x18f   : > { %2404 = vrot.lane.b32.xlu0 %v5572_v51, %s3236_s21  ;;  %v1287_v7 = vmul.f32 %v1285_v43, %v1285_v43  ;;  %v2497_v39 = vrot.slane %v5588_v16, 2  ;;  %v6594_v53 = vrot.slane %v5366_v42, 2  ;;  %v1288_v50 = vmul.f32 %v1286_v45, %v1286_v45  ;;  %v2953_v45 = vld [vmem:[%s3443_s10 + $0x170] sm:$0xff] }
 0x190   : > { %v2107_v19 = vadd.f32 %v6593_v34, %v5083_v2  ;;  %v2341_v14 = vsel %vm604_vm0, %v5469_v52, %v5366_v42  ;;  %v2373_v12 = vadd.f32 %v5476_v30, %v5396_v54  ;;  %v2421_v3 = vsel %vm604_vm0, %v5543_v22, %v5469_v52  ;;  %v2957_v34 = vld [vmem:[%s3456_s9 + $0x170] sm:$0xff] }
 0x191   : > { %v2263_v25 = vsub.f32 %v5388_v62, %v6594_v53  ;;  %v5616_v1 = vadd.f32 %v1287_v7, %v1204_v37  ;;  %v6596_v2 = vand.u32 2147483647, %v5261_v47  ;;  %v6597_v43 = vrot.slane %v5469_v52, 2  ;;  %v5624_v53 = vpop.permute.xlu1 %1601  ;;  %v5634_v37 = vpop.permute.xlu0 %1599  ;;  %v2592_v7 = vld [vmem:[#allocation11 + $0x78] sm:$0xff] }
 0x192   : > { %v5626_v42 = vadd.f32 %v1288_v50, %v1205_v49  ;;  %2474 = vrot.lane.b32.xlu1 %v5588_v16, %s3236_s21  ;;  %v2423_v54 = vsub.f32 %v2421_v3, %v2417_v44  ;;  %v2453_v30 = vadd.f32 %v2451_v36, %v2373_v12  ;;  %v2501_v47 = vsel %vm604_vm0, %v5588_v16, %v5543_v22 }
 0x193   : > { %6595 = vst [vmem:[#allocation66_spill] sm:$0xff] %v5616_v1  ;;  %v2187_v26 = vadd.f32 %v6596_v2, %v2107_v19  ;;  %v2265_v62 = vand.u32 2147483647, %v2263_v25  ;;  %v2343_v55 = vsub.f32 %v2341_v14, %v6597_v43  ;;  %6599 = vst [vmem:[#allocation42_spill] sm:$0xff] %v5634_v37  ;;  %v2503_v14 = vsub.f32 %v2501_v47, %v2497_v39  ;;  %v2591_v37 = vld [vmem:[#allocation11 + $0x70] sm:$0xff] }
 0x194   : > { %6598 = vst [vmem:[#allocation61_spill] sm:$0xff] %v5626_v42  ;;  %v2372_v49 = vadd.f32 %v5488_v41, %v5400_v15  ;;  %v2425_v50 = vand.u32 2147483647, %v2423_v54  ;;  %v2533_v2 = vadd.f32 %v2531_v29, %v2453_v30  ;;  %v2416_v43 = vrot.slane %v5545_v13, 2 }
 0x195   : > { %v2267_v19 = vadd.f32 %v2265_v62, %v2187_v26  ;;  %v2345_v25 = vand.u32 2147483647, %v2343_v55  ;;  %v5639_v44 = vadd.f32 %v2957_v34, %v2953_v45  ;;  %v2505_v12 = vand.u32 2147483647, %v2503_v14  ;;  %v5664_v47 = vpop.permute.xlu0 %1667 }
 0x196   : > { %v2452_v3 = vadd.f32 %v2450_v56, %v2372_v49  ;;  %v2530_v52 = vmul.f32 %v2953_v45, %v2953_v45  ;;  %v2594_v42 = vadd.f32 %v2592_v7, %v2533_v2  ;;  %v6600_v15 = vand.u32 2147483647, %v5175_v58  ;;  %v5658_v45 = vpop.permute.xlu1 %1669  ;;  %v2932_v2 = vld [vmem:[%s3464_s11 + $0x148] sm:$0xff] }
 0x197   : > { %v2347_v36 = vadd.f32 %v2345_v25, %v2267_v19  ;;  %v2496_v1 = vrot.slane %v5639_v44, 2  ;;  %2472 = vrot.lane.b32.xlu0 %v5639_v44, %s3236_s21  ;;  %v6601_v29 = vrot.slane %v5368_v24, 2  ;;  %v2340_v56 = vsel %vm604_vm0, %v5478_v0, %v5368_v24 }
 0x198   : > { %v2106_v41 = vadd.f32 %v6600_v15, %v5095_v5  ;;  %v2532_v62 = vadd.f32 %v2530_v52, %v2452_v3  ;;  %v2420_v55 = vsel %vm604_vm0, %v5545_v13, %v5478_v0  ;;  %v2557_v5 = vld [vmem:[#allocation11 + $0x18] sm:$0xff]  ;;  %2596 = vst [vmem:[#allocation11 + $0x78] sm:$0xff] %v2594_v42  ;;  %v6602_v58 = vand.u32 2147483647, %v5300_v28  ;;  %v6605_v3 = vld [vmem:[#allocation87_spill] sm:$0xff] }
 0x199   : > { %v2262_v39 = vsub.f32 %v5417_v38, %v6601_v29  ;;  %v2427_v26 = vadd.f32 %v2425_v50, %v2347_v36  ;;  %v6603_v52 = vrot.slane %v5478_v0, 2  ;;  %v2422_v30 = vsub.f32 %v2420_v55, %v2416_v43  ;;  %v6604_v36 = vld [vmem:[#allocation44_spill] sm:$0xff]  ;;  %v2952_v55 = vld [vmem:[%s3464_s11 + $0x168] sm:$0xff] }
 0x19a   : > { %v2186_v38 = vadd.f32 %v6602_v58, %v2106_v41  ;;  %v2593_v19 = vadd.f32 %v2591_v37, %v2532_v62  ;;  %v2500_v25 = vsel %vm604_vm0, %v5639_v44, %v5545_v13  ;;  %v1351_v28 = vsel %vm625_vm1, %v5237_v59, %v5223_v6  ;;  %v2942_v41 = vld [vmem:[%s3464_s11 + $0x158] sm:$0xff] }
 0x19b   : > { %v2264_v34 = vand.u32 2147483647, %v2262_v39  ;;  %v2342_v54 = vsub.f32 %v2340_v56, %v6603_v52  ;;  %v2507_v7 = vadd.f32 %v2505_v12, %v2427_v26  ;;  %v2424_v49 = vand.u32 2147483647, %v2422_v30  ;;  %v6606_v26 = vld [vmem:[#allocation48_spill] sm:$0xff] }
 0x19c   : > { %v2502_v50 = vsub.f32 %v2500_v25, %v2496_v1  ;;  %2595 = vst [vmem:[#allocation11 + $0x70] sm:$0xff] %v2593_v19  ;;  %v1352_v37 = vsel %vm625_vm1, %v5223_v6, %v5237_v59  ;;  %v1353_v12 = vsub.f32 %v6604_v36, %v1351_v28  ;;  %v2209_v15 = vadd.f32 %v5305_v31, %v6605_v3  ;;  %v2956_v52 = vld [vmem:[%s3450_s16 + $0x178] sm:$0xff]  ;;  %v2556_v19 = vld [vmem:[#allocation11 + $0x10] sm:$0xff] }
 0x19d   : > { %v2266_v42 = vadd.f32 %v2264_v34, %v2186_v38  ;;  %v2344_v14 = vand.u32 2147483647, %v2342_v54  ;;  %v2559_v43 = vadd.f32 %v2557_v5, %v2507_v7  ;;  %v5685_v29 = vmul.f32 %v5548_v20, %v5548_v20  ;;  %v5692_v5 = vpop.permute.xlu1 %1681  ;;  %v2960_v54 = vld [vmem:[%s3458_s6 + $0x178] sm:$0xff]  ;;  %v5700_v7 = vpop.permute.xlu0 %1679 }
 0x19e   : > { %v2504_v39 = vand.u32 2147483647, %v2502_v50  ;;  %v1354_v62 = vsub.f32 %v6606_v26, %v1352_v37  ;;  %v1355_v56 = vand.u32 2147483647, %v1353_v12  ;;  %v2279_v6 = vmul.f32 %v2932_v2, %v5425_v32  ;;  %v2962_v30 = vld [vmem:[%s3464_s11 + $0x178] sm:$0xff]  ;;  %v2585_v26 = vld [vmem:[#allocation11 + $0x68] sm:$0xff] }
 0x19f   : > { %v2346_v1 = vadd.f32 %v2344_v14, %v2266_v42  ;;  %2561 = vst [vmem:[#allocation11 + $0x18] sm:$0xff] %v2559_v43  ;;  %v2283_v59 = vmul.f32 %v5425_v32, %v5425_v32  ;;  %v2287_v31 = vmul.f32 %v2932_v2, %v2932_v2  ;;  %v5695_v38 = vmul.f32 %v2942_v41, %v5516_v46 }
 0x1a0   : > { %v1356_v20 = vand.u32 2147483647, %v1354_v62  ;;  %v2367_v34 = vmul.f32 %v2942_v41, %v2942_v41  ;;  %v5703_v25 = vadd.f32 %v1355_v56, %v5590_v11  ;;  %v2363_v28 = vmul.f32 %v5516_v46, %v5516_v46  ;;  %v2599_v41 = vld [vmem:[#allocation11 + $0x88] sm:$0xff]  ;;  %v6608_v56 = vld [vmem:[#allocation39_spill] sm:$0xff] }
 0x1a1   : > { %v2426_v58 = vadd.f32 %v2424_v49, %v2346_v1  ;;  %v2289_v32 = vadd.f32 %v2287_v31, %v2209_v15  ;;  %v2377_v42 = vadd.f32 %v5509_v9, %v5435_v57  ;;  %v2437_v50 = vmul.f32 %v5563_v23, %v5543_v22  ;;  %v5724_v1 = vpop.permute.xlu1 %1749 }
 0x1a2   : > { %v5710_v49 = vadd.f32 %v1356_v20, %v5592_v18  ;;  %v2447_v2 = vmul.f32 %v2952_v55, %v2952_v55  ;;  %v5715_v11 = vadd.f32 %v2960_v54, %v2956_v52  ;;  %v2527_v36 = vmul.f32 %v2962_v30, %v2962_v30  ;;  %v5733_v20 = vpop.permute.xlu0 %1747 }
 0x1a3   : > { %v2506_v14 = vadd.f32 %v2504_v39, %v2426_v58  ;;  %v2369_v43 = vadd.f32 %v2367_v34, %v2289_v32  ;;  %v2457_v37 = vadd.f32 %v5569_v61, %v2377_v42  ;;  %v2419_v46 = vrot.slane %v5563_v23, 2 }
 0x1a4   : > { %6607 = vst [vmem:[#allocation51_spill] sm:$0xff] %v5715_v11  ;;  %v2439_v3 = vmul.f32 %v2952_v55, %v2437_v50  ;;  %v2535_v15 = vmul.f32 %v2956_v52, %v2956_v52  ;;  %v2443_v57 = vmul.f32 %v2437_v50, %v2437_v50  ;;  %v2517_v18 = vmul.f32 %v5715_v11, %v5588_v16  ;;  %v2931_v50 = vld [vmem:[%s3464_s11 + $0x140] sm:$0xff] }
 0x1a5   : > { %v2558_v12 = vadd.f32 %v2556_v19, %v2506_v14  ;;  %v2449_v9 = vadd.f32 %v2447_v2, %v2369_v43  ;;  %2486 = vrot.lane.b32.xlu1 %v5715_v11, %s3236_s21  ;;  %v2115_v61 = vadd.f32 %v5241_v4, %v5123_v17  ;;  %v2121_v62 = vadd.f32 %v5209_v40, %v5098_v27  ;;  %v6610_v19 = vld [vmem:[#allocation86_spill] sm:$0xff]  ;;  %v6611_v27 = vld [vmem:[#allocation36_spill] sm:$0xff]  ;;  %v6612_v14 = vld [vmem:[#allocation71_spill] sm:$0xff] }
 0x1a6   : > { %v2537_v39 = vadd.f32 %v2535_v15, %v2457_v37  ;;  %v2125_v31 = vadd.f32 %v6608_v56, %v5116_v48  ;;  %v6609_v55 = vrot.slane %v5411_v63, 2  ;;  %v2499_v4 = vrot.slane %v5715_v11, 2  ;;  %v5757_v56 = vpop.permute.xlu1 %1761 }
 0x1a7   : > { %2560 = vst [vmem:[#allocation11 + $0x10] sm:$0xff] %v2558_v12  ;;  %v2519_v17 = vmul.f32 %v2962_v30, %v2517_v18  ;;  %v2529_v34 = vadd.f32 %v2527_v36, %v2449_v9  ;;  %v2195_v52 = vadd.f32 %v5358_v60, %v2115_v61  ;;  %v2201_v32 = vadd.f32 %v6610_v19, %v2121_v62  ;;  %v6614_v61 = vld [vmem:[#allocation111_spill] sm:$0xff] }
 0x1a8   : > { %v2271_v58 = vsub.f32 %v5441_v33, %v6609_v55  ;;  %v2601_v54 = vadd.f32 %v2599_v41, %v2537_v39  ;;  %v2205_v40 = vadd.f32 %v6611_v27, %v2125_v31  ;;  %v2349_v33 = vsel %vm604_vm0, %v6612_v14, %v5411_v63  ;;  %v6615_v39 = vld [vmem:[#allocation113_spill] sm:$0xff]  ;;  %v2941_v62 = vld [vmem:[%s3464_s11 + $0x150] sm:$0xff]  ;;  %v6617_v27 = vld [vmem:[#allocation72_spill] sm:$0xff] }
 0x1a9   : > { %v2587_v48 = vadd.f32 %v2585_v26, %v2529_v34  ;;  %v2429_v30 = vsel %vm604_vm0, %v5563_v23, %v6612_v14  ;;  %v2509_v60 = vsel %vm604_vm0, %v5715_v11, %v5563_v23  ;;  %v2281_v43 = vadd.f32 %v2279_v6, %v2201_v32  ;;  %v6616_v55 = vld [vmem:[#allocation63_spill] sm:$0xff]  ;;  %v6632_v23 = vld [vmem:[#allocation70_spill] sm:$0xff] }
 0x1aa   : > { %v2273_v42 = vmul.f32 %v2271_v58, %v2271_v58  ;;  %2603 = vst [vmem:[#allocation11 + $0x88] sm:$0xff] %v2601_v54  ;;  %v2285_v37 = vadd.f32 %v2283_v59, %v2205_v40  ;;  %v6613_v36 = vrot.slane %v6612_v14, 2  ;;  %v2523_v15 = vmul.f32 %v2517_v18, %v2517_v18  ;;  %v5763_v18 = vpop.permute.xlu0 %1759 }
 0x1ab   : > { %2589 = vst [vmem:[#allocation11 + $0x68] sm:$0xff] %v2587_v48  ;;  %v2431_v9 = vsub.f32 %v2429_v30, %v2419_v46  ;;  %v2511_v41 = vsub.f32 %v2509_v60, %v2499_v4  ;;  %v2208_v26 = vadd.f32 %v6615_v39, %v6614_v61  ;;  %v2361_v6 = vadd.f32 %v5695_v38, %v2281_v43  ;;  %v2951_v38 = vld [vmem:[%s3464_s11 + $0x160] sm:$0xff]  ;;  %v2571_v48 = vld [vmem:[#allocation11 + $0x48] sm:$0xff] }
 0x1ac   : > { %v2275_v2 = vadd.f32 %v2273_v42, %v2195_v52  ;;  %v2351_v12 = vsub.f32 %v2349_v33, %v6613_v36  ;;  %v2365_v59 = vadd.f32 %v2363_v28, %v2285_v37  ;;  %v5761_v58 = vmul.f32 %v2931_v50, %v6616_v55  ;;  %v2955_v28 = vld [vmem:[%s3450_s16 + $0x170] sm:$0xff]  ;;  %v2578_v33 = vld [vmem:[#allocation11 + $0x58] sm:$0xff]  ;;  %v6619_v36 = vld [vmem:[#allocation69_spill] sm:$0xff] }
 0x1ad   : > { %v2433_v46 = vmul.f32 %v2431_v9, %v2431_v9  ;;  %v2513_v4 = vmul.f32 %v2511_v41, %v2511_v41  ;;  %v5767_v34 = vmul.f32 %v6616_v55, %v6616_v55  ;;  %v2286_v52 = vmul.f32 %v2931_v50, %v2931_v50  ;;  %v2959_v42 = vld [vmem:[%s3458_s6 + $0x170] sm:$0xff]  ;;  %v6618_v37 = vld [vmem:[#allocation60_spill] sm:$0xff] }
 0x1ae   : > { %v2353_v31 = vmul.f32 %v2351_v12, %v2351_v12  ;;  %v2441_v19 = vadd.f32 %v2439_v3, %v2361_v6  ;;  %v2445_v32 = vadd.f32 %v2443_v57, %v2365_v59  ;;  %v5770_v40 = vmul.f32 %v2941_v62, %v6617_v27  ;;  %v2564_v9 = vld [vmem:[#allocation11 + $0x38] sm:$0xff]  ;;  %v5785_v6 = vpop.permute.xlu1 %1829 }
 0x1af   : > { %v2288_v30 = vadd.f32 %v2286_v52, %v2208_v26  ;;  %v2362_v60 = vmul.f32 %v6617_v27, %v6617_v27  ;;  %v2366_v43 = vmul.f32 %v2941_v62, %v2941_v62  ;;  %v2376_v50 = vadd.f32 %v6619_v36, %v6618_v37  ;;  %v2961_v26 = vld [vmem:[%s3464_s11 + $0x170] sm:$0xff]  ;;  %v6622_v37 = vld [vmem:[#allocation90_spill] sm:$0xff]  ;;  %v6623_v36 = vld [vmem:[#allocation45_spill] sm:$0xff] }
 0x1b0   : > { %v2355_v54 = vadd.f32 %v2353_v31, %v2275_v2  ;;  %v2521_v3 = vadd.f32 %v2519_v17, %v2441_v19  ;;  %v2525_v57 = vadd.f32 %v2523_v15, %v2445_v32  ;;  %v2436_v12 = vmul.f32 %v5572_v51, %v5545_v13  ;;  %v5788_v17 = vpop.permute.xlu0 %1827 }
 0x1b1   : > { %v2368_v41 = vadd.f32 %v2366_v43, %v2288_v30  ;;  %v2418_v61 = vrot.slane %v5572_v51, 2  ;;  %v2446_v39 = vmul.f32 %v2951_v38, %v2951_v38  ;;  %v5782_v31 = vadd.f32 %v2959_v42, %v2955_v28  ;;  %v6620_v42 = vld [vmem:[#allocation38_spill] sm:$0xff]  ;;  %v2598_v43 = vld [vmem:[#allocation11 + $0x80] sm:$0xff] }
 0x1b2   : > { %v2435_v2 = vadd.f32 %v2433_v46, %v2355_v54  ;;  %v2573_v59 = vadd.f32 %v2571_v48, %v2521_v3  ;;  %v2580_v55 = vadd.f32 %v2578_v33, %v2525_v57  ;;  %v2456_v46 = vadd.f32 %v5685_v29, %v2376_v50  ;;  %v6621_v48 = vld [vmem:[#allocation46_spill] sm:$0xff]  ;;  %v6625_v3 = vld [vmem:[#allocation41_spill] sm:$0xff] }
 0x1b3   : > { %v2438_v15 = vmul.f32 %v2951_v38, %v2436_v12  ;;  %v2442_v52 = vmul.f32 %v2436_v12, %v2436_v12  ;;  %v2448_v54 = vadd.f32 %v2446_v39, %v2368_v41  ;;  %v2516_v19 = vmul.f32 %v5782_v31, %v5639_v44  ;;  %2484 = vrot.lane.b32.xlu0 %v5782_v31, %s3236_s21  ;;  %v2584_v38 = vld [vmem:[#allocation11 + $0x60] sm:$0xff]  ;;  %v6626_v41 = vld [vmem:[#allocation59_spill] sm:$0xff] }
 0x1b4   : > { %v2515_v62 = vadd.f32 %v2513_v4, %v2435_v2  ;;  %2575 = vst [vmem:[#allocation11 + $0x48] sm:$0xff] %v2573_v59  ;;  %2582 = vst [vmem:[#allocation11 + $0x58] sm:$0xff] %v2580_v55  ;;  %v2526_v27 = vmul.f32 %v2961_v26, %v2961_v26  ;;  %v2534_v4 = vmul.f32 %v2955_v28, %v2955_v28  ;;  %v2498_v29 = vrot.slane %v5782_v31, 2  ;;  %v6624_v2 = vld [vmem:[#allocation105_spill] sm:$0xff]  ;;  %v6627_v28 = vld [vmem:[#allocation103_spill] sm:$0xff] }
 0x1b5   : > { %v2114_v33 = vadd.f32 %v6621_v48, %v6620_v42  ;;  %v2518_v30 = vmul.f32 %v2961_v26, %v2516_v19  ;;  %v2120_v50 = vadd.f32 %v6623_v36, %v6622_v37  ;;  %v2124_v57 = vadd.f32 %v6625_v3, %v6624_v2  ;;  %v6629_v59 = vld [vmem:[#allocation64_spill] sm:$0xff]  ;;  %v6630_v42 = vld [vmem:[#allocation43_spill] sm:$0xff] }
 0x1b6   : > { %v2566_v32 = vadd.f32 %v2564_v9, %v2515_v62  ;;  %v2528_v12 = vadd.f32 %v2526_v27, %v2448_v54  ;;  %v2536_v9 = vadd.f32 %v2534_v4, %v2456_v46  ;;  %v6628_v62 = vrot.slane %v6627_v28, 2  ;;  %v6631_v26 = vld [vmem:[#allocation88_spill] sm:$0xff]  ;;  %v5815_v54 = vpop.permute.xlu1 %1841 }
 0x1b7   : > { %v2194_v39 = vadd.f32 %v6626_v41, %v2114_v33  ;;  %v2200_v48 = vadd.f32 %v6630_v42, %v2120_v50  ;;  %v2204_v11 = vadd.f32 %v6631_v26, %v2124_v57  ;;  %v2348_v37 = vsel %vm604_vm0, %v6632_v23, %v6627_v28  ;;  %v5819_v50 = vpop.permute.xlu0 %1839  ;;  %v6634_v42 = vld [vmem:[#allocation34_spill] sm:$0xff] }
 0x1b8   : > { %2568 = vst [vmem:[#allocation11 + $0x38] sm:$0xff] %v2566_v32  ;;  %v2270_v55 = vsub.f32 %v6629_v59, %v6628_v62  ;;  %v2428_v46 = vsel %vm604_vm0, %v5572_v51, %v6632_v23  ;;  %v2586_v32 = vadd.f32 %v2584_v38, %v2528_v12  ;;  %v2600_v27 = vadd.f32 %v2598_v43, %v2536_v9  ;;  %v6636_v26 = vld [vmem:[#allocation54_spill] sm:$0xff] }
 0x1b9   : > { %v6633_v33 = vrot.slane %v6632_v23, 2  ;;  %v2280_v2 = vadd.f32 %v5761_v58, %v2200_v48  ;;  %v2284_v3 = vadd.f32 %v5767_v34, %v2204_v11  ;;  %v2430_v57 = vsub.f32 %v2428_v46, %v2418_v61  ;;  %v6635_v58 = vld [vmem:[#allocation35_spill] sm:$0xff] }
 0x1ba   : > { %v2272_v4 = vmul.f32 %v2270_v55, %v2270_v55  ;;  %v2508_v41 = vsel %vm604_vm0, %v5782_v31, %v5572_v51  ;;  %v2522_v62 = vmul.f32 %v2516_v19, %v2516_v19  ;;  %2588 = vst [vmem:[#allocation11 + $0x60] sm:$0xff] %v2586_v32  ;;  %2602 = vst [vmem:[#allocation11 + $0x80] sm:$0xff] %v2600_v27  ;;  %v6637_v19 = vld [vmem:[#allocation53_spill] sm:$0xff]  ;;  %v6639_v27 = vld [vmem:[#allocation56_spill] sm:$0xff] }
 0x1bb   : > { %v2350_v36 = vsub.f32 %v2348_v37, %v6633_v33  ;;  %v2510_v12 = vsub.f32 %v2508_v41, %v2498_v29  ;;  %v2360_v9 = vadd.f32 %v5770_v40, %v2280_v2  ;;  %v2364_v59 = vadd.f32 %v2362_v60, %v2284_v3  ;;  %v5840_v60 = vpop.permute.xlu1 %1914  ;;  %v2570_v29 = vld [vmem:[#allocation11 + $0x40] sm:$0xff]  ;;  %v2577_v37 = vld [vmem:[#allocation11 + $0x50] sm:$0xff]  ;;  %v5848_v33 = vpop.permute.xlu0 %1912 }
 0x1bc   : > { %v2274_v38 = vadd.f32 %v2272_v4, %v2194_v39  ;;  %v2432_v55 = vmul.f32 %v2430_v57, %v2430_v57  ;;  %v1363_v11 = vsel %vm625_vm1, %v6635_v58, %v6634_v42  ;;  %v1431_v39 = vsel %vm625_vm1, %v6637_v19, %v6636_v26  ;;  %v6640_v57 = vld [vmem:[#allocation57_spill] sm:$0xff] }
 0x1bd   : > { %v2352_v43 = vmul.f32 %v2350_v36, %v2350_v36  ;;  %v2512_v61 = vmul.f32 %v2510_v12, %v2510_v12  ;;  %v2440_v48 = vadd.f32 %v2438_v15, %v2360_v9  ;;  %v2444_v10 = vadd.f32 %v2442_v52, %v2364_v59  ;;  %v6638_v52 = vld [vmem:[#allocation62_spill] sm:$0xff]  ;;  %v2563_v36 = vld [vmem:[#allocation11 + $0x30] sm:$0xff]  ;;  %v6641_v9 = vld [vmem:[#allocation49_spill] sm:$0xff] }
 0x1be   : > { %v1432_v40 = vsel %vm625_vm1, %v6636_v26, %v6637_v19  ;;  %v1364_v15 = vsel %vm625_vm1, %v6634_v42, %v6635_v58  ;;  %v1365_v32 = vsub.f32 %v6638_v52, %v1363_v11  ;;  %v1433_v4 = vsub.f32 %v6639_v27, %v1431_v39  ;;  %v6650_v27 = vld [vmem:[#allocation114_spill] sm:$0xff] }
 0x1bf   : > { %v2354_v34 = vadd.f32 %v2352_v43, %v2274_v38  ;;  %v2520_v2 = vadd.f32 %v2518_v30, %v2440_v48  ;;  %v2524_v3 = vadd.f32 %v2522_v62, %v2444_v10  ;;  %v1434_v41 = vsub.f32 %v6640_v57, %v1432_v40  ;;  %v6644_v62 = vld [vmem:[#allocation65_spill] sm:$0xff]  ;;  %v5868_v39 = vpop.permute.xlu1 %1926 }
 0x1c0   : > { %v1366_v59 = vsub.f32 %v6641_v9, %v1364_v15  ;;  %v1367_v11 = vmul.f32 %v1365_v32, %v1365_v32  ;;  %v1435_v26 = vand.u32 2147483647, %v1433_v4  ;;  %v6646_v40 = vld [vmem:[#allocation77_spill] sm:$0xff]  ;;  %v6648_v15 = vld [vmem:[#allocation79_spill] sm:$0xff]  ;;  %v6649_v32 = vld [vmem:[#allocation74_spill] sm:$0xff]  ;;  %v1591_v57 = vsel %vm625_vm1, %v5580_v35, %v5574_v21 }
 0x1c1   : > { %v2434_v46 = vadd.f32 %v2432_v55, %v2354_v34  ;;  %v2572_v43 = vadd.f32 %v2570_v29, %v2520_v2  ;;  %v2579_v12 = vadd.f32 %v2577_v37, %v2524_v3  ;;  %v6642_v55 = vld [vmem:[#allocation58_spill] sm:$0xff]  ;;  %v6643_v34 = vld [vmem:[#allocation96_spill] sm:$0xff]  ;;  %v1436_v19 = vand.u32 2147483647, %v1434_v41  ;;  %v6647_v37 = vld [vmem:[#allocation81_spill] sm:$0xff] }
 0x1c2   : > { %v1443_v42 = vsel %vm625_vm1, %v6643_v34, %v6642_v55  ;;  %v1444_v30 = vsel %vm625_vm1, %v6642_v55, %v6643_v34  ;;  %v1523_v4 = vsel %vm625_vm1, %v6650_v27, %v6649_v32  ;;  %v1368_v2 = vmul.f32 %v1366_v59, %v1366_v59  ;;  %v6652_v34 = vld [vmem:[#allocation85_spill] sm:$0xff] }
 0x1c3   : > { %v2514_v38 = vadd.f32 %v2512_v61, %v2434_v46  ;;  %2574 = vst [vmem:[#allocation11 + $0x40] sm:$0xff] %v2572_v43  ;;  %2581 = vst [vmem:[#allocation11 + $0x50] sm:$0xff] %v2579_v12  ;;  %v6645_v61 = vld [vmem:[#allocation67_spill] sm:$0xff]  ;;  %v1445_v29 = vsub.f32 %v6646_v40, %v1443_v42  ;;  %v1524_v3 = vsel %vm625_vm1, %v6649_v32, %v6650_v27  ;;  %v6651_v43 = vld [vmem:[#allocation73_spill] sm:$0xff] }
 0x1c4   : > { %v1511_v48 = vsel %vm625_vm1, %v6645_v61, %v6644_v62  ;;  %v1512_v10 = vsel %vm625_vm1, %v6644_v62, %v6645_v61  ;;  %v1592_v41 = vsel %vm625_vm1, %v5574_v21, %v5580_v35  ;;  %v1446_v12 = vsub.f32 %v6651_v43, %v1444_v30  ;;  %v6654_v61 = vld [vmem:[#allocation89_spill] sm:$0xff]  ;;  %v6655_v40 = vld [vmem:[#allocation84_spill] sm:$0xff]  ;;  %v5906_v30 = vpop.permute.xlu1 %1994 }
 0x1c5   : > { %v2565_v58 = vadd.f32 %v2563_v36, %v2514_v38  ;;  %v1513_v46 = vsub.f32 %v6647_v37, %v1511_v48  ;;  %v1514_v52 = vsub.f32 %v6648_v15, %v1512_v10  ;;  %v5877_v36 = vpop.permute.xlu0 %1924  ;;  %v1437_v38 = vadd.f32 %v1435_v26, %v5703_v25  ;;  %v6656_v15 = vld [vmem:[#allocation42_spill] sm:$0xff]  ;;  %v6658_v32 = vld [vmem:[#allocation93_spill] sm:$0xff] }
 0x1c6   : > { %v1438_v55 = vadd.f32 %v1436_v19, %v5710_v49  ;;  %v1525_v42 = vsub.f32 %v6652_v34, %v1523_v4  ;;  %v1594_v48 = vsub.f32 %v6654_v61, %v1592_v41  ;;  %v1447_v10 = vmul.f32 %v1445_v29, %v1445_v29  ;;  %v6657_v29 = vld [vmem:[#allocation95_spill] sm:$0xff] }
 0x1c7   : > { %2567 = vst [vmem:[#allocation11 + $0x30] sm:$0xff] %v2565_v58  ;;  %v1515_v9 = vand.u32 2147483647, %v1513_v46  ;;  %v1516_v59 = vand.u32 2147483647, %v1514_v52  ;;  %v6653_v58 = vld [vmem:[#allocation92_spill] sm:$0xff]  ;;  %v1526_v37 = vsub.f32 %v6655_v40, %v1524_v3  ;;  %v1603_v21 = vsel %vm625_vm1, %v6656_v15, %v5624_v53 }
 0x1c8   : > { %v1593_v62 = vsub.f32 %v6653_v58, %v1591_v57  ;;  %v1604_v35 = vsel %vm625_vm1, %v5624_v53, %v6656_v15  ;;  %v1596_v19 = vand.u32 2147483647, %v1594_v48  ;;  %v1448_v46 = vmul.f32 %v1446_v12, %v1446_v12  ;;  %v6659_v3 = vld [vmem:[#allocation66_spill] sm:$0xff]  ;;  %v6660_v53 = vld [vmem:[#allocation61_spill] sm:$0xff]  ;;  %v5928_v15 = vpop.permute.xlu1 %2006 }
 0x1c9   : > { %v1517_v25 = vadd.f32 %v1515_v9, %v1437_v38  ;;  %v1518_v49 = vadd.f32 %v1516_v59, %v1438_v55  ;;  %v1605_v52 = vsub.f32 %v6657_v29, %v1603_v21  ;;  %v1606_v27 = vsub.f32 %v6658_v32, %v1604_v35  ;;  %v5910_v4 = vpop.permute.xlu0 %1992  ;;  %v6662_v48 = vld [vmem:[#allocation101_spill] sm:$0xff] }
 0x1ca   : > { %v1595_v26 = vand.u32 2147483647, %v1593_v62  ;;  %v1369_v57 = vadd.f32 %v1367_v11, %v6659_v3  ;;  %v1527_v41 = vmul.f32 %v1525_v42, %v1525_v42  ;;  %v1370_v38 = vadd.f32 %v1368_v2, %v6660_v53  ;;  %v6661_v42 = vld [vmem:[#allocation102_spill] sm:$0xff] }
 0x1cb   : > { %v5915_v34 = vadd.f32 %v1596_v19, %v1518_v49  ;;  %v1528_v9 = vmul.f32 %v1526_v37, %v1526_v37  ;;  %v1683_v12 = vsel %vm625_vm1, %v5700_v7, %v5692_v5  ;;  %v1607_v55 = vmul.f32 %v1605_v52, %v1605_v52  ;;  %v6663_v49 = vld [vmem:[#allocation110_spill] sm:$0xff] }
 0x1cc   : > { %v5913_v43 = vadd.f32 %v1595_v26, %v1517_v25  ;;  %v1449_v59 = vadd.f32 %v1447_v10, %v1369_v57  ;;  %v1684_v11 = vsel %vm625_vm1, %v5692_v5, %v5700_v7  ;;  %v1685_v58 = vsub.f32 %v6661_v42, %v1683_v12  ;;  %v6666_v12 = vld [vmem:[#allocation32_spill] sm:$0xff] }
 0x1cd   : > { %v1450_v62 = vadd.f32 %v1448_v46, %v1370_v38  ;;  %v1608_v61 = vmul.f32 %v1606_v27, %v1606_v27  ;;  %v1686_v40 = vsub.f32 %v6662_v48, %v1684_v11  ;;  %v1763_v10 = vsel %vm625_vm1, %v5763_v18, %v5757_v56  ;;  %v5934_v25 = vpop.permute.xlu0 %2004  ;;  %v6664_v46 = vld [vmem:[#allocation109_spill] sm:$0xff] }
 0x1ce   : > { %v1529_v2 = vadd.f32 %v1527_v41, %v1449_v59  ;;  %v1687_v37 = vmul.f32 %v1685_v58, %v1685_v58  ;;  %v1764_v7 = vsel %vm625_vm1, %v5757_v56, %v5763_v18  ;;  %v1765_v26 = vsub.f32 %v6663_v49, %v1763_v10  ;;  %v6665_v18 = vld [vmem:[#allocation106_spill] sm:$0xff] }
 0x1cf   : > { %v1530_v21 = vadd.f32 %v1528_v9, %v1450_v62  ;;  %v1688_v35 = vmul.f32 %v1686_v40, %v1686_v40  ;;  %v1766_v29 = vsub.f32 %v6664_v46, %v1764_v7  ;;  %v1843_v57 = vsel %vm625_vm1, %v5819_v50, %v5815_v54  ;;  %v6668_v40 = vld [vmem:[#allocation55_spill] sm:$0xff] }
 0x1d0   : > { %v1609_v5 = vadd.f32 %v1607_v55, %v1529_v2  ;;  %v1767_v32 = vmul.f32 %v1765_v26, %v1765_v26  ;;  %v1844_v56 = vsel %vm625_vm1, %v5815_v54, %v5819_v50  ;;  %v1845_v53 = vsub.f32 %v6665_v18, %v1843_v57  ;;  %v6667_v50 = vld [vmem:[#allocation80_spill] sm:$0xff] }
 0x1d1   : > { %v1610_v19 = vadd.f32 %v1608_v61, %v1530_v21  ;;  %v1768_v3 = vmul.f32 %v1766_v29, %v1766_v29  ;;  %v2075_v38 = vpop.permute.xlu1 %2074  ;;  %v1846_v59 = vsub.f32 %v6666_v12, %v1844_v56  ;;  %v1928_v58 = vsel %vm625_vm1, %v5877_v36, %v5868_v39 }
 0x1d2   : > { %v1689_v52 = vadd.f32 %v1687_v37, %v1609_v5  ;;  %v2073_v55 = vpop.permute.xlu0 %2072  ;;  %v1847_v11 = vmul.f32 %v1845_v53, %v1845_v53  ;;  %v1929_v54 = vsel %vm625_vm1, %v5868_v39, %v5877_v36  ;;  %v1930_v61 = vsub.f32 %v6667_v50, %v1928_v58  ;;  %v6674_v50 = vld [vmem:[#allocation112_spill] sm:$0xff] }
 0x1d3   : > { %v1690_v27 = vadd.f32 %v1688_v35, %v1610_v19  ;;  %v1848_v42 = vmul.f32 %v1846_v59, %v1846_v59  ;;  %v1931_v2 = vsub.f32 %v6668_v40, %v1929_v54  ;;  %v1671_v46 = vsel %vm625_vm1, %v5664_v47, %v5658_v45 }
 0x1d4   : > { %v1769_v41 = vadd.f32 %v1767_v32, %v1689_v52  ;;  %v1932_v37 = vmul.f32 %v1930_v61, %v1930_v61  ;;  %v1672_v29 = vsel %vm625_vm1, %v5658_v45, %v5664_v47  ;;  %v1751_v32 = vsel %vm625_vm1, %v5733_v20, %v5724_v1  ;;  %v6671_v45 = vld [vmem:[#allocation107_spill] sm:$0xff] }
 0x1d5   : > { %v1770_v9 = vadd.f32 %v1768_v3, %v1690_v27  ;;  %v1933_v35 = vmul.f32 %v1931_v2, %v1931_v2  ;;  %v1752_v27 = vsel %vm625_vm1, %v5724_v1, %v5733_v20  ;;  %v6669_v3 = vld [vmem:[#allocation100_spill] sm:$0xff]  ;;  %v1753_v47 = vsub.f32 %v6671_v45, %v1751_v32  ;;  %v6677_v45 = vld [vmem:[#allocation82_spill] sm:$0xff] }
 0x1d6   : > { %v1849_v62 = vadd.f32 %v1847_v11, %v1769_v41  ;;  %v5962_v21 = vpop.permute.xlu1 %2086  ;;  %v1673_v57 = vsub.f32 %v6669_v3, %v1671_v46  ;;  %v6670_v41 = vld [vmem:[#allocation99_spill] sm:$0xff]  ;;  %v1831_v59 = vsel %vm625_vm1, %v5788_v17, %v5785_v6  ;;  %v1832_v1 = vsel %vm625_vm1, %v5785_v6, %v5788_v17 }
 0x1d7   : > { %v1850_v48 = vadd.f32 %v1848_v42, %v1770_v9  ;;  %v5964_v10 = vpop.permute.xlu0 %2084  ;;  %v1674_v56 = vsub.f32 %v6670_v41, %v1672_v29  ;;  %v6672_v9 = vld [vmem:[#allocation104_spill] sm:$0xff]  ;;  %v1916_v42 = vsel %vm625_vm1, %v5848_v33, %v5840_v60  ;;  %v1917_v58 = vsel %vm625_vm1, %v5840_v60, %v5848_v33  ;;  %v6675_v17 = vld [vmem:[#allocation83_spill] sm:$0xff] }
 0x1d8   : > { %v5966_v5 = vadd.f32 %v1932_v37, %v1849_v62  ;;  %v1754_v12 = vsub.f32 %v6672_v9, %v1752_v27  ;;  %v1675_v20 = vand.u32 2147483647, %v1673_v57  ;;  %v6673_v62 = vld [vmem:[#allocation33_spill] sm:$0xff]  ;;  %v1834_v61 = vsub.f32 %v6674_v50, %v1832_v1  ;;  %v6678_v9 = vld [vmem:[#allocation76_spill] sm:$0xff] }
 0x1d9   : > { %v5968_v7 = vadd.f32 %v1933_v35, %v1850_v48  ;;  %v1676_v11 = vand.u32 2147483647, %v1674_v56  ;;  %v1833_v54 = vsub.f32 %v6673_v62, %v1831_v59  ;;  %v1755_v40 = vand.u32 2147483647, %v1753_v47  ;;  %v6676_v35 = vld [vmem:[#allocation78_spill] sm:$0xff]  ;;  %v6679_v1 = vld [vmem:[#allocation108_spill] sm:$0xff] }
 0x1da   : > { %v1756_v2 = vand.u32 2147483647, %v1754_v12  ;;  %v1918_v37 = vsub.f32 %v6675_v17, %v1916_v42  ;;  %v1919_v46 = vsub.f32 %v6676_v35, %v1917_v58  ;;  %v1996_v29 = vsel %vm625_vm1, %v5910_v4, %v5906_v30 }
 0x1db   : > { %v1997_v60 = vsel %vm625_vm1, %v5906_v30, %v5910_v4  ;;  %v1677_v33 = vadd.f32 %v1675_v20, %v5913_v43  ;;  %v1678_v32 = vadd.f32 %v1676_v11, %v5915_v34  ;;  %v1835_v27 = vand.u32 2147483647, %v1833_v54  ;;  %v6680_v11 = vld [vmem:[#allocation91_spill] sm:$0xff] }
 0x1dc   : > { %v2155_v49 = vpop.permute.xlu1 %2154  ;;  %v1836_v3 = vand.u32 2147483647, %v1834_v61  ;;  %v2076_v57 = vsel %vm625_vm1, %v2073_v55, %v2075_v38  ;;  %v2077_v41 = vsel %vm625_vm1, %v2075_v38, %v2073_v55  ;;  %v1998_v47 = vsub.f32 %v6677_v45, %v1996_v29 }
 0x1dd   : > { %v1999_v12 = vsub.f32 %v6678_v9, %v1997_v60  ;;  %v1757_v30 = vadd.f32 %v1755_v40, %v1677_v33  ;;  %v1758_v4 = vadd.f32 %v1756_v2, %v1678_v32  ;;  %v1920_v43 = vand.u32 2147483647, %v1918_v37  ;;  %v6682_v60 = vld [vmem:[#allocation40_spill] sm:$0xff] }
 0x1de   : > { %v1921_v34 = vand.u32 2147483647, %v1919_v46  ;;  %v2078_v20 = vsub.f32 %v6679_v1, %v2076_v57  ;;  %v2079_v42 = vsub.f32 %v6680_v11, %v2077_v41  ;;  %v2000_v50 = vand.u32 2147483647, %v1998_v47  ;;  %v6681_v46 = vld [vmem:[#allocation47_spill] sm:$0xff]  ;;  %v6683_v57 = vld [vmem:[#allocation97_spill] sm:$0xff] }
 0x1df   : > { %v2153_v26 = vpop.permute.xlu0 %2152  ;;  %v1837_v55 = vadd.f32 %v1835_v27, %v1757_v30  ;;  %v1838_v62 = vadd.f32 %v1836_v3, %v1758_v4  ;;  %v2001_v61 = vand.u32 2147483647, %v1999_v12 }
 0x1e0   : > { %v2156_v58 = vsel %vm625_vm1, %v2153_v26, %v2155_v49  ;;  %v2157_v38 = vsel %vm625_vm1, %v2155_v49, %v2153_v26  ;;  %v2080_v32 = vand.u32 2147483647, %v2078_v20  ;;  %v2081_v49 = vand.u32 2147483647, %v2079_v42 }
 0x1e1   : > { %v1922_v37 = vadd.f32 %v1920_v43, %v1837_v55  ;;  %v1923_v35 = vadd.f32 %v1921_v34, %v1838_v62  ;;  %v2158_v29 = vsub.f32 %v6681_v46, %v2156_v58  ;;  %v2159_v33 = vsub.f32 %v6682_v60, %v2157_v38  ;;  %v6684_v43 = vld [vmem:[#allocation68_spill] sm:$0xff] }
 0x1e3   : > { %v5970_v19 = vpop.permute.xlu1 %2166  ;;  %v2003_v45 = vadd.f32 %v2001_v61, %v1923_v35  ;;  %v2160_v12 = vand.u32 2147483647, %v2158_v29  ;;  %v2161_v30 = vand.u32 2147483647, %v2159_v33 }
 0x1e4   : > { %v5972_v39 = vpop.permute.xlu0 %2164 }
 0x1e5   : > { %v2083_v34 = vadd.f32 %v2081_v49, %v2003_v45 }
 0x1e7   : > { %v2163_v38 = vadd.f32 %v2161_v30, %v2083_v34  ;;  %v2168_v34 = vsel %vm625_vm1, %v5972_v39, %v5970_v19 }
 0x1eb   : > { %v2235_v36 = vpop.permute.xlu1 %2234 }
 0x1ec   : > { %v2233_v52 = vpop.permute.xlu0 %2232 }
 0x1ed   : > { %v2236_v40 = vsel %vm625_vm1, %v2233_v52, %v2235_v36  ;;  %v2237_v2 = vsel %vm625_vm1, %v2235_v36, %v2233_v52  ;;  %v2002_v52 = vadd.f32 %v2000_v50, %v1922_v37 }
 0x1ee   : > { %v2238_v3 = vsub.f32 %v5368_v24, %v2236_v40  ;;  %v2239_v41 = vsub.f32 %v6683_v57, %v2237_v2 }
 0x1ef   : > { %v5992_v18 = vpop.permute.xlu1 %2246  ;;  %v2082_v24 = vadd.f32 %v2080_v32, %v2002_v52 }
 0x1f0   : > { %v5994_v53 = vpop.permute.xlu0 %2244  ;;  %v2240_v1 = vand.u32 2147483647, %v2238_v3  ;;  %v2241_v20 = vand.u32 2147483647, %v2239_v41 }
 0x1f1   : > { %v2162_v58 = vadd.f32 %v2160_v12, %v2082_v24  ;;  %v6685_v12 = vld [vmem:[#allocation94_spill] sm:$0xff] }
 0x1f2   : > { %v2243_v61 = vadd.f32 %v2241_v20, %v2163_v38  ;;  %v2248_v20 = vsel %vm625_vm1, %v5994_v53, %v5992_v18  ;;  %v6690_v38 = vld [vmem:[#allocation52_spill] sm:$0xff] }
 0x1f3   : > { %v2242_v50 = vadd.f32 %v2240_v1, %v2162_v58  ;;  %v2169_v1 = vsel %vm625_vm1, %v5970_v19, %v5972_v39 }
 0x1f4   : > { %v2315_v48 = vpop.permute.xlu1 %2314 }
 0x1f5   : > { %v2313_v6 = vpop.permute.xlu0 %2312 }
 0x1f6   : > { %v2316_v26 = vsel %vm625_vm1, %v2313_v6, %v2315_v48  ;;  %v2317_v27 = vsel %vm625_vm1, %v2315_v48, %v2313_v6 }
 0x1f7   : > { %v2318_v4 = vsub.f32 %v5478_v0, %v2316_v26  ;;  %v2319_v48 = vsub.f32 %v6684_v43, %v2317_v27  ;;  %v2538_v26 = vld [vmem:[#allocation11] sm:$0xff]  ;;  %v2539_v27 = vld [vmem:[#allocation11 + $0x8] sm:$0xff] }
 0x1f8   : > { %v6032_v56 = vpop.permute.xlu1 %2326 }
 0x1f9   : > { %v6036_v59 = vpop.permute.xlu0 %2324  ;;  %v2320_v55 = vand.u32 2147483647, %v2318_v4  ;;  %v2321_v62 = vand.u32 2147483647, %v2319_v48  ;;  %v6686_v4 = vld [vmem:[#allocation98_spill] sm:$0xff]  ;;  %v6687_v48 = vld [vmem:[#allocation31_spill] sm:$0xff] }
 0x1fa   : > { %v2328_v19 = vsel %vm625_vm1, %v6036_v59, %v6032_v56  ;;  %v2329_v39 = vsel %vm625_vm1, %v6032_v56, %v6036_v59 }
 0x1fb   : > { %v2323_v35 = vadd.f32 %v2321_v62, %v2243_v61 }
 0x1fc   : > { %v2395_v54 = vpop.permute.xlu1 %2394 }
 0x1fd   : > { %v2393_v17 = vpop.permute.xlu0 %2392 }
 0x1fe   : > { %v2396_v47 = vsel %vm625_vm1, %v2393_v17, %v2395_v54  ;;  %v2397_v9 = vsel %vm625_vm1, %v2395_v54, %v2393_v17  ;;  %v6069_v17 = vadd.s32 128, %v4537_v8 }
 0x1ff   : > { %v2398_v11 = vsub.f32 %v5545_v13, %v2396_v47  ;;  %v2399_v42 = vsub.f32 %v5543_v22, %v2397_v9  ;;  %v2322_v22 = vadd.f32 %v2320_v55, %v2242_v50  ;;  %v2088_v47 = vsel %vm625_vm1, %v5964_v10, %v5962_v21 }
 0x200   : > { %v6056_v36 = vpop.permute.xlu1 %2406  ;;  %vm606_vm2 = vcmp.lt.s32.totalorder %v6069_v17, 254  ;;  %v2089_v9 = vsel %vm625_vm1, %v5962_v21, %v5964_v10  ;;  %v2090_v24 = vsub.f32 %v6687_v48, %v2088_v47  ;;  %v2171_v55 = vsub.f32 %v6690_v38, %v2169_v1 }
 0x201   : > { %v6064_v6 = vpop.permute.xlu0 %2404  ;;  %v2400_v0 = vand.u32 2147483647, %v2398_v11  ;;  %v2401_v40 = vand.u32 2147483647, %v2399_v42  ;;  %v2249_v11 = vsel %vm625_vm1, %v5992_v18, %v5994_v53  ;;  %v6689_v42 = vld [vmem:[#allocation50_spill] sm:$0xff]  ;;  %v2250_v50 = vsub.f32 %v6627_v28, %v2248_v20 }
 0x202   : > { %v2170_v58 = vsub.f32 %v6689_v42, %v2168_v34  ;;  %v2092_v62 = vmul.f32 %v2090_v24, %v2090_v24  ;;  %v2251_v18 = vsub.f32 %v5411_v63, %v2249_v11  ;;  %v2173_v56 = vmul.f32 %v2171_v55, %v2171_v55 }
 0x203   : > { %v2402_v60 = vadd.f32 %v2400_v0, %v2322_v22  ;;  %v2403_v33 = vadd.f32 %v2401_v40, %v2323_v35  ;;  %v2408_v0 = vsel %vm625_vm1, %v6064_v6, %v6056_v36  ;;  %v2409_v40 = vsel %vm625_vm1, %v6056_v36, %v6064_v6  ;;  %v6691_v22 = vld [vmem:[#allocation75_spill] sm:$0xff] }
 0x204   : > { %v2475_v54 = vpop.permute.xlu1 %2474  ;;  %v2330_v28 = vsub.f32 %v6632_v23, %v2328_v19  ;;  %v2331_v63 = vsub.f32 %v6612_v14, %v2329_v39  ;;  %v2411_v35 = vsub.f32 %v6691_v22, %v2409_v40 }
 0x209   : > { %v2473_v2 = vpop.permute.xlu0 %2472 }
 0x20a   : > { %v2476_v37 = vsel %vm625_vm1, %v2473_v2, %v2475_v54  ;;  %v2477_v13 = vsel %vm625_vm1, %v2475_v54, %v2473_v2  ;;  %v2172_v2 = vmul.f32 %v2170_v58, %v2170_v58 }
 0x20b   : > { %v2478_v46 = vsub.f32 %v5639_v44, %v2476_v37  ;;  %v2479_v29 = vsub.f32 %v5588_v16, %v2477_v13  ;;  %v2008_v44 = vsel %vm625_vm1, %v5934_v25, %v5928_v15  ;;  %v2009_v16 = vsel %vm625_vm1, %v5928_v15, %v5934_v25  ;;  %v6688_v15 = vld [vmem:[#allocation37_spill] sm:$0xff] }
 0x20c   : > { %v2010_v30 = vsub.f32 %v6685_v12, %v2008_v44  ;;  %v2011_v43 = vsub.f32 %v6686_v4, %v2009_v16  ;;  %v2091_v25 = vsub.f32 %v6688_v15, %v2089_v9  ;;  %v2252_v37 = vmul.f32 %v2250_v50, %v2250_v50  ;;  %v2547_v9 = vld [vmem:[#allocation11 + $0x20] sm:$0xff]  ;;  %v2548_v12 = vld [vmem:[#allocation11 + $0x28] sm:$0xff] }
 0x20d   : > { %v2480_v32 = vand.u32 2147483647, %v2478_v46  ;;  %v2481_v49 = vand.u32 2147483647, %v2479_v29  ;;  %v2410_v13 = vsub.f32 %v5572_v51, %v2408_v0 }
 0x20e   : > { %v2012_v21 = vmul.f32 %v2010_v30, %v2010_v30  ;;  %v2013_v10 = vmul.f32 %v2011_v43, %v2011_v43  ;;  %v2093_v54 = vmul.f32 %v2091_v25, %v2091_v25 }
 0x20f   : > { %v2482_v3 = vadd.f32 %v2480_v32, %v2402_v60  ;;  %v2483_v57 = vadd.f32 %v2481_v49, %v2403_v33  ;;  %v2332_v60 = vmul.f32 %v2330_v28, %v2330_v28  ;;  %v2333_v33 = vmul.f32 %v2331_v63, %v2331_v63 }
 0x210   : > { %v2014_v53 = vadd.f32 %v2012_v21, %v5966_v5  ;;  %v2015_v61 = vadd.f32 %v2013_v10, %v5968_v7  ;;  %v2253_v7 = vmul.f32 %v2251_v18, %v2251_v18  ;;  %v2412_v49 = vmul.f32 %v2410_v13, %v2410_v13 }
 0x211   : > { %v2541_v41 = vsel %vm606_vm2, %v2483_v57, 0.0  ;;  %v2542_v52 = vadd.f32 %v2538_v26, %v2482_v3  ;;  %v2413_v26 = vmul.f32 %v2411_v35, %v2411_v35 }
 0x212   : > { %v2543_v45 = vadd.f32 %v2541_v41, %v2539_v27  ;;  %v2094_v59 = vadd.f32 %v2092_v62, %v2014_v53  ;;  %v2095_v5 = vadd.f32 %v2093_v54, %v2015_v61  ;;  %v6692_v41 = vld [vmem:[#allocation51_spill] sm:$0xff] }
 0x213   : > { %2544 = vst [vmem:[#allocation11] sm:$0xff] %v2542_v52 }
 0x214   : > { %2545 = vst [vmem:[#allocation11 + $0x8] sm:$0xff] %v2543_v45  ;;  %v2174_v46 = vadd.f32 %v2172_v2, %v2094_v59  ;;  %v2175_v29 = vadd.f32 %v2173_v56, %v2095_v5 }
 0x216   : > { %v2254_v36 = vadd.f32 %v2252_v37, %v2174_v46  ;;  %v2255_v6 = vadd.f32 %v2253_v7, %v2175_v29 }
 0x217   : > { %v2487_v32 = vpop.permute.xlu1 %2486 }
 0x218   : > { %v2334_v3 = vadd.f32 %v2332_v60, %v2254_v36  ;;  %v2335_v51 = vadd.f32 %v2333_v33, %v2255_v6 }
 0x21a   : > { %v2414_v44 = vadd.f32 %v2412_v49, %v2334_v3  ;;  %v2415_v16 = vadd.f32 %v2413_v26, %v2335_v51 }
 0x225   : > { %v2485_v23 = vpop.permute.xlu0 %2484 }
 0x226   : > { %v2488_v14 = vsel %vm625_vm1, %v2485_v23, %v2487_v32  ;;  %v2489_v27 = vsel %vm625_vm1, %v2487_v32, %v2485_v23 }
 0x227   : > { %v2490_v57 = vsub.f32 %v5782_v31, %v2488_v14  ;;  %v2491_v52 = vsub.f32 %v6692_v41, %v2489_v27 }
 0x229   : > { %v2492_v45 = vmul.f32 %v2490_v57, %v2490_v57  ;;  %v2493_v47 = vmul.f32 %v2491_v52, %v2491_v52 }
 0x22b   : > { %v2494_v30 = vadd.f32 %v2492_v45, %v2414_v44  ;;  %v2495_v4 = vadd.f32 %v2493_v47, %v2415_v16 }
 0x22d   : > { %v2550_v8 = vsel %vm606_vm2, %v2495_v4, 0.0  ;;  %v2551_v43 = vadd.f32 %v2547_v9, %v2494_v30 }
 0x22e   : > { %v2552_v48 = vadd.f32 %v2550_v8, %v2548_v12 }
 0x22f   : > { %2553 = vst [vmem:[#allocation11 + $0x20] sm:$0xff] %v2551_v43 }
 0x230   : > { %2554 = vst [vmem:[#allocation11 + $0x28] sm:$0xff] %v2552_v48 }
 0x231   : > { %3130 = shalt.err (!%p3127_p6)
}
 0x232   : > { %s3238_s7 = smov 256   ;;  %s3239_s18 = smov 16  }
 0x233   : > { %3029 = dma.vmem_to_hbm [thread:$0]  (%p3032_p13), %s2614_s26, 2304, %s6185_s5, [#allocation4], %s3238_s7, %s3238_s7, %s3239_s18  }
 0x234   : > { %3178 = dma.done.wait (%p3032_p13), [#allocation4], 2304  }
 0x235   : > { %3180 = vsyncadd (%p3032_p13), [#allocation4], 4294964992 }
 0x236 PF: > { %s25_s23 = sadd.s32 1, %s3203_s23   ;;  %s6693_s18 = smov %s3187_s19 }
 0x237   : > { %p22_p7 = scmp.ge.s32.totalorder %s25_s23, 6   ;;  %s6694_s19 = smov %s3191_s20 }
 0x238   : > { %s6695_s20 = smov %s3321_s30  ;;  %s6696_s21 = smov %s3199_s22 }
 0x239   : > { %s6697_s22 = smov %s6699_s25  ;;  %24 = sbr.rel (!%p22_p7) target bundleno = 9 (0x9), region = 173 }
 0x23e   :  { %2629 = vsyncpa [#allocation3], 1 }
 0x23f   :  { %2631 = vsyncpa [#allocation3 + $0x1], 1 }
 0x240   :  { %2632 = vsyncpa [#allocation6], 1 }
 0x241   :  { %2634 = vsyncpa [#allocation6 + $0x1], 1 }
 0x242   :  { %2635 = vsyncpa [#allocation9], 1 }
 0x243   :  { %2637 = vsyncpa [#allocation9 + $0x1], 1 }
 0x244   :  { %2638 = vsyncpa [#allocation4], 1 }
 0x245   :  { %2640 = vsyncpa [#allocation4 + $0x1], 1 }

</bundles_post_ra>
